<compile_context>
chip_gen: v5e
topology: v5e:2x2
jax: 0.10.0
libtpu: 0.0.40
codegen_flags: <defaults>
</compile_context>

<pallas_src>
import functools

import numpy as np
import jax
import jax.numpy as jnp
from jax.experimental import pallas as pl
from jax.experimental.pallas import tpu as pltpu

_EPS = 1e-5


# --------------------------------------------------------------------------------------
# Kernel 1: [optional folded BN + ReLU on the input] -> 3x3 conv (pad=1) + bias,
#           fused per-image channel sum / sum-of-squares (training-mode BN statistics).
# --------------------------------------------------------------------------------------
def _conv3x3_kernel(x_ref, w_ref, b_ref, scale_ref, shift_ref,
                    y_ref, sum_ref, ssq_ref, xpad_ref, *, apply_act):
    # x_ref              : (1, H, W, Cin)   unpadded input, one image
    # w_ref              : (9, Cin, Cout)   3x3 HWIO weights, taps flattened
    # b_ref              : (1, Cout)        bias
    # scale_ref/shift_ref: (1, Cin)         affine folded from the *previous* BN
    #                                       (ignored when apply_act=False)
    # y_ref              : (1, H, W, Cout)  conv output (pre-BN)
    # sum_ref/ssq_ref    : (1, 1, Cout)     per-image partial channel statistics
    # xpad_ref           : VMEM scratch (H+2, W+2, Cin)
    _, H, W, Cin = x_ref.shape
    Cout = y_ref.shape[3]

    xin = x_ref[0]                                                   # (H, W, Cin)
    if apply_act:
        xin = jnp.maximum(xin * scale_ref[...] + shift_ref[...], 0.0)

    # Zero-padding is applied to the *post*-activation input, so pad inside VMEM.
    xpad_ref[...] = jnp.zeros_like(xpad_ref)
    xpad_ref[pl.ds(1, H), pl.ds(1, W), :] = xin

    # 9 shifted whole-image matmuls: M = H*W rows per MXU matmul (no per-row loop).
    acc = jnp.zeros((H * W, Cout), jnp.float32)
    for dy in range(3):
        for dx in range(3):
            patch = xpad_ref[pl.ds(dy, H), pl.ds(dx, W), :]          # (H, W, Cin)
            acc = acc + jnp.dot(patch.reshape(H * W, Cin),
                                w_ref[dy * 3 + dx],
                                preferred_element_type=jnp.float32)
    acc = acc + b_ref[...]                                           # (H*W, Cout)

    y_ref[0] = acc.reshape(H, W, Cout)
    # Single reduction over the whole image (no per-row read-modify-write).
    sum_ref[0] = jnp.sum(acc, axis=0, keepdims=True)                 # (1, Cout)
    ssq_ref[0] = jnp.sum(acc * acc, axis=0, keepdims=True)           # (1, Cout)


def conv3x3_act_stats(x, w, b, scale, shift, *, apply_act):
    """y = conv3x3(act(x)) + b, act(x) = relu(x*scale + shift) if apply_act else x.

    Returns (y, sum_c, sumsq_c): the per-channel batch sum / sum-of-squares of y."""
    N, H, W, Cin = x.shape
    Cout = w.shape[-1]
    w9 = w.reshape(9, Cin, Cout)
    kernel = functools.partial(_conv3x3_kernel, apply_act=apply_act)
    y, s, ss = pl.pallas_call(
        kernel,
        grid=(N,),
        in_specs=[
            pl.BlockSpec((1, H, W, Cin), lambda n: (n, 0, 0, 0)),
            pl.BlockSpec((9, Cin, Cout), lambda n: (0, 0, 0)),
            pl.BlockSpec((1, Cout), lambda n: (0, 0)),
            pl.BlockSpec((1, Cin), lambda n: (0, 0)),
            pl.BlockSpec((1, Cin), lambda n: (0, 0)),
        ],
        out_specs=[
            pl.BlockSpec((1, H, W, Cout), lambda n: (n, 0, 0, 0)),
            pl.BlockSpec((1, 1, Cout), lambda n: (n, 0, 0)),   # per-image partial sums
            pl.BlockSpec((1, 1, Cout), lambda n: (n, 0, 0)),
        ],
        out_shape=[
            jax.ShapeDtypeStruct((N, H, W, Cout), jnp.float32),
            jax.ShapeDtypeStruct((N, 1, Cout), jnp.float32),
            jax.ShapeDtypeStruct((N, 1, Cout), jnp.float32),
        ],
        scratch_shapes=[pltpu.VMEM((H + 2, W + 2, Cin), jnp.float32)],
        compiler_params=pltpu.CompilerParams(dimension_semantics=("parallel",)),
    )(x, w9, b.reshape(1, Cout), scale.reshape(1, Cin), shift.reshape(1, Cin))
    # Cheap (N, Cout) -> (Cout,) reduction of the partial statistics in XLA.
    return y, jnp.sum(s, axis=(0, 1)), jnp.sum(ss, axis=(0, 1))


# --------------------------------------------------------------------------------------
# Kernel 2: folded BatchNorm + ReLU + fused 2x2 max-pool (stride 2). Emits x and p.
# --------------------------------------------------------------------------------------
def _bn_relu_pool_kernel(y_ref, scale_ref, shift_ref, x_ref, p_ref, a_ref):
    # y_ref : (1, H, W, C)   pre-BN conv output
    # x_ref : (1, H, W, C)   activation output
    # p_ref : (1, H/2, W/2, C) pooled output
    # a_ref : VMEM scratch (H/2, W, C) (row-pooled intermediate)
    _, H, W, C = x_ref.shape
    x = jnp.maximum(y_ref[0] * scale_ref[...] + shift_ref[...], 0.0)     # (H, W, C)
    x_ref[0] = x

    # Pool over H: split the leading (non-tiled) dim, max over the pair axis.
    xh = x.reshape(H // 2, 2, W, C)
    a_ref[...] = jnp.maximum(xh[:, 0], xh[:, 1])                         # (H//2, W, C)

    # Pool over W: sublane-strided loads of even/odd columns, one dense store.
    even = a_ref[:, pl.ds(0, W // 2, stride=2), :]                       # (H//2, W//2, C)
    odd = a_ref[:, pl.ds(1, W // 2, stride=2), :]
    p_ref[0] = jnp.maximum(even, odd)


def bn_relu_pool(y, scale, shift):
    N, H, W, C = y.shape
    x, p = pl.pallas_call(
        _bn_relu_pool_kernel,
        grid=(N,),
        in_specs=[
            pl.BlockSpec((1, H, W, C), lambda n: (n, 0, 0, 0)),
            pl.BlockSpec((1, C), lambda n: (0, 0)),
            pl.BlockSpec((1, C), lambda n: (0, 0)),
        ],
        out_specs=[
            pl.BlockSpec((1, H, W, C), lambda n: (n, 0, 0, 0)),
            pl.BlockSpec((1, H // 2, W // 2, C), lambda n: (n, 0, 0, 0)),
        ],
        out_shape=[
            jax.ShapeDtypeStruct((N, H, W, C), jnp.float32),
            jax.ShapeDtypeStruct((N, H // 2, W // 2, C), jnp.float32),
        ],
        scratch_shapes=[pltpu.VMEM((H // 2, W, C), jnp.float32)],
        compiler_params=pltpu.CompilerParams(dimension_semantics=("parallel",)),
    )(y, scale.reshape(1, C), shift.reshape(1, C))
    return x, p


# --------------------------------------------------------------------------------------
# Glue: BN folding (training-mode batch statistics), parameters, full forward.
# --------------------------------------------------------------------------------------
def fold_bn(s, ss, count, gamma, beta, eps=_EPS):
    mean = s / count
    var = ss / count - mean * mean          # biased variance (PyTorch BN training forward)
    scale = gamma / jnp.sqrt(var + eps)
    shift = beta - mean * scale
    return scale, shift


def init_params(key, in_c, out_c):
    k0, k1, k2, k3 = jax.random.split(key, 4)
    return {
        "w1": 0.1 * jax.random.normal(k0, (3, 3, in_c, out_c), jnp.float32),   # HWIO
        "b1": 0.05 * jax.random.normal(k1, (out_c,), jnp.float32),
        "g1": jnp.ones((out_c,), jnp.float32),
        "bt1": jnp.zeros((out_c,), jnp.float32),
        "w2": 0.1 * jax.random.normal(k2, (3, 3, out_c, out_c), jnp.float32),  # HWIO
        "b2": 0.05 * jax.random.normal(k3, (out_c,), jnp.float32),
        "g2": jnp.ones((out_c,), jnp.float32),
        "bt2": jnp.zeros((out_c,), jnp.float32),
    }


def encoder_block_forward(x_nchw, params):
    """PyTorch encoder_block.forward: returns (x, p) in NCHW, matching the nn.Module."""
    x = jnp.transpose(x_nchw, (0, 2, 3, 1))  # -> NHWC
    N, H, W, Cin = x.shape
    cnt = N * H * W

    # pass 1: conv1 + stats (no input activation)
    ones_in = jnp.ones((Cin,), jnp.float32)
    zeros_in = jnp.zeros((Cin,), jnp.float32)
    y1, s1, ss1 = conv3x3_act_stats(x, params["w1"], params["b1"],
                                    ones_in, zeros_in, apply_act=False)
    sc1, sh1 = fold_bn(s1, ss1, cnt, params["g1"], params["bt1"])

    # pass 2: BN1+ReLU fused into conv2 + stats
    y2, s2, ss2 = conv3x3_act_stats(y1, params["w2"], params["b2"],
                                    sc1, sh1, apply_act=True)
    sc2, sh2 = fold_bn(s2, ss2, cnt, params["g2"], params["bt2"])

    # pass 3: BN2+ReLU + 2x2 max-pool
    x2, p = bn_relu_pool(y2, sc2, sh2)

    return jnp.transpose(x2, (0, 3, 1, 2)), jnp.transpose(p, (0, 3, 1, 2))


# --------------------------------------------------------------------------------------
# Pure-JAX reference (same math, no Pallas) for a correctness check.
# --------------------------------------------------------------------------------------
def reference_forward(x_nchw, params):
    x = jnp.transpose(x_nchw, (0, 2, 3, 1))

    def conv(h, w, b):
        return jax.lax.conv_general_dilated(
            h, w, (1, 1), "SAME",
            dimension_numbers=("NHWC", "HWIO", "NHWC"),
            precision=jax.lax.Precision.HIGHEST) + b

    def bn_relu_ref(h, g, bt):
        mean = jnp.mean(h, axis=(0, 1, 2))
        var = jnp.var(h, axis=(0, 1, 2))
        return jax.nn.relu((h - mean) / jnp.sqrt(var + _EPS) * g + bt)

    h = bn_relu_ref(conv(x, params["w1"], params["b1"]), params["g1"], params["bt1"])
    h = bn_relu_ref(conv(h, params["w2"], params["b2"]), params["g2"], params["bt2"])
    N, H, W, C = h.shape
    p = h.reshape(N, H // 2, 2, W // 2, 2, C).max(axis=(2, 4))
    return jnp.transpose(h, (0, 3, 1, 2)), jnp.transpose(p, (0, 3, 1, 2))


if __name__ == "__main__":
    key = jax.random.PRNGKey(0)
    kx, kp = jax.random.split(key)

    N, Cin, H, W, Cout = 2, 4, 16, 16, 8
    x_nchw = jax.random.normal(kx, (N, Cin, H, W), jnp.float32)
    params = init_params(kp, Cin, Cout)

    fwd = jax.jit(lambda x: encoder_block_forward(x, params))
    x_out, p_out = fwd(x_nchw)
    jax.block_until_ready((x_out, p_out))

    assert x_out.shape == (N, Cout, H, W)
    assert p_out.shape == (N, Cout, H // 2, W // 2)

    x_r, p_r = reference_forward(x_nchw, params)
    assert np.allclose(np.asarray(x_out), np.asarray(x_r), atol=1e-2, rtol=1e-2)
    assert np.allclose(np.asarray(p_out), np.asarray(p_r), atol=1e-2, rtol=1e-2)

    print("KERNEL_OK")
</pallas_src>

<mosaic_0001>
module attributes {stable_mosaic.version = 11 : i64} {
  func.func @_conv3x3_kernel(%arg0: i32, %arg1: memref<1x16x16x4xf32, #tpu.memory_space<vmem>>, %arg2: memref<9x4x8xf32, #tpu.memory_space<vmem>>, %arg3: memref<1x8xf32, #tpu.memory_space<vmem>>, %arg4: memref<1x4xf32, #tpu.memory_space<vmem>>, %arg5: memref<1x4xf32, #tpu.memory_space<vmem>>, %arg6: memref<1x16x16x8xf32, #tpu.memory_space<vmem>>, %arg7: memref<1x1x8xf32, #tpu.memory_space<vmem>>, %arg8: memref<1x1x8xf32, #tpu.memory_space<vmem>>, %arg9: memref<18x18x4xf32, #tpu.memory_space<vmem>>) attributes {dimension_semantics = [#tpu.dimension_semantics<parallel>], iteration_bounds = array<i64: 2>, scalar_prefetch = 0 : i64, scratch_operands = 1 : i64, tpu.core_type = #tpu.core_type<tc>, window_params = [{transform_indices = @transform_0, window_bounds = array<i64: 1, 16, 16, 4>}, {pipeline_mode = #tpu.pipeline_mode<synchronous>, transform_indices = @transform_1, window_bounds = array<i64: 9, 4, 8>}, {pipeline_mode = #tpu.pipeline_mode<synchronous>, transform_indices = @transform_2, window_bounds = array<i64: 1, 8>}, {pipeline_mode = #tpu.pipeline_mode<synchronous>, transform_indices = @transform_3, window_bounds = array<i64: 1, 4>}, {pipeline_mode = #tpu.pipeline_mode<synchronous>, transform_indices = @transform_4, window_bounds = array<i64: 1, 4>}, {transform_indices = @transform_5, window_bounds = array<i64: 1, 16, 16, 8>}, {transform_indices = @transform_6, window_bounds = array<i64: 1, 1, 8>}, {transform_indices = @transform_7, window_bounds = array<i64: 1, 1, 8>}]} {
    %c0 = arith.constant 0 : index
    %c0_0 = arith.constant 0 : index
    %c0_1 = arith.constant 0 : index
    %c0_2 = arith.constant 0 : index
    %0 = vector.load %arg1[%c0, %c0_0, %c0_1, %c0_2] : memref<1x16x16x4xf32, #tpu.memory_space<vmem>>, vector<1x16x16x4xf32>
    %1 = vector.shape_cast %0 : vector<1x16x16x4xf32> to vector<16x16x4xf32>
    %cst = arith.constant 0.000000e+00 : f32
    %2 = vector.broadcast %cst : f32 to vector<18x18x4xf32>
    %c0_3 = arith.constant 0 : index
    %c0_4 = arith.constant 0 : index
    %c0_5 = arith.constant 0 : index
    %3 = vector.load %arg9[%c0_3, %c0_4, %c0_5] : memref<18x18x4xf32, #tpu.memory_space<vmem>>, vector<18x18x4xf32>
    tpu.vector_store %arg9[%c0_3, %c0_4, %c0_5], %2 {strides = array<i32>} : memref<18x18x4xf32, #tpu.memory_space<vmem>>, vector<18x18x4xf32>,
    %c1 = arith.constant 1 : index
    %c1_6 = arith.constant 1 : index
    %c0_7 = arith.constant 0 : index
    %4 = vector.load %arg9[%c1, %c1_6, %c0_7] : memref<18x18x4xf32, #tpu.memory_space<vmem>>, vector<16x16x4xf32>
    tpu.vector_store %arg9[%c1, %c1_6, %c0_7], %1 {strides = array<i32>} : memref<18x18x4xf32, #tpu.memory_space<vmem>>, vector<16x16x4xf32>,
    %cst_8 = arith.constant 0.000000e+00 : f32
    %5 = vector.broadcast %cst_8 : f32 to vector<256x8xf32>
    %c0_9 = arith.constant 0 : index
    %c0_10 = arith.constant 0 : index
    %c0_11 = arith.constant 0 : index
    %6 = vector.load %arg9[%c0_9, %c0_10, %c0_11] : memref<18x18x4xf32, #tpu.memory_space<vmem>>, vector<16x16x4xf32>
    %7 = vector.shape_cast %6 : vector<16x16x4xf32> to vector<256x4xf32>
    %c0_12 = arith.constant 0 : index
    %c0_13 = arith.constant 0 : index
    %c0_14 = arith.constant 0 : index
    %8 = vector.load %arg2[%c0_12, %c0_13, %c0_14] : memref<9x4x8xf32, #tpu.memory_space<vmem>>, vector<1x4x8xf32>
    %9 = vector.shape_cast %8 : vector<1x4x8xf32> to vector<4x8xf32>
    %cst_15 = arith.constant dense<0.000000e+00> : vector<256x8xf32>
    %10 = tpu.matmul %7, %9, %cst_15 {dimension_numbers = #tpu.dot_dimension_numbers<[1], [0], [0], [1], [0, 0, 1, 1], [], []>} : vector<256x4xf32>, vector<4x8xf32>, vector<256x8xf32> -> vector<256x8xf32>
    %11 = arith.addf %5, %10 : vector<256x8xf32>
    %c0_16 = arith.constant 0 : index
    %c1_17 = arith.constant 1 : index
    %c0_18 = arith.constant 0 : index
    %12 = vector.load %arg9[%c0_16, %c1_17, %c0_18] : memref<18x18x4xf32, #tpu.memory_space<vmem>>, vector<16x16x4xf32>
    %13 = vector.shape_cast %12 : vector<16x16x4xf32> to vector<256x4xf32>
    %c1_19 = arith.constant 1 : index
    %c0_20 = arith.constant 0 : index
    %c0_21 = arith.constant 0 : index
    %14 = vector.load %arg2[%c1_19, %c0_20, %c0_21] : memref<9x4x8xf32, #tpu.memory_space<vmem>>, vector<1x4x8xf32>
    %15 = vector.shape_cast %14 : vector<1x4x8xf32> to vector<4x8xf32>
    %cst_22 = arith.constant dense<0.000000e+00> : vector<256x8xf32>
    %16 = tpu.matmul %13, %15, %cst_22 {dimension_numbers = #tpu.dot_dimension_numbers<[1], [0], [0], [1], [0, 0, 1, 1], [], []>} : vector<256x4xf32>, vector<4x8xf32>, vector<256x8xf32> -> vector<256x8xf32>
    %17 = arith.addf %11, %16 : vector<256x8xf32>
    %c0_23 = arith.constant 0 : index
    %c2 = arith.constant 2 : index
    %c0_24 = arith.constant 0 : index
    %18 = vector.load %arg9[%c0_23, %c2, %c0_24] : memref<18x18x4xf32, #tpu.memory_space<vmem>>, vector<16x16x4xf32>
    %19 = vector.shape_cast %18 : vector<16x16x4xf32> to vector<256x4xf32>
    %c2_25 = arith.constant 2 : index
    %c0_26 = arith.constant 0 : index
    %c0_27 = arith.constant 0 : index
    %20 = vector.load %arg2[%c2_25, %c0_26, %c0_27] : memref<9x4x8xf32, #tpu.memory_space<vmem>>, vector<1x4x8xf32>
    %21 = vector.shape_cast %20 : vector<1x4x8xf32> to vector<4x8xf32>
    %cst_28 = arith.constant dense<0.000000e+00> : vector<256x8xf32>
    %22 = tpu.matmul %19, %21, %cst_28 {dimension_numbers = #tpu.dot_dimension_numbers<[1], [0], [0], [1], [0, 0, 1, 1], [], []>} : vector<256x4xf32>, vector<4x8xf32>, vector<256x8xf32> -> vector<256x8xf32>
    %23 = arith.addf %17, %22 : vector<256x8xf32>
    %c1_29 = arith.constant 1 : index
    %c0_30 = arith.constant 0 : index
    %c0_31 = arith.constant 0 : index
    %24 = vector.load %arg9[%c1_29, %c0_30, %c0_31] : memref<18x18x4xf32, #tpu.memory_space<vmem>>, vector<16x16x4xf32>
    %25 = vector.shape_cast %24 : vector<16x16x4xf32> to vector<256x4xf32>
    %c3 = arith.constant 3 : index
    %c0_32 = arith.constant 0 : index
    %c0_33 = arith.constant 0 : index
    %26 = vector.load %arg2[%c3, %c0_32, %c0_33] : memref<9x4x8xf32, #tpu.memory_space<vmem>>, vector<1x4x8xf32>
    %27 = vector.shape_cast %26 : vector<1x4x8xf32> to vector<4x8xf32>
    %cst_34 = arith.constant dense<0.000000e+00> : vector<256x8xf32>
    %28 = tpu.matmul %25, %27, %cst_34 {dimension_numbers = #tpu.dot_dimension_numbers<[1], [0], [0], [1], [0, 0, 1, 1], [], []>} : vector<256x4xf32>, vector<4x8xf32>, vector<256x8xf32> -> vector<256x8xf32>
    %29 = arith.addf %23, %28 : vector<256x8xf32>
    %c1_35 = arith.constant 1 : index
    %c1_36 = arith.constant 1 : index
    %c0_37 = arith.constant 0 : index
    %30 = vector.load %arg9[%c1_35, %c1_36, %c0_37] : memref<18x18x4xf32, #tpu.memory_space<vmem>>, vector<16x16x4xf32>
    %31 = vector.shape_cast %30 : vector<16x16x4xf32> to vector<256x4xf32>
    %c4 = arith.constant 4 : index
    %c0_38 = arith.constant 0 : index
    %c0_39 = arith.constant 0 : index
    %32 = vector.load %arg2[%c4, %c0_38, %c0_39] : memref<9x4x8xf32, #tpu.memory_space<vmem>>, vector<1x4x8xf32>
    %33 = vector.shape_cast %32 : vector<1x4x8xf32> to vector<4x8xf32>
    %cst_40 = arith.constant dense<0.000000e+00> : vector<256x8xf32>
    %34 = tpu.matmul %31, %33, %cst_40 {dimension_numbers = #tpu.dot_dimension_numbers<[1], [0], [0], [1], [0, 0, 1, 1], [], []>} : vector<256x4xf32>, vector<4x8xf32>, vector<256x8xf32> -> vector<256x8xf32>
    %35 = arith.addf %29, %34 : vector<256x8xf32>
    %c1_41 = arith.constant 1 : index
    %c2_42 = arith.constant 2 : index
    %c0_43 = arith.constant 0 : index
    %36 = vector.load %arg9[%c1_41, %c2_42, %c0_43] : memref<18x18x4xf32, #tpu.memory_space<vmem>>, vector<16x16x4xf32>
    %37 = vector.shape_cast %36 : vector<16x16x4xf32> to vector<256x4xf32>
    %c5 = arith.constant 5 : index
    %c0_44 = arith.constant 0 : index
    %c0_45 = arith.constant 0 : index
    %38 = vector.load %arg2[%c5, %c0_44, %c0_45] : memref<9x4x8xf32, #tpu.memory_space<vmem>>, vector<1x4x8xf32>
    %39 = vector.shape_cast %38 : vector<1x4x8xf32> to vector<4x8xf32>
    %cst_46 = arith.constant dense<0.000000e+00> : vector<256x8xf32>
    %40 = tpu.matmul %37, %39, %cst_46 {dimension_numbers = #tpu.dot_dimension_numbers<[1], [0], [0], [1], [0, 0, 1, 1], [], []>} : vector<256x4xf32>, vector<4x8xf32>, vector<256x8xf32> -> vector<256x8xf32>
    %41 = arith.addf %35, %40 : vector<256x8xf32>
    %c2_47 = arith.constant 2 : index
    %c0_48 = arith.constant 0 : index
    %c0_49 = arith.constant 0 : index
    %42 = vector.load %arg9[%c2_47, %c0_48, %c0_49] : memref<18x18x4xf32, #tpu.memory_space<vmem>>, vector<16x16x4xf32>
    %43 = vector.shape_cast %42 : vector<16x16x4xf32> to vector<256x4xf32>
    %c6 = arith.constant 6 : index
    %c0_50 = arith.constant 0 : index
    %c0_51 = arith.constant 0 : index
    %44 = vector.load %arg2[%c6, %c0_50, %c0_51] : memref<9x4x8xf32, #tpu.memory_space<vmem>>, vector<1x4x8xf32>
    %45 = vector.shape_cast %44 : vector<1x4x8xf32> to vector<4x8xf32>
    %cst_52 = arith.constant dense<0.000000e+00> : vector<256x8xf32>
    %46 = tpu.matmul %43, %45, %cst_52 {dimension_numbers = #tpu.dot_dimension_numbers<[1], [0], [0], [1], [0, 0, 1, 1], [], []>} : vector<256x4xf32>, vector<4x8xf32>, vector<256x8xf32> -> vector<256x8xf32>
    %47 = arith.addf %41, %46 : vector<256x8xf32>
    %c2_53 = arith.constant 2 : index
    %c1_54 = arith.constant 1 : index
    %c0_55 = arith.constant 0 : index
    %48 = vector.load %arg9[%c2_53, %c1_54, %c0_55] : memref<18x18x4xf32, #tpu.memory_space<vmem>>, vector<16x16x4xf32>
    %49 = vector.shape_cast %48 : vector<16x16x4xf32> to vector<256x4xf32>
    %c7 = arith.constant 7 : index
    %c0_56 = arith.constant 0 : index
    %c0_57 = arith.constant 0 : index
    %50 = vector.load %arg2[%c7, %c0_56, %c0_57] : memref<9x4x8xf32, #tpu.memory_space<vmem>>, vector<1x4x8xf32>
    %51 = vector.shape_cast %50 : vector<1x4x8xf32> to vector<4x8xf32>
    %cst_58 = arith.constant dense<0.000000e+00> : vector<256x8xf32>
    %52 = tpu.matmul %49, %51, %cst_58 {dimension_numbers = #tpu.dot_dimension_numbers<[1], [0], [0], [1], [0, 0, 1, 1], [], []>} : vector<256x4xf32>, vector<4x8xf32>, vector<256x8xf32> -> vector<256x8xf32>
    %53 = arith.addf %47, %52 : vector<256x8xf32>
    %c2_59 = arith.constant 2 : index
    %c2_60 = arith.constant 2 : index
    %c0_61 = arith.constant 0 : index
    %54 = vector.load %arg9[%c2_59, %c2_60, %c0_61] : memref<18x18x4xf32, #tpu.memory_space<vmem>>, vector<16x16x4xf32>
    %55 = vector.shape_cast %54 : vector<16x16x4xf32> to vector<256x4xf32>
    %c8 = arith.constant 8 : index
    %c0_62 = arith.constant 0 : index
    %c0_63 = arith.constant 0 : index
    %56 = vector.load %arg2[%c8, %c0_62, %c0_63] : memref<9x4x8xf32, #tpu.memory_space<vmem>>, vector<1x4x8xf32>
    %57 = vector.shape_cast %56 : vector<1x4x8xf32> to vector<4x8xf32>
    %cst_64 = arith.constant dense<0.000000e+00> : vector<256x8xf32>
    %58 = tpu.matmul %55, %57, %cst_64 {dimension_numbers = #tpu.dot_dimension_numbers<[1], [0], [0], [1], [0, 0, 1, 1], [], []>} : vector<256x4xf32>, vector<4x8xf32>, vector<256x8xf32> -> vector<256x8xf32>
    %59 = arith.addf %53, %58 : vector<256x8xf32>
    %c0_65 = arith.constant 0 : index
    %c0_66 = arith.constant 0 : index
    %60 = vector.load %arg3[%c0_65, %c0_66] : memref<1x8xf32, #tpu.memory_space<vmem>>, vector<1x8xf32>
    %61 = vector.broadcast %60 : vector<1x8xf32> to vector<256x8xf32>
    %62 = arith.addf %59, %61 : vector<256x8xf32>
    %63 = vector.shape_cast %62 : vector<256x8xf32> to vector<16x16x8xf32>
    %c0_67 = arith.constant 0 : index
    %c0_68 = arith.constant 0 : index
    %c0_69 = arith.constant 0 : index
    %c0_70 = arith.constant 0 : index
    %64 = vector.load %arg6[%c0_67, %c0_68, %c0_69, %c0_70] : memref<1x16x16x8xf32, #tpu.memory_space<vmem>>, vector<1x16x16x8xf32>
    %65 = vector.shape_cast %64 : vector<1x16x16x8xf32> to vector<16x16x8xf32>
    %66 = vector.shape_cast %63 : vector<16x16x8xf32> to vector<1x16x16x8xf32>
    tpu.vector_store %arg6[%c0_67, %c0_68, %c0_69, %c0_70], %66 {strides = array<i32>} : memref<1x16x16x8xf32, #tpu.memory_space<vmem>>, vector<1x16x16x8xf32>,
    %cst_71 = arith.constant dense<0.000000e+00> : vector<8xf32>
    %67 = vector.multi_reduction <add>, %62, %cst_71 [0] : vector<256x8xf32> to vector<8xf32>
    %68 = vector.shape_cast %67 : vector<8xf32> to vector<1x8xf32>
    %c0_72 = arith.constant 0 : index
    %c0_73 = arith.constant 0 : index
    %c0_74 = arith.constant 0 : index
    %69 = vector.load %arg7[%c0_72, %c0_73, %c0_74] : memref<1x1x8xf32, #tpu.memory_space<vmem>>, vector<1x1x8xf32>
    %70 = vector.shape_cast %69 : vector<1x1x8xf32> to vector<1x8xf32>
    %71 = vector.shape_cast %68 : vector<1x8xf32> to vector<1x1x8xf32>
    tpu.vector_store %arg7[%c0_72, %c0_73, %c0_74], %71 {strides = array<i32>} : memref<1x1x8xf32, #tpu.memory_space<vmem>>, vector<1x1x8xf32>,
    %72 = arith.mulf %62, %62 : vector<256x8xf32>
    %cst_75 = arith.constant dense<0.000000e+00> : vector<8xf32>
    %73 = vector.multi_reduction <add>, %72, %cst_75 [0] : vector<256x8xf32> to vector<8xf32>
    %74 = vector.shape_cast %73 : vector<8xf32> to vector<1x8xf32>
    %c0_76 = arith.constant 0 : index
    %c0_77 = arith.constant 0 : index
    %c0_78 = arith.constant 0 : index
    %75 = vector.load %arg8[%c0_76, %c0_77, %c0_78] : memref<1x1x8xf32, #tpu.memory_space<vmem>>, vector<1x1x8xf32>
    %76 = vector.shape_cast %75 : vector<1x1x8xf32> to vector<1x8xf32>
    %77 = vector.shape_cast %74 : vector<1x8xf32> to vector<1x1x8xf32>
    tpu.vector_store %arg8[%c0_76, %c0_77, %c0_78], %77 {strides = array<i32>} : memref<1x1x8xf32, #tpu.memory_space<vmem>>, vector<1x1x8xf32>,
    return
  }
  func.func @transform_0(%arg0: i32) -> (i32, i32, i32, i32) {
    %c0_i32 = arith.constant 0 : i32
    %c0_i32_0 = arith.constant 0 : i32
    %c0_i32_1 = arith.constant 0 : i32
    %c0_i32_2 = arith.constant 0 : i32
    return %arg0, %c0_i32, %c0_i32_0, %c0_i32_1 : i32, i32, i32, i32
  }
  func.func @transform_1(%arg0: i32) -> (i32, i32, i32) {
    %c0_i32 = arith.constant 0 : i32
    %c0_i32_0 = arith.constant 0 : i32
    %c0_i32_1 = arith.constant 0 : i32
    %c0_i32_2 = arith.constant 0 : i32
    return %c0_i32, %c0_i32_0, %c0_i32_1 : i32, i32, i32
  }
  func.func @transform_2(%arg0: i32) -> (i32, i32) {
    %c0_i32 = arith.constant 0 : i32
    %c0_i32_0 = arith.constant 0 : i32
    %c0_i32_1 = arith.constant 0 : i32
    return %c0_i32, %c0_i32_0 : i32, i32
  }
  func.func @transform_3(%arg0: i32) -> (i32, i32) {
    %c0_i32 = arith.constant 0 : i32
    %c0_i32_0 = arith.constant 0 : i32
    %c0_i32_1 = arith.constant 0 : i32
    return %c0_i32, %c0_i32_0 : i32, i32
  }
  func.func @transform_4(%arg0: i32) -> (i32, i32) {
    %c0_i32 = arith.constant 0 : i32
    %c0_i32_0 = arith.constant 0 : i32
    %c0_i32_1 = arith.constant 0 : i32
    return %c0_i32, %c0_i32_0 : i32, i32
  }
  func.func @transform_5(%arg0: i32) -> (i32, i32, i32, i32) {
    %c0_i32 = arith.constant 0 : i32
    %c0_i32_0 = arith.constant 0 : i32
    %c0_i32_1 = arith.constant 0 : i32
    %c0_i32_2 = arith.constant 0 : i32
    return %arg0, %c0_i32, %c0_i32_0, %c0_i32_1 : i32, i32, i32, i32
  }
  func.func @transform_6(%arg0: i32) -> (i32, i32, i32) {
    %c0_i32 = arith.constant 0 : i32
    %c0_i32_0 = arith.constant 0 : i32
    %c0_i32_1 = arith.constant 0 : i32
    return %arg0, %c0_i32, %c0_i32_0 : i32, i32, i32
  }
  func.func @transform_7(%arg0: i32) -> (i32, i32, i32) {
    %c0_i32 = arith.constant 0 : i32
    %c0_i32_0 = arith.constant 0 : i32
    %c0_i32_1 = arith.constant 0 : i32
    return %arg0, %c0_i32, %c0_i32_0 : i32, i32, i32
  }
}

module attributes {stable_mosaic.version = 11 : i64} {
  func.func @_conv3x3_kernel(%arg0: i32, %arg1: memref<1x16x16x8xf32, #tpu.memory_space<vmem>>, %arg2: memref<9x8x8xf32, #tpu.memory_space<vmem>>, %arg3: memref<1x8xf32, #tpu.memory_space<vmem>>, %arg4: memref<1x8xf32, #tpu.memory_space<vmem>>, %arg5: memref<1x8xf32, #tpu.memory_space<vmem>>, %arg6: memref<1x16x16x8xf32, #tpu.memory_space<vmem>>, %arg7: memref<1x1x8xf32, #tpu.memory_space<vmem>>, %arg8: memref<1x1x8xf32, #tpu.memory_space<vmem>>, %arg9: memref<18x18x8xf32, #tpu.memory_space<vmem>>) attributes {dimension_semantics = [#tpu.dimension_semantics<parallel>], iteration_bounds = array<i64: 2>, scalar_prefetch = 0 : i64, scratch_operands = 1 : i64, tpu.core_type = #tpu.core_type<tc>, window_params = [{transform_indices = @transform_0, window_bounds = array<i64: 1, 16, 16, 8>}, {pipeline_mode = #tpu.pipeline_mode<synchronous>, transform_indices = @transform_1, window_bounds = array<i64: 9, 8, 8>}, {pipeline_mode = #tpu.pipeline_mode<synchronous>, transform_indices = @transform_2, window_bounds = array<i64: 1, 8>}, {pipeline_mode = #tpu.pipeline_mode<synchronous>, transform_indices = @transform_3, window_bounds = array<i64: 1, 8>}, {pipeline_mode = #tpu.pipeline_mode<synchronous>, transform_indices = @transform_4, window_bounds = array<i64: 1, 8>}, {transform_indices = @transform_5, window_bounds = array<i64: 1, 16, 16, 8>}, {transform_indices = @transform_6, window_bounds = array<i64: 1, 1, 8>}, {transform_indices = @transform_7, window_bounds = array<i64: 1, 1, 8>}]} {
    %c0 = arith.constant 0 : index
    %c0_0 = arith.constant 0 : index
    %c0_1 = arith.constant 0 : index
    %c0_2 = arith.constant 0 : index
    %0 = vector.load %arg1[%c0, %c0_0, %c0_1, %c0_2] : memref<1x16x16x8xf32, #tpu.memory_space<vmem>>, vector<1x16x16x8xf32>
    %1 = vector.shape_cast %0 : vector<1x16x16x8xf32> to vector<16x16x8xf32>
    %c0_3 = arith.constant 0 : index
    %c0_4 = arith.constant 0 : index
    %2 = vector.load %arg4[%c0_3, %c0_4] : memref<1x8xf32, #tpu.memory_space<vmem>>, vector<1x8xf32>
    %3 = vector.shape_cast %2 : vector<1x8xf32> to vector<1x1x8xf32>
    %4 = vector.broadcast %3 : vector<1x1x8xf32> to vector<16x16x8xf32>
    %5 = arith.mulf %1, %4 : vector<16x16x8xf32>
    %c0_5 = arith.constant 0 : index
    %c0_6 = arith.constant 0 : index
    %6 = vector.load %arg5[%c0_5, %c0_6] : memref<1x8xf32, #tpu.memory_space<vmem>>, vector<1x8xf32>
    %7 = vector.shape_cast %6 : vector<1x8xf32> to vector<1x1x8xf32>
    %8 = vector.broadcast %7 : vector<1x1x8xf32> to vector<16x16x8xf32>
    %9 = arith.addf %5, %8 : vector<16x16x8xf32>
    %cst = arith.constant 0.000000e+00 : f32
    %10 = vector.broadcast %cst : f32 to vector<16x16x8xf32>
    %11 = arith.maximumf %9, %10 : vector<16x16x8xf32>
    %cst_7 = arith.constant 0.000000e+00 : f32
    %12 = vector.broadcast %cst_7 : f32 to vector<18x18x8xf32>
    %c0_8 = arith.constant 0 : index
    %c0_9 = arith.constant 0 : index
    %c0_10 = arith.constant 0 : index
    %13 = vector.load %arg9[%c0_8, %c0_9, %c0_10] : memref<18x18x8xf32, #tpu.memory_space<vmem>>, vector<18x18x8xf32>
    tpu.vector_store %arg9[%c0_8, %c0_9, %c0_10], %12 {strides = array<i32>} : memref<18x18x8xf32, #tpu.memory_space<vmem>>, vector<18x18x8xf32>,
    %c1 = arith.constant 1 : index
    %c1_11 = arith.constant 1 : index
    %c0_12 = arith.constant 0 : index
    %14 = vector.load %arg9[%c1, %c1_11, %c0_12] : memref<18x18x8xf32, #tpu.memory_space<vmem>>, vector<16x16x8xf32>
    tpu.vector_store %arg9[%c1, %c1_11, %c0_12], %11 {strides = array<i32>} : memref<18x18x8xf32, #tpu.memory_space<vmem>>, vector<16x16x8xf32>,
    %cst_13 = arith.constant 0.000000e+00 : f32
    %15 = vector.broadcast %cst_13 : f32 to vector<256x8xf32>
    %c0_14 = arith.constant 0 : index
    %c0_15 = arith.constant 0 : index
    %c0_16 = arith.constant 0 : index
    %16 = vector.load %arg9[%c0_14, %c0_15, %c0_16] : memref<18x18x8xf32, #tpu.memory_space<vmem>>, vector<16x16x8xf32>
    %17 = vector.shape_cast %16 : vector<16x16x8xf32> to vector<256x8xf32>
    %c0_17 = arith.constant 0 : index
    %c0_18 = arith.constant 0 : index
    %c0_19 = arith.constant 0 : index
    %18 = vector.load %arg2[%c0_17, %c0_18, %c0_19] : memref<9x8x8xf32, #tpu.memory_space<vmem>>, vector<1x8x8xf32>
    %19 = vector.shape_cast %18 : vector<1x8x8xf32> to vector<8x8xf32>
    %cst_20 = arith.constant dense<0.000000e+00> : vector<256x8xf32>
    %20 = tpu.matmul %17, %19, %cst_20 {dimension_numbers = #tpu.dot_dimension_numbers<[1], [0], [0], [1], [0, 0, 1, 1], [], []>} : vector<256x8xf32>, vector<8x8xf32>, vector<256x8xf32> -> vector<256x8xf32>
    %21 = arith.addf %15, %20 : vector<256x8xf32>
    %c0_21 = arith.constant 0 : index
    %c1_22 = arith.constant 1 : index
    %c0_23 = arith.constant 0 : index
    %22 = vector.load %arg9[%c0_21, %c1_22, %c0_23] : memref<18x18x8xf32, #tpu.memory_space<vmem>>, vector<16x16x8xf32>
    %23 = vector.shape_cast %22 : vector<16x16x8xf32> to vector<256x8xf32>
    %c1_24 = arith.constant 1 : index
    %c0_25 = arith.constant 0 : index
    %c0_26 = arith.constant 0 : index
    %24 = vector.load %arg2[%c1_24, %c0_25, %c0_26] : memref<9x8x8xf32, #tpu.memory_space<vmem>>, vector<1x8x8xf32>
    %25 = vector.shape_cast %24 : vector<1x8x8xf32> to vector<8x8xf32>
    %cst_27 = arith.constant dense<0.000000e+00> : vector<256x8xf32>
    %26 = tpu.matmul %23, %25, %cst_27 {dimension_numbers = #tpu.dot_dimension_numbers<[1], [0], [0], [1], [0, 0, 1, 1], [], []>} : vector<256x8xf32>, vector<8x8xf32>, vector<256x8xf32> -> vector<256x8xf32>
    %27 = arith.addf %21, %26 : vector<256x8xf32>
    %c0_28 = arith.constant 0 : index
    %c2 = arith.constant 2 : index
    %c0_29 = arith.constant 0 : index
    %28 = vector.load %arg9[%c0_28, %c2, %c0_29] : memref<18x18x8xf32, #tpu.memory_space<vmem>>, vector<16x16x8xf32>
    %29 = vector.shape_cast %28 : vector<16x16x8xf32> to vector<256x8xf32>
    %c2_30 = arith.constant 2 : index
    %c0_31 = arith.constant 0 : index
    %c0_32 = arith.constant 0 : index
    %30 = vector.load %arg2[%c2_30, %c0_31, %c0_32] : memref<9x8x8xf32, #tpu.memory_space<vmem>>, vector<1x8x8xf32>
    %31 = vector.shape_cast %30 : vector<1x8x8xf32> to vector<8x8xf32>
    %cst_33 = arith.constant dense<0.000000e+00> : vector<256x8xf32>
    %32 = tpu.matmul %29, %31, %cst_33 {dimension_numbers = #tpu.dot_dimension_numbers<[1], [0], [0], [1], [0, 0, 1, 1], [], []>} : vector<256x8xf32>, vector<8x8xf32>, vector<256x8xf32> -> vector<256x8xf32>
    %33 = arith.addf %27, %32 : vector<256x8xf32>
    %c1_34 = arith.constant 1 : index
    %c0_35 = arith.constant 0 : index
    %c0_36 = arith.constant 0 : index
    %34 = vector.load %arg9[%c1_34, %c0_35, %c0_36] : memref<18x18x8xf32, #tpu.memory_space<vmem>>, vector<16x16x8xf32>
    %35 = vector.shape_cast %34 : vector<16x16x8xf32> to vector<256x8xf32>
    %c3 = arith.constant 3 : index
    %c0_37 = arith.constant 0 : index
    %c0_38 = arith.constant 0 : index
    %36 = vector.load %arg2[%c3, %c0_37, %c0_38] : memref<9x8x8xf32, #tpu.memory_space<vmem>>, vector<1x8x8xf32>
    %37 = vector.shape_cast %36 : vector<1x8x8xf32> to vector<8x8xf32>
    %cst_39 = arith.constant dense<0.000000e+00> : vector<256x8xf32>
    %38 = tpu.matmul %35, %37, %cst_39 {dimension_numbers = #tpu.dot_dimension_numbers<[1], [0], [0], [1], [0, 0, 1, 1], [], []>} : vector<256x8xf32>, vector<8x8xf32>, vector<256x8xf32> -> vector<256x8xf32>
    %39 = arith.addf %33, %38 : vector<256x8xf32>
    %c1_40 = arith.constant 1 : index
    %c1_41 = arith.constant 1 : index
    %c0_42 = arith.constant 0 : index
    %40 = vector.load %arg9[%c1_40, %c1_41, %c0_42] : memref<18x18x8xf32, #tpu.memory_space<vmem>>, vector<16x16x8xf32>
    %41 = vector.shape_cast %40 : vector<16x16x8xf32> to vector<256x8xf32>
    %c4 = arith.constant 4 : index
    %c0_43 = arith.constant 0 : index
    %c0_44 = arith.constant 0 : index
    %42 = vector.load %arg2[%c4, %c0_43, %c0_44] : memref<9x8x8xf32, #tpu.memory_space<vmem>>, vector<1x8x8xf32>
    %43 = vector.shape_cast %42 : vector<1x8x8xf32> to vector<8x8xf32>
    %cst_45 = arith.constant dense<0.000000e+00> : vector<256x8xf32>
    %44 = tpu.matmul %41, %43, %cst_45 {dimension_numbers = #tpu.dot_dimension_numbers<[1], [0], [0], [1], [0, 0, 1, 1], [], []>} : vector<256x8xf32>, vector<8x8xf32>, vector<256x8xf32> -> vector<256x8xf32>
    %45 = arith.addf %39, %44 : vector<256x8xf32>
    %c1_46 = arith.constant 1 : index
    %c2_47 = arith.constant 2 : index
    %c0_48 = arith.constant 0 : index
    %46 = vector.load %arg9[%c1_46, %c2_47, %c0_48] : memref<18x18x8xf32, #tpu.memory_space<vmem>>, vector<16x16x8xf32>
    %47 = vector.shape_cast %46 : vector<16x16x8xf32> to vector<256x8xf32>
    %c5 = arith.constant 5 : index
    %c0_49 = arith.constant 0 : index
    %c0_50 = arith.constant 0 : index
    %48 = vector.load %arg2[%c5, %c0_49, %c0_50] : memref<9x8x8xf32, #tpu.memory_space<vmem>>, vector<1x8x8xf32>
    %49 = vector.shape_cast %48 : vector<1x8x8xf32> to vector<8x8xf32>
    %cst_51 = arith.constant dense<0.000000e+00> : vector<256x8xf32>
    %50 = tpu.matmul %47, %49, %cst_51 {dimension_numbers = #tpu.dot_dimension_numbers<[1], [0], [0], [1], [0, 0, 1, 1], [], []>} : vector<256x8xf32>, vector<8x8xf32>, vector<256x8xf32> -> vector<256x8xf32>
    %51 = arith.addf %45, %50 : vector<256x8xf32>
    %c2_52 = arith.constant 2 : index
    %c0_53 = arith.constant 0 : index
    %c0_54 = arith.constant 0 : index
    %52 = vector.load %arg9[%c2_52, %c0_53, %c0_54] : memref<18x18x8xf32, #tpu.memory_space<vmem>>, vector<16x16x8xf32>
    %53 = vector.shape_cast %52 : vector<16x16x8xf32> to vector<256x8xf32>
    %c6 = arith.constant 6 : index
    %c0_55 = arith.constant 0 : index
    %c0_56 = arith.constant 0 : index
    %54 = vector.load %arg2[%c6, %c0_55, %c0_56] : memref<9x8x8xf32, #tpu.memory_space<vmem>>, vector<1x8x8xf32>
    %55 = vector.shape_cast %54 : vector<1x8x8xf32> to vector<8x8xf32>
    %cst_57 = arith.constant dense<0.000000e+00> : vector<256x8xf32>
    %56 = tpu.matmul %53, %55, %cst_57 {dimension_numbers = #tpu.dot_dimension_numbers<[1], [0], [0], [1], [0, 0, 1, 1], [], []>} : vector<256x8xf32>, vector<8x8xf32>, vector<256x8xf32> -> vector<256x8xf32>
    %57 = arith.addf %51, %56 : vector<256x8xf32>
    %c2_58 = arith.constant 2 : index
    %c1_59 = arith.constant 1 : index
    %c0_60 = arith.constant 0 : index
    %58 = vector.load %arg9[%c2_58, %c1_59, %c0_60] : memref<18x18x8xf32, #tpu.memory_space<vmem>>, vector<16x16x8xf32>
    %59 = vector.shape_cast %58 : vector<16x16x8xf32> to vector<256x8xf32>
    %c7 = arith.constant 7 : index
    %c0_61 = arith.constant 0 : index
    %c0_62 = arith.constant 0 : index
    %60 = vector.load %arg2[%c7, %c0_61, %c0_62] : memref<9x8x8xf32, #tpu.memory_space<vmem>>, vector<1x8x8xf32>
    %61 = vector.shape_cast %60 : vector<1x8x8xf32> to vector<8x8xf32>
    %cst_63 = arith.constant dense<0.000000e+00> : vector<256x8xf32>
    %62 = tpu.matmul %59, %61, %cst_63 {dimension_numbers = #tpu.dot_dimension_numbers<[1], [0], [0], [1], [0, 0, 1, 1], [], []>} : vector<256x8xf32>, vector<8x8xf32>, vector<256x8xf32> -> vector<256x8xf32>
    %63 = arith.addf %57, %62 : vector<256x8xf32>
    %c2_64 = arith.constant 2 : index
    %c2_65 = arith.constant 2 : index
    %c0_66 = arith.constant 0 : index
    %64 = vector.load %arg9[%c2_64, %c2_65, %c0_66] : memref<18x18x8xf32, #tpu.memory_space<vmem>>, vector<16x16x8xf32>
    %65 = vector.shape_cast %64 : vector<16x16x8xf32> to vector<256x8xf32>
    %c8 = arith.constant 8 : index
    %c0_67 = arith.constant 0 : index
    %c0_68 = arith.constant 0 : index
    %66 = vector.load %arg2[%c8, %c0_67, %c0_68] : memref<9x8x8xf32, #tpu.memory_space<vmem>>, vector<1x8x8xf32>
    %67 = vector.shape_cast %66 : vector<1x8x8xf32> to vector<8x8xf32>
    %cst_69 = arith.constant dense<0.000000e+00> : vector<256x8xf32>
    %68 = tpu.matmul %65, %67, %cst_69 {dimension_numbers = #tpu.dot_dimension_numbers<[1], [0], [0], [1], [0, 0, 1, 1], [], []>} : vector<256x8xf32>, vector<8x8xf32>, vector<256x8xf32> -> vector<256x8xf32>
    %69 = arith.addf %63, %68 : vector<256x8xf32>
    %c0_70 = arith.constant 0 : index
    %c0_71 = arith.constant 0 : index
    %70 = vector.load %arg3[%c0_70, %c0_71] : memref<1x8xf32, #tpu.memory_space<vmem>>, vector<1x8xf32>
    %71 = vector.broadcast %70 : vector<1x8xf32> to vector<256x8xf32>
    %72 = arith.addf %69, %71 : vector<256x8xf32>
    %73 = vector.shape_cast %72 : vector<256x8xf32> to vector<16x16x8xf32>
    %c0_72 = arith.constant 0 : index
    %c0_73 = arith.constant 0 : index
    %c0_74 = arith.constant 0 : index
    %c0_75 = arith.constant 0 : index
    %74 = vector.load %arg6[%c0_72, %c0_73, %c0_74, %c0_75] : memref<1x16x16x8xf32, #tpu.memory_space<vmem>>, vector<1x16x16x8xf32>
    %75 = vector.shape_cast %74 : vector<1x16x16x8xf32> to vector<16x16x8xf32>
    %76 = vector.shape_cast %73 : vector<16x16x8xf32> to vector<1x16x16x8xf32>
    tpu.vector_store %arg6[%c0_72, %c0_73, %c0_74, %c0_75], %76 {strides = array<i32>} : memref<1x16x16x8xf32, #tpu.memory_space<vmem>>, vector<1x16x16x8xf32>,
    %cst_76 = arith.constant dense<0.000000e+00> : vector<8xf32>
    %77 = vector.multi_reduction <add>, %72, %cst_76 [0] : vector<256x8xf32> to vector<8xf32>
    %78 = vector.shape_cast %77 : vector<8xf32> to vector<1x8xf32>
    %c0_77 = arith.constant 0 : index
    %c0_78 = arith.constant 0 : index
    %c0_79 = arith.constant 0 : index
    %79 = vector.load %arg7[%c0_77, %c0_78, %c0_79] : memref<1x1x8xf32, #tpu.memory_space<vmem>>, vector<1x1x8xf32>
    %80 = vector.shape_cast %79 : vector<1x1x8xf32> to vector<1x8xf32>
    %81 = vector.shape_cast %78 : vector<1x8xf32> to vector<1x1x8xf32>
    tpu.vector_store %arg7[%c0_77, %c0_78, %c0_79], %81 {strides = array<i32>} : memref<1x1x8xf32, #tpu.memory_space<vmem>>, vector<1x1x8xf32>,
    %82 = arith.mulf %72, %72 : vector<256x8xf32>
    %cst_80 = arith.constant dense<0.000000e+00> : vector<8xf32>
    %83 = vector.multi_reduction <add>, %82, %cst_80 [0] : vector<256x8xf32> to vector<8xf32>
    %84 = vector.shape_cast %83 : vector<8xf32> to vector<1x8xf32>
    %c0_81 = arith.constant 0 : index
    %c0_82 = arith.constant 0 : index
    %c0_83 = arith.constant 0 : index
    %85 = vector.load %arg8[%c0_81, %c0_82, %c0_83] : memref<1x1x8xf32, #tpu.memory_space<vmem>>, vector<1x1x8xf32>
    %86 = vector.shape_cast %85 : vector<1x1x8xf32> to vector<1x8xf32>
    %87 = vector.shape_cast %84 : vector<1x8xf32> to vector<1x1x8xf32>
    tpu.vector_store %arg8[%c0_81, %c0_82, %c0_83], %87 {strides = array<i32>} : memref<1x1x8xf32, #tpu.memory_space<vmem>>, vector<1x1x8xf32>,
    return
  }
  func.func @transform_0(%arg0: i32) -> (i32, i32, i32, i32) {
    %c0_i32 = arith.constant 0 : i32
    %c0_i32_0 = arith.constant 0 : i32
    %c0_i32_1 = arith.constant 0 : i32
    %c0_i32_2 = arith.constant 0 : i32
    return %arg0, %c0_i32, %c0_i32_0, %c0_i32_1 : i32, i32, i32, i32
  }
  func.func @transform_1(%arg0: i32) -> (i32, i32, i32) {
    %c0_i32 = arith.constant 0 : i32
    %c0_i32_0 = arith.constant 0 : i32
    %c0_i32_1 = arith.constant 0 : i32
    %c0_i32_2 = arith.constant 0 : i32
    return %c0_i32, %c0_i32_0, %c0_i32_1 : i32, i32, i32
  }
  func.func @transform_2(%arg0: i32) -> (i32, i32) {
    %c0_i32 = arith.constant 0 : i32
    %c0_i32_0 = arith.constant 0 : i32
    %c0_i32_1 = arith.constant 0 : i32
    return %c0_i32, %c0_i32_0 : i32, i32
  }
  func.func @transform_3(%arg0: i32) -> (i32, i32) {
    %c0_i32 = arith.constant 0 : i32
    %c0_i32_0 = arith.constant 0 : i32
    %c0_i32_1 = arith.constant 0 : i32
    return %c0_i32, %c0_i32_0 : i32, i32
  }
  func.func @transform_4(%arg0: i32) -> (i32, i32) {
    %c0_i32 = arith.constant 0 : i32
    %c0_i32_0 = arith.constant 0 : i32
    %c0_i32_1 = arith.constant 0 : i32
    return %c0_i32, %c0_i32_0 : i32, i32
  }
  func.func @transform_5(%arg0: i32) -> (i32, i32, i32, i32) {
    %c0_i32 = arith.constant 0 : i32
    %c0_i32_0 = arith.constant 0 : i32
    %c0_i32_1 = arith.constant 0 : i32
    %c0_i32_2 = arith.constant 0 : i32
    return %arg0, %c0_i32, %c0_i32_0, %c0_i32_1 : i32, i32, i32, i32
  }
  func.func @transform_6(%arg0: i32) -> (i32, i32, i32) {
    %c0_i32 = arith.constant 0 : i32
    %c0_i32_0 = arith.constant 0 : i32
    %c0_i32_1 = arith.constant 0 : i32
    return %arg0, %c0_i32, %c0_i32_0 : i32, i32, i32
  }
  func.func @transform_7(%arg0: i32) -> (i32, i32, i32) {
    %c0_i32 = arith.constant 0 : i32
    %c0_i32_0 = arith.constant 0 : i32
    %c0_i32_1 = arith.constant 0 : i32
    return %arg0, %c0_i32, %c0_i32_0 : i32, i32, i32
  }
}

module attributes {stable_mosaic.version = 11 : i64} {
  func.func @_bn_relu_pool_kernel(%arg0: i32, %arg1: memref<1x16x16x8xf32, #tpu.memory_space<vmem>>, %arg2: memref<1x8xf32, #tpu.memory_space<vmem>>, %arg3: memref<1x8xf32, #tpu.memory_space<vmem>>, %arg4: memref<1x16x16x8xf32, #tpu.memory_space<vmem>>, %arg5: memref<1x8x8x8xf32, #tpu.memory_space<vmem>>, %arg6: memref<8x16x8xf32, #tpu.memory_space<vmem>>) attributes {dimension_semantics = [#tpu.dimension_semantics<parallel>], iteration_bounds = array<i64: 2>, scalar_prefetch = 0 : i64, scratch_operands = 1 : i64, tpu.core_type = #tpu.core_type<tc>, window_params = [{transform_indices = @transform_0, window_bounds = array<i64: 1, 16, 16, 8>}, {pipeline_mode = #tpu.pipeline_mode<synchronous>, transform_indices = @transform_1, window_bounds = array<i64: 1, 8>}, {pipeline_mode = #tpu.pipeline_mode<synchronous>, transform_indices = @transform_2, window_bounds = array<i64: 1, 8>}, {transform_indices = @transform_3, window_bounds = array<i64: 1, 16, 16, 8>}, {transform_indices = @transform_4, window_bounds = array<i64: 1, 8, 8, 8>}]} {
    %c0 = arith.constant 0 : index
    %c0_0 = arith.constant 0 : index
    %c0_1 = arith.constant 0 : index
    %c0_2 = arith.constant 0 : index
    %0 = vector.load %arg1[%c0, %c0_0, %c0_1, %c0_2] : memref<1x16x16x8xf32, #tpu.memory_space<vmem>>, vector<1x16x16x8xf32>
    %1 = vector.shape_cast %0 : vector<1x16x16x8xf32> to vector<16x16x8xf32>
    %c0_3 = arith.constant 0 : index
    %c0_4 = arith.constant 0 : index
    %2 = vector.load %arg2[%c0_3, %c0_4] : memref<1x8xf32, #tpu.memory_space<vmem>>, vector<1x8xf32>
    %3 = vector.shape_cast %2 : vector<1x8xf32> to vector<1x1x8xf32>
    %4 = vector.broadcast %3 : vector<1x1x8xf32> to vector<16x16x8xf32>
    %5 = arith.mulf %1, %4 : vector<16x16x8xf32>
    %c0_5 = arith.constant 0 : index
    %c0_6 = arith.constant 0 : index
    %6 = vector.load %arg3[%c0_5, %c0_6] : memref<1x8xf32, #tpu.memory_space<vmem>>, vector<1x8xf32>
    %7 = vector.shape_cast %6 : vector<1x8xf32> to vector<1x1x8xf32>
    %8 = vector.broadcast %7 : vector<1x1x8xf32> to vector<16x16x8xf32>
    %9 = arith.addf %5, %8 : vector<16x16x8xf32>
    %cst = arith.constant 0.000000e+00 : f32
    %10 = vector.broadcast %cst : f32 to vector<16x16x8xf32>
    %11 = arith.maximumf %9, %10 : vector<16x16x8xf32>
    %c0_7 = arith.constant 0 : index
    %c0_8 = arith.constant 0 : index
    %c0_9 = arith.constant 0 : index
    %c0_10 = arith.constant 0 : index
    %12 = vector.load %arg4[%c0_7, %c0_8, %c0_9, %c0_10] : memref<1x16x16x8xf32, #tpu.memory_space<vmem>>, vector<1x16x16x8xf32>
    %13 = vector.shape_cast %12 : vector<1x16x16x8xf32> to vector<16x16x8xf32>
    %14 = vector.shape_cast %11 : vector<16x16x8xf32> to vector<1x16x16x8xf32>
    tpu.vector_store %arg4[%c0_7, %c0_8, %c0_9, %c0_10], %14 {strides = array<i32>} : memref<1x16x16x8xf32, #tpu.memory_space<vmem>>, vector<1x16x16x8xf32>,
    %15 = vector.shape_cast %11 : vector<16x16x8xf32> to vector<8x2x16x8xf32>
    %16 = vector.extract_strided_slice %15 {offsets = [0, 0, 0, 0], sizes = [8, 1, 16, 8], strides = [1, 1, 1, 1]} : vector<8x2x16x8xf32> to vector<8x1x16x8xf32>
    %17 = vector.shape_cast %16 : vector<8x1x16x8xf32> to vector<8x16x8xf32>
    %18 = vector.extract_strided_slice %15 {offsets = [0, 1, 0, 0], sizes = [8, 1, 16, 8], strides = [1, 1, 1, 1]} : vector<8x2x16x8xf32> to vector<8x1x16x8xf32>
    %19 = vector.shape_cast %18 : vector<8x1x16x8xf32> to vector<8x16x8xf32>
    %20 = arith.maximumf %17, %19 : vector<8x16x8xf32>
    %c0_11 = arith.constant 0 : index
    %c0_12 = arith.constant 0 : index
    %c0_13 = arith.constant 0 : index
    %21 = vector.load %arg6[%c0_11, %c0_12, %c0_13] : memref<8x16x8xf32, #tpu.memory_space<vmem>>, vector<8x16x8xf32>
    tpu.vector_store %arg6[%c0_11, %c0_12, %c0_13], %20 {strides = array<i32>} : memref<8x16x8xf32, #tpu.memory_space<vmem>>, vector<8x16x8xf32>,
    %c0_14 = arith.constant 0 : index
    %c0_15 = arith.constant 0 : index
    %c0_16 = arith.constant 0 : index
    %22 = tpu.strided_load %arg6[%c0_14, %c0_15, %c0_16] {strides = array<i32: 1, 2, 1>} : memref<8x16x8xf32, #tpu.memory_space<vmem>>, vector<8x8x8xf32>
    %c0_17 = arith.constant 0 : index
    %c1 = arith.constant 1 : index
    %c0_18 = arith.constant 0 : index
    %23 = tpu.strided_load %arg6[%c0_17, %c1, %c0_18] {strides = array<i32: 1, 2, 1>} : memref<8x16x8xf32, #tpu.memory_space<vmem>>, vector<8x8x8xf32>
    %24 = arith.maximumf %22, %23 : vector<8x8x8xf32>
    %c0_19 = arith.constant 0 : index
    %c0_20 = arith.constant 0 : index
    %c0_21 = arith.constant 0 : index
    %c0_22 = arith.constant 0 : index
    %25 = vector.load %arg5[%c0_19, %c0_20, %c0_21, %c0_22] : memref<1x8x8x8xf32, #tpu.memory_space<vmem>>, vector<1x8x8x8xf32>
    %26 = vector.shape_cast %25 : vector<1x8x8x8xf32> to vector<8x8x8xf32>
    %27 = vector.shape_cast %24 : vector<8x8x8xf32> to vector<1x8x8x8xf32>
    tpu.vector_store %arg5[%c0_19, %c0_20, %c0_21, %c0_22], %27 {strides = array<i32>} : memref<1x8x8x8xf32, #tpu.memory_space<vmem>>, vector<1x8x8x8xf32>,
    return
  }
  func.func @transform_0(%arg0: i32) -> (i32, i32, i32, i32) {
    %c0_i32 = arith.constant 0 : i32
    %c0_i32_0 = arith.constant 0 : i32
    %c0_i32_1 = arith.constant 0 : i32
    %c0_i32_2 = arith.constant 0 : i32
    return %arg0, %c0_i32, %c0_i32_0, %c0_i32_1 : i32, i32, i32, i32
  }
  func.func @transform_1(%arg0: i32) -> (i32, i32) {
    %c0_i32 = arith.constant 0 : i32
    %c0_i32_0 = arith.constant 0 : i32
    %c0_i32_1 = arith.constant 0 : i32
    return %c0_i32, %c0_i32_0 : i32, i32
  }
  func.func @transform_2(%arg0: i32) -> (i32, i32) {
    %c0_i32 = arith.constant 0 : i32
    %c0_i32_0 = arith.constant 0 : i32
    %c0_i32_1 = arith.constant 0 : i32
    return %c0_i32, %c0_i32_0 : i32, i32
  }
  func.func @transform_3(%arg0: i32) -> (i32, i32, i32, i32) {
    %c0_i32 = arith.constant 0 : i32
    %c0_i32_0 = arith.constant 0 : i32
    %c0_i32_1 = arith.constant 0 : i32
    %c0_i32_2 = arith.constant 0 : i32
    return %arg0, %c0_i32, %c0_i32_0, %c0_i32_1 : i32, i32, i32, i32
  }
  func.func @transform_4(%arg0: i32) -> (i32, i32, i32, i32) {
    %c0_i32 = arith.constant 0 : i32
    %c0_i32_0 = arith.constant 0 : i32
    %c0_i32_1 = arith.constant 0 : i32
    %c0_i32_2 = arith.constant 0 : i32
    return %arg0, %c0_i32, %c0_i32_0, %c0_i32_1 : i32, i32, i32, i32
  }
}

</mosaic_0001>

<bundles_post_ra>
// kernel: _lambda_.5
= control target key start
LH: loop header
LB: loop body
LE: loop exit
PB: predicated region body
PF: predicated region fallthrough
CT: control target
= control target key end

     0   :  { %s606_s15 = smov 0   ;;  %s959_s0 = inlined_call_operand.vmem [shape: f32[2,16,16,8], index: 0, kind: input, shape index: {}]   ;;  %s960_s1 = inlined_call_operand.vmem [shape: f32[1,8], index: 1, kind: input, shape index: {}]   ;;  %s961_s2 = inlined_call_operand.vmem [shape: f32[1,8], index: 2, kind: input, shape index: {}]   ;;  %s962_s3 = inlined_call_operand.vmem [shape: f32[2,16,16,8], index: 3, kind: output, shape index: {0}]   ;;  %s963_s4 = inlined_call_operand.vmem [shape: f32[2,8,8,8], index: 4, kind: output, shape index: {1}]  }
   0x1 LB: > { %s547_s16 = sadd.s32 4294967295, %s579_s15   ;;  %p551_p0 = scmp.ge.s32.totalorder %s579_s15, 1  ;;  %s579_s15 = sphi %s606_s15, %s15_s15  }
   0x2   : > { %p165_p1 = scmp.lt.s32.totalorder %s579_s15, 3 }
   0x4   : > { %p166_p2 = pnand %p551_p0, %p165_p1 }
   0x5   : > { %p196_p3 = scmp.lt.s32.totalorder (!%p166_p2), %s547_s16, 1 }
   0x6   : > { %169 = sbr.rel (%p166_p2) target bundleno = 77 (0x4d), region = 32 }
   0xb   : > { %s965_s16 = smov (!%p196_p3, %s547_s16), 1  ;;  %v619_v0 = vld [vmem:[%s960_s1] ss:$0 sm:$0xff]  ;;  %vm347_vm0 = vcmask 64512  }
   0xc   : > { %s560_s19 = sshll.u32 %s965_s16, 8  ;;  %v630_v1 = vld [vmem:[%s961_s2] ss:$0 sm:$0xff]  ;;  %s562_s28 = sshll.u32 %s965_s16, 6 }
   0xd   : > { %s625_s22 = scalar_lea.vmem %s959_s0, %s560_s19  ;;  %s667_s27 = scalar_lea.vmem %s962_s3, %s560_s19 }
   0xe   : > { %v211_v2 = vld [vmem:[%s625_s22] sm:$0xff]  ;;  %v213_v3 = vld [vmem:[%s625_s22 + $0x10] sm:$0xff]  ;;  %v212_v4 = vld [vmem:[%s625_s22 + $0x8] sm:$0xff]  ;;  %s210_s5 = scalar_lea.vmem %s963_s4, %s562_s28 }
   0xf   : > { %v247_v5 = vmul.f32 %v619_v0, %v211_v2  ;;  %v249_v6 = vmul.f32 %v619_v0, %v213_v3  ;;  %v214_v7 = vld [vmem:[%s625_s22 + $0x18] sm:$0xff]  ;;  %v248_v8 = vmul.f32 %v619_v0, %v212_v4  ;;  %v215_v9 = vld [vmem:[%s625_s22 + $0x20] sm:$0xff]  ;;  %v217_v10 = vld [vmem:[%s625_s22 + $0x30] sm:$0xff] }
  0x10   : > { %v250_v11 = vmul.f32 %v619_v0, %v214_v7  ;;  %v251_v12 = vmul.f32 %v619_v0, %v215_v9  ;;  %v253_v13 = vmul.f32 %v619_v0, %v217_v10  ;;  %v216_v14 = vld [vmem:[%s625_s22 + $0x28] sm:$0xff]  ;;  %v218_v15 = vld [vmem:[%s625_s22 + $0x38] sm:$0xff]  ;;  %v219_v24 = vld [vmem:[%s625_s22 + $0x40] sm:$0xff] }
  0x11   : > { %v283_v16 = vadd.f32 %v630_v1, %v247_v5  ;;  %v648_v17 = vadd.f32 %v630_v1, %v249_v6  ;;  %v284_v18 = vadd.f32 %v630_v1, %v248_v8  ;;  %v252_v19 = vmul.f32 %v619_v0, %v216_v14  ;;  %v221_v25 = vld [vmem:[%s625_s22 + $0x50] sm:$0xff]  ;;  %v220_v30 = vld [vmem:[%s625_s22 + $0x48] sm:$0xff]  ;;  %v222_v35 = vld [vmem:[%s625_s22 + $0x58] sm:$0xff] }
  0x12   : > { %v653_v20 = vadd.f32 %v630_v1, %v250_v11  ;;  %v656_v21 = vadd.f32 %v630_v1, %v251_v12  ;;  %v659_v22 = vadd.f32 %v630_v1, %v253_v13  ;;  %v254_v23 = vmul.f32 %v619_v0, %v218_v15  ;;  %v223_v36 = vld [vmem:[%s625_s22 + $0x60] sm:$0xff]  ;;  %v225_v41 = vld [vmem:[%s625_s22 + $0x70] sm:$0xff]  ;;  %v224_v42 = vld [vmem:[%s625_s22 + $0x68] sm:$0xff] }
  0x13   : > { %v315_v26 = vmax.f32 %v283_v16, 0.0  ;;  %v317_v27 = vmax.f32 %v648_v17, 0.0  ;;  %v316_v28 = vmax.f32 %v284_v18, 0.0  ;;  %v671_v29 = vadd.f32 %v630_v1, %v252_v19  ;;  %v226_v51 = vld [vmem:[%s625_s22 + $0x78] sm:$0xff]  ;;  %v227_v56 = vld [vmem:[%s625_s22 + $0x80] sm:$0xff]  ;;  %v229_v61 = vld [vmem:[%s625_s22 + $0x90] sm:$0xff] }
  0x14   : > { %v318_v31 = vmax.f32 %v653_v20, 0.0  ;;  %v319_v32 = vmax.f32 %v656_v21, 0.0  ;;  %v321_v33 = vmax.f32 %v659_v22, 0.0  ;;  %v678_v34 = vadd.f32 %v630_v1, %v254_v23  ;;  %v228_v4 = vld [vmem:[%s625_s22 + $0x88] sm:$0xff]  ;;  %v230_v5 = vld [vmem:[%s625_s22 + $0x98] sm:$0xff]  ;;  %v231_v10 = vld [vmem:[%s625_s22 + $0xa0] sm:$0xff] }
  0x15   : > { %v380_v37 = vmax.f32 %v315_v26, %v317_v27  ;;  %v320_v38 = vmax.f32 %v671_v29, 0.0  ;;  %v255_v39 = vmul.f32 %v619_v0, %v219_v24  ;;  %v257_v40 = vmul.f32 %v619_v0, %v221_v25  ;;  %348 = vst.msk [vmem:[%s667_s27] sm:$0xff] %vm347_vm0, %v315_v26  ;;  %v233_v15 = vld [vmem:[%s625_s22 + $0xb0] sm:$0xff]  ;;  %v232_v20 = vld [vmem:[%s625_s22 + $0xa8] sm:$0xff] }
  0x16   : > { %v381_v43 = vmax.f32 %v316_v28, %v318_v31  ;;  %v382_v44 = vmax.f32 %v319_v32, %v321_v33  ;;  %v322_v45 = vmax.f32 %v678_v34, 0.0  ;;  %v256_v46 = vmul.f32 %v619_v0, %v220_v30  ;;  %349 = vst.msk [vmem:[%s667_s27 + $0x8] sm:$0xff] %vm347_vm0, %v316_v28 }
  0x17   : > { %396 = vst.msk [vmem:[#allocation2] sm:$0xff] %vm347_vm0, %v380_v37  ;;  %v699_v47 = vadd.f32 %v630_v1, %v255_v39  ;;  %v702_v48 = vadd.f32 %v630_v1, %v257_v40  ;;  %v258_v49 = vmul.f32 %v619_v0, %v222_v35  ;;  %v259_v50 = vmul.f32 %v619_v0, %v223_v36  ;;  %v235_v36 = vld [vmem:[%s625_s22 + $0xc0] sm:$0xff]  ;;  %v237_v40 = vld [vmem:[%s625_s22 + $0xd0] sm:$0xff] }
  0x18   : > { %397 = vst.msk [vmem:[#allocation2 + $0x8] sm:$0xff] %vm347_vm0, %v381_v43  ;;  %v383_v52 = vmax.f32 %v320_v38, %v322_v45  ;;  %v713_v53 = vadd.f32 %v630_v1, %v256_v46  ;;  %v261_v54 = vmul.f32 %v619_v0, %v225_v41  ;;  %v260_v55 = vmul.f32 %v619_v0, %v224_v42  ;;  %v236_v46 = vld [vmem:[%s625_s22 + $0xc8] sm:$0xff] }
  0x19   : > { %398 = vst.msk [vmem:[#allocation2 + $0x10] sm:$0xff] %vm347_vm0, %v382_v44  ;;  %v323_v57 = vmax.f32 %v699_v47, 0.0  ;;  %v325_v58 = vmax.f32 %v702_v48, 0.0  ;;  %v722_v59 = vadd.f32 %v630_v1, %v258_v49  ;;  %v725_v60 = vadd.f32 %v630_v1, %v259_v50  ;;  %v238_v49 = vld [vmem:[%s625_s22 + $0xd8] sm:$0xff] }
  0x1a   : > { %399 = vst.msk [vmem:[#allocation2 + $0x18] sm:$0xff] %vm347_vm0, %v383_v52  ;;  %v324_v62 = vmax.f32 %v713_v53, 0.0  ;;  %v731_v63 = vadd.f32 %v630_v1, %v261_v54  ;;  %v262_v2 = vmul.f32 %v619_v0, %v226_v51  ;;  %v735_v3 = vadd.f32 %v630_v1, %v260_v55  ;;  %v239_v55 = vld [vmem:[%s625_s22 + $0xe0] sm:$0xff] }
  0x1b   : > { %v384_v6 = vmax.f32 %v323_v57, %v325_v58  ;;  %v326_v7 = vmax.f32 %v722_v59, 0.0  ;;  %v327_v8 = vmax.f32 %v725_v60, 0.0  ;;  %v263_v9 = vmul.f32 %v619_v0, %v227_v56  ;;  %350 = vst.msk [vmem:[%s667_s27 + $0x10] sm:$0xff] %vm347_vm0, %v317_v27  ;;  %v234_v27 = vld [vmem:[%s625_s22 + $0xb8] sm:$0xff] }
  0x1c   : > { %v329_v11 = vmax.f32 %v731_v63, 0.0  ;;  %v751_v12 = vadd.f32 %v630_v1, %v262_v2  ;;  %v328_v13 = vmax.f32 %v735_v3, 0.0  ;;  %v265_v14 = vmul.f32 %v619_v0, %v229_v61  ;;  %351 = vst.msk [vmem:[%s667_s27 + $0x18] sm:$0xff] %vm347_vm0, %v318_v31  ;;  %v241_v2 = vld [vmem:[%s625_s22 + $0xf0] sm:$0xff] }
  0x1d   : > { %400 = vst.msk [vmem:[#allocation2 + $0x20] sm:$0xff] %vm347_vm0, %v384_v6  ;;  %v385_v16 = vmax.f32 %v324_v62, %v326_v7  ;;  %v764_v17 = vadd.f32 %v630_v1, %v263_v9  ;;  %v264_v18 = vmul.f32 %v619_v0, %v228_v4  ;;  %v266_v19 = vmul.f32 %v619_v0, %v230_v5 }
  0x1e   : > { %v386_v23 = vmax.f32 %v327_v8, %v329_v11  ;;  %v330_v24 = vmax.f32 %v751_v12, 0.0  ;;  %v775_v25 = vadd.f32 %v630_v1, %v265_v14  ;;  %v267_v26 = vmul.f32 %v619_v0, %v231_v10  ;;  %352 = vst.msk [vmem:[%s667_s27 + $0x20] sm:$0xff] %vm347_vm0, %v319_v32  ;;  %v240_v10 = vld [vmem:[%s625_s22 + $0xe8] sm:$0xff] }
  0x1f   : > { %401 = vst.msk [vmem:[#allocation2 + $0x28] sm:$0xff] %vm347_vm0, %v385_v16  ;;  %v331_v28 = vmax.f32 %v764_v17, 0.0  ;;  %v786_v30 = vadd.f32 %v630_v1, %v264_v18  ;;  %v789_v31 = vadd.f32 %v630_v1, %v266_v19  ;;  %v269_v35 = vmul.f32 %v619_v0, %v233_v15  ;;  %v242_v16 = vld [vmem:[%s625_s22 + $0xf8] sm:$0xff]  ;;  %v412_v48 = vld [vmem:[#allocation2] ss:$2 sm:$0xff] }
  0x20   : > { %402 = vst.msk [vmem:[#allocation2 + $0x30] sm:$0xff] %vm347_vm0, %v386_v23  ;;  %v387_v21 = vmax.f32 %v328_v13, %v330_v24  ;;  %v333_v32 = vmax.f32 %v775_v25, 0.0  ;;  %v800_v37 = vadd.f32 %v630_v1, %v267_v26  ;;  %v268_v39 = vmul.f32 %v619_v0, %v232_v20  ;;  %v428_v53 = vld [vmem:[#allocation2 + $0x1] ss:$2 sm:$0xff] }
  0x21   : > { %v332_v41 = vmax.f32 %v786_v30, 0.0  ;;  %v334_v42 = vmax.f32 %v789_v31, 0.0  ;;  %v807_v43 = vadd.f32 %v630_v1, %v269_v35  ;;  %v270_v44 = vmul.f32 %v619_v0, %v234_v27  ;;  %353 = vst.msk [vmem:[%s667_s27 + $0x28] sm:$0xff] %vm347_vm0, %v320_v38  ;;  %v430_v59 = vld [vmem:[#allocation2 + $0x11] ss:$2 sm:$0xff] }
  0x22   : > { %403 = vst.msk [vmem:[#allocation2 + $0x38] sm:$0xff] %vm347_vm0, %v387_v21  ;;  %v388_v50 = vmax.f32 %v331_v28, %v333_v32  ;;  %v335_v51 = vmax.f32 %v800_v37, 0.0  ;;  %v823_v52 = vadd.f32 %v630_v1, %v268_v39  ;;  %v271_v54 = vmul.f32 %v619_v0, %v235_v36 }
  0x23   : > { %v389_v29 = vmax.f32 %v332_v41, %v334_v42  ;;  %v337_v38 = vmax.f32 %v807_v43, 0.0  ;;  %v306_v56 = vadd.f32 %v630_v1, %v270_v44  ;;  %v273_v61 = vmul.f32 %v619_v0, %v237_v40  ;;  %354 = vst.msk [vmem:[%s667_s27 + $0x30] sm:$0xff] %vm347_vm0, %v321_v33 }
  0x24   : > { %404 = vst.msk [vmem:[#allocation2 + $0x40] sm:$0xff] %vm347_vm0, %v388_v50  ;;  %v336_v4 = vmax.f32 %v823_v52, 0.0  ;;  %v307_v5 = vadd.f32 %v630_v1, %v271_v54  ;;  %v272_v6 = vmul.f32 %v619_v0, %v236_v46  ;;  %v274_v9 = vmul.f32 %v619_v0, %v238_v49 }
  0x25   : > { %405 = vst.msk [vmem:[#allocation2 + $0x48] sm:$0xff] %vm347_vm0, %v389_v29  ;;  %v390_v14 = vmax.f32 %v335_v51, %v337_v38  ;;  %v338_v22 = vmax.f32 %v306_v56, 0.0  ;;  %v309_v33 = vadd.f32 %v630_v1, %v273_v61  ;;  %v275_v15 = vmul.f32 %v619_v0, %v239_v55 }
  0x26   : > { %v339_v18 = vmax.f32 %v307_v5, 0.0  ;;  %v308_v19 = vadd.f32 %v630_v1, %v272_v6  ;;  %v310_v20 = vadd.f32 %v630_v1, %v274_v9  ;;  %v277_v23 = vmul.f32 %v619_v0, %v241_v2  ;;  %355 = vst.msk [vmem:[%s667_s27 + $0x38] sm:$0xff] %vm347_vm0, %v322_v45  ;;  %v416_v60 = vld [vmem:[#allocation2 + $0x20] ss:$2 sm:$0xff] }
  0x27   : > { %406 = vst.msk [vmem:[#allocation2 + $0x50] sm:$0xff] %vm347_vm0, %v390_v14  ;;  %v391_v26 = vmax.f32 %v336_v4, %v338_v22  ;;  %v341_v27 = vmax.f32 %v309_v33, 0.0  ;;  %v311_v35 = vadd.f32 %v630_v1, %v275_v15  ;;  %v276_v36 = vmul.f32 %v619_v0, %v240_v10 }
  0x28   : > { %v340_v21 = vmax.f32 %v308_v19, 0.0  ;;  %v342_v39 = vmax.f32 %v310_v20, 0.0  ;;  %v313_v40 = vadd.f32 %v630_v1, %v277_v23  ;;  %v278_v43 = vmul.f32 %v619_v0, %v242_v16  ;;  %356 = vst.msk [vmem:[%s667_s27 + $0x40] sm:$0xff] %vm347_vm0, %v323_v57 }
  0x29   : > { %407 = vst.msk [vmem:[#allocation2 + $0x58] sm:$0xff] %vm347_vm0, %v391_v26  ;;  %v392_v34 = vmax.f32 %v339_v18, %v341_v27  ;;  %v343_v45 = vmax.f32 %v311_v35, 0.0  ;;  %v312_v44 = vadd.f32 %v630_v1, %v276_v36  ;;  %v443_v63 = vmax.f32 %v412_v48, %v428_v53  ;;  %v418_v3 = vld [vmem:[#allocation2 + $0x30] ss:$2 sm:$0xff] }
  0x2a   : > { %v393_v46 = vmax.f32 %v340_v21, %v342_v39  ;;  %v345_v49 = vmax.f32 %v313_v40, 0.0  ;;  %v314_v50 = vadd.f32 %v630_v1, %v278_v43  ;;  %357 = vst.msk [vmem:[%s667_s27 + $0x48] sm:$0xff] %vm347_vm0, %v324_v62  ;;  %v432_v62 = vld [vmem:[#allocation2 + $0x21] ss:$2 sm:$0xff] }
  0x2b   : > { %408 = vst.msk [vmem:[#allocation2 + $0x60] sm:$0xff] %vm347_vm0, %v392_v34  ;;  %v344_v0 = vmax.f32 %v312_v44, 0.0 }
  0x2c   : > { %409 = vst.msk [vmem:[#allocation2 + $0x68] sm:$0xff] %vm347_vm0, %v393_v46  ;;  %v394_v47 = vmax.f32 %v343_v45, %v345_v49  ;;  %v346_v57 = vmax.f32 %v314_v50, 0.0  ;;  %v436_v12 = vld [vmem:[#allocation2 + $0x41] ss:$2 sm:$0xff] }
  0x2d   : > { %358 = vst.msk [vmem:[%s667_s27 + $0x50] sm:$0xff] %vm347_vm0, %v325_v58  ;;  %v414_v58 = vld [vmem:[#allocation2 + $0x10] ss:$2 sm:$0xff] }
  0x2e   : > { %410 = vst.msk [vmem:[#allocation2 + $0x70] sm:$0xff] %vm347_vm0, %v394_v47  ;;  %v395_v1 = vmax.f32 %v344_v0, %v346_v57 }
  0x2f   : > { %359 = vst.msk [vmem:[%s667_s27 + $0x58] sm:$0xff] %vm347_vm0, %v326_v7  ;;  %v434_v7 = vld [vmem:[#allocation2 + $0x31] ss:$2 sm:$0xff] }
  0x30   : > { %411 = vst.msk [vmem:[#allocation2 + $0x78] sm:$0xff] %vm347_vm0, %v395_v1  ;;  %v422_v17 = vld [vmem:[#allocation2 + $0x50] ss:$2 sm:$0xff]  ;;  %v446_v25 = vmax.f32 %v418_v3, %v434_v7 }
  0x31   : > { %360 = vst.msk [vmem:[%s667_s27 + $0x60] sm:$0xff] %vm347_vm0, %v327_v8  ;;  %v444_v8 = vmax.f32 %v414_v58, %v430_v59 }
  0x32   : > { %361 = vst.msk [vmem:[%s667_s27 + $0x68] sm:$0xff] %vm347_vm0, %v328_v13  ;;  %v445_v13 = vmax.f32 %v416_v60, %v432_v62 }
  0x33   : > { %362 = vst.msk [vmem:[%s667_s27 + $0x70] sm:$0xff] %vm347_vm0, %v329_v11  ;;  %v420_v11 = vld [vmem:[#allocation2 + $0x40] ss:$2 sm:$0xff]  ;;  %v440_v30 = vld [vmem:[#allocation2 + $0x61] ss:$2 sm:$0xff] }
  0x34   : > { %363 = vst.msk [vmem:[%s667_s27 + $0x78] sm:$0xff] %vm347_vm0, %v330_v24  ;;  %v438_v24 = vld [vmem:[#allocation2 + $0x51] ss:$2 sm:$0xff]  ;;  %v447_v31 = vmax.f32 %v420_v11, %v436_v12 }
  0x35   : > { %364 = vst.msk [vmem:[%s667_s27 + $0x80] sm:$0xff] %vm347_vm0, %v331_v28  ;;  %v424_v28 = vld [vmem:[#allocation2 + $0x60] ss:$2 sm:$0xff] }
  0x36   : > { %365 = vst.msk [vmem:[%s667_s27 + $0x88] sm:$0xff] %vm347_vm0, %v332_v41  ;;  %v448_v41 = vmax.f32 %v422_v17, %v438_v24 }
  0x37   : > { %366 = vst.msk [vmem:[%s667_s27 + $0x90] sm:$0xff] %vm347_vm0, %v333_v32  ;;  %v426_v32 = vld [vmem:[#allocation2 + $0x70] ss:$2 sm:$0xff]  ;;  %v442_v37 = vld [vmem:[#allocation2 + $0x71] ss:$2 sm:$0xff] }
  0x38   : > { %367 = vst.msk [vmem:[%s667_s27 + $0x98] sm:$0xff] %vm347_vm0, %v334_v42  ;;  %v449_v42 = vmax.f32 %v424_v28, %v440_v30 }
  0x39   : > { %368 = vst.msk [vmem:[%s667_s27 + $0xa0] sm:$0xff] %vm347_vm0, %v335_v51  ;;  %v450_v51 = vmax.f32 %v426_v32, %v442_v37 }
  0x3a   : > { %369 = vst.msk [vmem:[%s667_s27 + $0xa8] sm:$0xff] %vm347_vm0, %v336_v4 }
  0x3b   : > { %370 = vst.msk [vmem:[%s667_s27 + $0xb0] sm:$0xff] %vm347_vm0, %v337_v38 }
  0x3c   : > { %371 = vst.msk [vmem:[%s667_s27 + $0xb8] sm:$0xff] %vm347_vm0, %v338_v22 }
  0x3d   : > { %372 = vst.msk [vmem:[%s667_s27 + $0xc0] sm:$0xff] %vm347_vm0, %v339_v18 }
  0x3e   : > { %373 = vst.msk [vmem:[%s667_s27 + $0xc8] sm:$0xff] %vm347_vm0, %v340_v21 }
  0x3f   : > { %374 = vst.msk [vmem:[%s667_s27 + $0xd0] sm:$0xff] %vm347_vm0, %v341_v27 }
  0x40   : > { %375 = vst.msk [vmem:[%s667_s27 + $0xd8] sm:$0xff] %vm347_vm0, %v342_v39 }
  0x41   : > { %376 = vst.msk [vmem:[%s667_s27 + $0xe0] sm:$0xff] %vm347_vm0, %v343_v45 }
  0x42   : > { %377 = vst.msk [vmem:[%s667_s27 + $0xe8] sm:$0xff] %vm347_vm0, %v344_v0 }
  0x43   : > { %378 = vst.msk [vmem:[%s667_s27 + $0xf0] sm:$0xff] %vm347_vm0, %v345_v49 }
  0x44   : > { %379 = vst.msk [vmem:[%s667_s27 + $0xf8] sm:$0xff] %vm347_vm0, %v346_v57 }
  0x45   : > { %451 = vst.msk [vmem:[%s210_s5] sm:$0xff] %vm347_vm0, %v443_v63 }
  0x46   : > { %452 = vst.msk [vmem:[%s210_s5 + $0x8] sm:$0xff] %vm347_vm0, %v444_v8 }
  0x47   : > { %453 = vst.msk [vmem:[%s210_s5 + $0x10] sm:$0xff] %vm347_vm0, %v445_v13 }
  0x48   : > { %454 = vst.msk [vmem:[%s210_s5 + $0x18] sm:$0xff] %vm347_vm0, %v446_v25 }
  0x49   : > { %455 = vst.msk [vmem:[%s210_s5 + $0x20] sm:$0xff] %vm347_vm0, %v447_v31 }
  0x4a   : > { %456 = vst.msk [vmem:[%s210_s5 + $0x28] sm:$0xff] %vm347_vm0, %v448_v41 }
  0x4b   : > { %457 = vst.msk [vmem:[%s210_s5 + $0x30] sm:$0xff] %vm347_vm0, %v449_v42 }
  0x4c   : > { %458 = vst.msk [vmem:[%s210_s5 + $0x38] sm:$0xff] %vm347_vm0, %v450_v51 }
  0x4d PF: > { %s15_s15 = sadd.s32 1, %s579_s15  }
  0x4e   : > { %p12_p4 = scmp.ge.s32.totalorder %s15_s15, 4  }
  0x50   :  { %14 = sbr.rel (!%p12_p4) target bundleno = 1 (0x1), region = 89 }

// kernel: _lambda_.3
= control target key start
LH: loop header
LB: loop body
LE: loop exit
PB: predicated region body
PF: predicated region fallthrough
CT: control target
= control target key end

     0   :  { %s3584_s24 = smov 0   ;;  %s4815_s0 = inlined_call_operand.vmem [shape: f32[2,16,16,4], index: 0, kind: input, shape index: {}]   ;;  %s4816_s1 = inlined_call_operand.vmem [shape: f32[9,4,8], index: 1, kind: input, shape index: {}]   ;;  %s4817_s2 = inlined_call_operand.vmem [shape: f32[1,8], index: 2, kind: input, shape index: {}]   ;;  %s4818_s3 = inlined_call_operand.vmem [shape: f32[1,4], index: 3, kind: input, shape index: {}]   ;;  %s4819_s4 = inlined_call_operand.vmem [shape: f32[1,4], index: 4, kind: input, shape index: {}]   ;;  %s4820_s5 = inlined_call_operand.vmem [shape: f32[2,16,16,8], index: 5, kind: output, shape index: {0}]   ;;  %s4821_s6 = inlined_call_operand.vmem [shape: f32[2,1,8], index: 6, kind: output, shape index: {1}]   ;;  %s4822_s7 = inlined_call_operand.vmem [shape: f32[2,1,8], index: 7, kind: output, shape index: {2}]  }
   0x1 LB: > { %s3203_s3 = sadd.s32 4294967295, %s3541_s24   ;;  %p3207_p0 = scmp.ge.s32.totalorder %s3541_s24, 1  ;;  %s3541_s24 = sphi %s3584_s24, %s18_s24  }
   0x2   : > { %p242_p1 = scmp.lt.s32.totalorder %s3541_s24, 3 }
   0x4   : > { %p243_p2 = pnand %p3207_p0, %p242_p1 }
   0x6   : > { %246 = sbr.rel (%p243_p2) target bundleno = 796 (0x31c), region = 40 }
   0xb   : > { %v3212_v0 = vld [vmem:[%s4816_s1 + $0x4] sm:$0xf]  ;;  %vm580_vm0 = vcmask 1043456   ;;  %p280_p3 = scmp.lt.s32.totalorder %s3203_s3, 1  ;;  %vm328_vm1 = vcmask 31744   ;;  %v3543_v1 = vmov 0.0  }
   0xc   : > { %3521 = vmatpush.msk.msra.mxu1 %vm580_vm0, %v3212_v0  ;;  %3522 = vmatpush.msk.msra.mxu2 %vm580_vm0, %v3212_v0  ;;  %342 = vst.msk [vmem:[#allocation2 + $0x60] sm:$0xff] %vm328_vm1, %v3543_v1  ;;  %v3279_v4 = vld [vmem:[%s4816_s1 + $0x8] sm:$0xf]  ;;  %v3313_v5 = vld [vmem:[%s4816_s1 + $0xc] sm:$0xf]  ;;  %vm331_vm2 = vcmask 25600  }
   0xd   : > { %s4924_s3 = smov (!%p280_p3, %s3203_s3), 1  ;;  %343 = vst.msk [vmem:[#allocation2 + $0x68] sm:$0xff] %vm328_vm1, %v3543_v1  ;;  %3523 = vmatpush.msk.msra.mxu3 %vm580_vm0, %v3212_v0  ;;  %3213 = vmatpush.msk.msra.mxu0 %vm580_vm0, %v3212_v0  ;;  %v449_v6 = vld [vmem:[%s4816_s1] sm:$0xf]  ;;  %v3347_v10 = vld [vmem:[%s4816_s1 + $0x10] sm:$0xf] }
   0xe   : > { %329 = vst.msk [vmem:[#allocation2] sm:$0xff] %vm328_vm1, %v3543_v1  ;;  %s3519_s26 = sshll.u32 %s4924_s3, 8  ;;  %3280 = vmatpush.msk.msrb.mxu2 %vm580_vm0, %v3279_v4  ;;  %3246 = vmatpush.msk.msrb.mxu1 %vm580_vm0, %v449_v6  ;;  %v3415_v57 = vld [vmem:[%s4816_s1 + $0x18] sm:$0xf]  ;;  %v3449_v58 = vld [vmem:[%s4816_s1 + $0x1c] sm:$0xf]  ;;  %s292_s9 = scalar_lea.vmem %s4821_s6, %s4924_s3 }
   0xf   : > { %330 = vst.msk [vmem:[#allocation2 + $0x8] sm:$0xff] %vm328_vm1, %v3543_v1  ;;  %s3615_s29 = scalar_lea.vmem %s4815_s0, %s3519_s26  ;;  %3314 = vmatpush.msk.msrb.mxu3 %vm580_vm0, %v3313_v5  ;;  %3348 = vmatpush.msk.msrb.mxu0 %vm580_vm0, %v3347_v10  ;;  %v3381_v59 = vld [vmem:[%s4816_s1 + $0x14] sm:$0xf]  ;;  %v3483_v0 = vld [vmem:[%s4816_s1 + $0x20] sm:$0xf]  ;;  %s4546_s28 = scalar_lea.vmem %s4820_s5, %s3519_s26  ;;  %vm2892_vm3 = vcmask 64512  }
  0x10   : > { %333 = vst.msk [vmem:[#allocation2 + $0x18] sm:$0xff] %vm328_vm1, %v3543_v1  ;;  %v302_v2 = vld [vmem:[%s3615_s29 + $0x30] sm:$0xff]  ;;  %v303_v11 = vld [vmem:[%s3615_s29 + $0x38] sm:$0xff]  ;;  %v304_v18 = vld [vmem:[%s3615_s29 + $0x40] sm:$0xff]  ;;  %vm2994_vm4 = vcmask 57344   ;;  %s295_s12 = scalar_lea.vmem %s4822_s7, %s4924_s3 }
  0x11   : > { %334 = vst.msk [vmem:[#allocation2 + $0x20] sm:$0xff] %vm328_vm1, %v3543_v1  ;;  %v310_v7 = vld [vmem:[%s3615_s29 + $0x70] sm:$0xff]  ;;  %v311_v16 = vld [vmem:[%s3615_s29 + $0x78] sm:$0xff]  ;;  %v312_v19 = vld [vmem:[%s3615_s29 + $0x80] sm:$0xff] }
  0x12   : > { %391 = vst.msk [vmem:[#allocation2 + $0x61] sm:$0xff] %vm328_vm1, %v302_v2  ;;  %v318_v9 = vld [vmem:[%s3615_s29 + $0xb0] sm:$0xff]  ;;  %v319_v17 = vld [vmem:[%s3615_s29 + $0xb8] sm:$0xff]  ;;  %v320_v20 = vld [vmem:[%s3615_s29 + $0xc0] sm:$0xff] }
  0x13   : > { %336 = vst.msk [vmem:[#allocation2 + $0x30] sm:$0xff] %vm328_vm1, %v3543_v1  ;;  %v305_v21 = vld [vmem:[%s3615_s29 + $0x48] sm:$0xff]  ;;  %v296_v23 = vld [vmem:[%s3615_s29] sm:$0xff]  ;;  %v306_v25 = vld [vmem:[%s3615_s29 + $0x50] sm:$0xff] }
  0x14   : > { %337 = vst.msk [vmem:[#allocation2 + $0x38] sm:$0xff] %vm328_vm1, %v3543_v1  ;;  %v313_v22 = vld [vmem:[%s3615_s29 + $0x88] sm:$0xff]  ;;  %v314_v27 = vld [vmem:[%s3615_s29 + $0x90] sm:$0xff]  ;;  %v307_v32 = vld [vmem:[%s3615_s29 + $0x58] sm:$0xff] }
  0x15   : > { %339 = vst.msk [vmem:[#allocation2 + $0x48] sm:$0xff] %vm328_vm1, %v3543_v1  ;;  %v321_v24 = vld [vmem:[%s3615_s29 + $0xc8] sm:$0xff]  ;;  %v322_v31 = vld [vmem:[%s3615_s29 + $0xd0] sm:$0xff]  ;;  %v315_v33 = vld [vmem:[%s3615_s29 + $0x98] sm:$0xff] }
  0x16   : > { %340 = vst.msk [vmem:[#allocation2 + $0x50] sm:$0xff] %vm328_vm1, %v3543_v1  ;;  %v450_v8 = vld [vmem:[#allocation2 + $0x1] sm:$0xff]  ;;  %v298_v34 = vld [vmem:[%s3615_s29 + $0x10] sm:$0xff]  ;;  %v323_v36 = vld [vmem:[%s3615_s29 + $0xd8] sm:$0xff] }
  0x17   : > { %345 = vst.msk [vmem:[#allocation2 + $0x78] sm:$0xff] %vm328_vm1, %v3543_v1  ;;  %3214 = vmatmul.msk.f32.vlgmr.msra.gmra.mxu0 %vm328_vm1, %v450_v8  ;;  %v297_v29 = vld [vmem:[%s3615_s29 + $0x8] sm:$0xff]  ;;  %v308_v39 = vld [vmem:[%s3615_s29 + $0x60] sm:$0xff]  ;;  %v299_v42 = vld [vmem:[%s3615_s29 + $0x18] sm:$0xff] }
  0x18   : > { %346 = vst.msk [vmem:[#allocation2 + $0x80] sm:$0xff] %vm328_vm1, %v3543_v1  ;;  %v316_v41 = vld [vmem:[%s3615_s29 + $0xa0] sm:$0xff]  ;;  %v309_v44 = vld [vmem:[%s3615_s29 + $0x68] sm:$0xff]  ;;  %3484 = vmatpush.msk.msra.mxu0 %vm580_vm0, %v3483_v0 }
  0x19   : > { %v3635_v3 = vld [vmem:[#allocation2 + $0x61] sm:$0xff]  ;;  %348 = vst.msk [vmem:[#allocation2 + $0x90] sm:$0xff] %vm328_vm1, %v3543_v1 }
  0x1a   : > { %3222 = vmatmul.msk.f32.vlgmr.msra.gmra.mxu1 %vm328_vm1, %v3635_v3  ;;  %349 = vst.msk [vmem:[#allocation2 + $0x98] sm:$0xff] %vm328_vm1, %v3543_v1  ;;  %v324_v43 = vld [vmem:[%s3615_s29 + $0xe0] sm:$0xff]  ;;  %v317_v45 = vld [vmem:[%s3615_s29 + $0xa8] sm:$0xff] }
  0x1b   : > { %351 = vst.msk [vmem:[#allocation2 + $0xa8] sm:$0xff] %vm328_vm1, %v3543_v1  ;;  %v300_v47 = vld [vmem:[%s3615_s29 + $0x20] sm:$0xff]  ;;  %v325_v49 = vld [vmem:[%s3615_s29 + $0xe8] sm:$0xff]  ;;  %3382 = vmatpush.msk.msra.mxu1 %vm580_vm0, %v3381_v59 }
  0x1c   : > { %352 = vst.msk [vmem:[#allocation2 + $0xb0] sm:$0xff] %vm328_vm1, %v3543_v1  ;;  %v301_v52 = vld [vmem:[%s3615_s29 + $0x28] sm:$0xff] }
  0x1d   : > { %354 = vst.msk [vmem:[#allocation2 + $0xc0] sm:$0xff] %vm328_vm1, %v3543_v1  ;;  %v909_v10 = vld [vmem:[#allocation2 + $0x2] sm:$0xff] }
  0x1e   : > { %355 = vst.msk [vmem:[#allocation2 + $0xc8] sm:$0xff] %vm328_vm1, %v3543_v1 }
  0x1f   : > { %357 = vst.msk [vmem:[#allocation2 + $0xd8] sm:$0xff] %vm328_vm1, %v3543_v1 }
  0x20   : > { %358 = vst.msk [vmem:[#allocation2 + $0xe0] sm:$0xff] %vm328_vm1, %v3543_v1 }
  0x21   : > { %360 = vst.msk [vmem:[#allocation2 + $0xf0] sm:$0xff] %vm328_vm1, %v3543_v1 }
  0x22   : > { %361 = vst.msk [vmem:[#allocation2 + $0xf8] sm:$0xff] %vm328_vm1, %v3543_v1 }
  0x23   : > { %363 = vst.msk [vmem:[#allocation2 + $0x108] sm:$0xff] %vm328_vm1, %v3543_v1 }
  0x24   : > { %364 = vst.msk [vmem:[#allocation2 + $0x110] sm:$0xff] %vm328_vm1, %v3543_v1 }
  0x25   : > { %366 = vst.msk [vmem:[#allocation2 + $0x120] sm:$0xff] %vm328_vm1, %v3543_v1 }
  0x26   : > { %367 = vst.msk [vmem:[#allocation2 + $0x128] sm:$0xff] %vm328_vm1, %v3543_v1 }
  0x27   : > { %369 = vst.msk [vmem:[#allocation2 + $0x138] sm:$0xff] %vm328_vm1, %v3543_v1 }
  0x28   : > { %370 = vst.msk [vmem:[#allocation2 + $0x140] sm:$0xff] %vm328_vm1, %v3543_v1 }
  0x29   : > { %372 = vst.msk [vmem:[#allocation2 + $0x150] sm:$0xff] %vm328_vm1, %v3543_v1 }
  0x2a   : > { %373 = vst.msk [vmem:[#allocation2 + $0x158] sm:$0xff] %vm328_vm1, %v3543_v1 }
  0x2b   : > { %375 = vst.msk [vmem:[#allocation2 + $0x168] sm:$0xff] %vm328_vm1, %v3543_v1 }
  0x2c   : > { %376 = vst.msk [vmem:[#allocation2 + $0x170] sm:$0xff] %vm328_vm1, %v3543_v1 }
  0x2d   : > { %378 = vst.msk [vmem:[#allocation2 + $0x180] sm:$0xff] %vm328_vm1, %v3543_v1 }
  0x2e   : > { %379 = vst.msk [vmem:[#allocation2 + $0x188] sm:$0xff] %vm328_vm1, %v3543_v1 }
  0x2f   : > { %381 = vst.msk [vmem:[#allocation2 + $0x198] sm:$0xff] %vm328_vm1, %v3543_v1 }
  0x30   : > { %382 = vst.msk [vmem:[#allocation2 + $0x1a0] sm:$0xff] %vm328_vm1, %v3543_v1 }
  0x31   : > { %399 = vst.msk [vmem:[#allocation2 + $0xc1] sm:$0xff] %vm328_vm1, %v310_v7 }
  0x32   : > { %407 = vst.msk [vmem:[#allocation2 + $0x121] sm:$0xff] %vm328_vm1, %v318_v9  ;;  %v417_v9 = vld [vmem:[#allocation2] sm:$0xff] }
  0x33   : > { %344 = vst.msk [vmem:[#allocation2 + $0x70] sm:$0x3] %vm331_vm2, %v3543_v1 }
  0x34   : > { %392 = vst.msk [vmem:[#allocation2 + $0x69] sm:$0xff] %vm328_vm1, %v303_v11 }
  0x35   : > { %332 = vst.msk [vmem:[#allocation2 + $0x10] sm:$0x3] %vm331_vm2, %v3543_v1 }
  0x36   : > { %335 = vst.msk [vmem:[#allocation2 + $0x28] sm:$0x3] %vm331_vm2, %v3543_v1 }
  0x37   : > { %338 = vst.msk [vmem:[#allocation2 + $0x40] sm:$0x3] %vm331_vm2, %v3543_v1 }
  0x38   : > { %v3718_v12 = vld [vmem:[#allocation2 + $0xc1] sm:$0xff]  ;;  %341 = vst.msk [vmem:[#allocation2 + $0x58] sm:$0x3] %vm331_vm2, %v3543_v1 }
  0x39   : > { %3230 = vmatmul.msk.f32.vlgmr.msra.gmra.mxu2 %vm328_vm1, %v3718_v12  ;;  %v3724_v13 = vld [vmem:[#allocation2 + $0x121] sm:$0xff]  ;;  %347 = vst.msk [vmem:[#allocation2 + $0x88] sm:$0x3] %vm331_vm2, %v3543_v1 }
  0x3a   : > { %3238 = vmatmul.msk.f32.vlgmr.msra.gmra.mxu3 %vm328_vm1, %v3724_v13  ;;  %350 = vst.msk [vmem:[#allocation2 + $0xa0] sm:$0x3] %vm331_vm2, %v3543_v1  ;;  %3416 = vmatpush.msk.msra.mxu2 %vm580_vm0, %v3415_v57 }
  0x3b   : > { %v3732_v14 = vld [vmem:[#allocation2 + $0x69] sm:$0xff]  ;;  %353 = vst.msk [vmem:[#allocation2 + $0xb8] sm:$0x3] %vm331_vm2, %v3543_v1  ;;  %3450 = vmatpush.msk.msra.mxu3 %vm580_vm0, %v3449_v58 }
  0x3c   : > { %3223 = vmatmul.msk.f32.gmra.mxu1 %vm328_vm1, %v3732_v14  ;;  %356 = vst.msk [vmem:[#allocation2 + $0xd0] sm:$0x3] %vm331_vm2, %v3543_v1  ;;  %v451_v15 = vld [vmem:[#allocation2 + $0x9] sm:$0xff] }
  0x3d   : > { %359 = vst.msk [vmem:[#allocation2 + $0xe8] sm:$0x3] %vm331_vm2, %v3543_v1  ;;  %3215 = vmatmul.msk.f32.gmra.mxu0 %vm328_vm1, %v451_v15  ;;  %v418_v15 = vld [vmem:[#allocation2 + $0x8] sm:$0xff] }
  0x3e   : > { %362 = vst.msk [vmem:[#allocation2 + $0x100] sm:$0x3] %vm331_vm2, %v3543_v1 }
  0x3f   : > { %365 = vst.msk [vmem:[#allocation2 + $0x118] sm:$0x3] %vm331_vm2, %v3543_v1 }
  0x40   : > { %368 = vst.msk [vmem:[#allocation2 + $0x130] sm:$0x3] %vm331_vm2, %v3543_v1 }
  0x41   : > { %371 = vst.msk [vmem:[#allocation2 + $0x148] sm:$0x3] %vm331_vm2, %v3543_v1 }
  0x42   : > { %374 = vst.msk [vmem:[#allocation2 + $0x160] sm:$0x3] %vm331_vm2, %v3543_v1 }
  0x43   : > { %377 = vst.msk [vmem:[#allocation2 + $0x178] sm:$0x3] %vm331_vm2, %v3543_v1 }
  0x44   : > { %380 = vst.msk [vmem:[#allocation2 + $0x190] sm:$0x3] %vm331_vm2, %v3543_v1 }
  0x45   : > { %383 = vst.msk [vmem:[#allocation2 + $0x1a8] sm:$0x3] %vm331_vm2, %v3543_v1 }
  0x46   : > { %400 = vst.msk [vmem:[#allocation2 + $0xc9] sm:$0xff] %vm328_vm1, %v311_v16  ;;  %v910_v16 = vld [vmem:[#allocation2 + $0xa] sm:$0xff] }
  0x47   : > { %408 = vst.msk [vmem:[#allocation2 + $0x129] sm:$0xff] %vm328_vm1, %v319_v17 }
  0x48   : > { %393 = vst.msk [vmem:[#allocation2 + $0x79] sm:$0xff] %vm328_vm1, %v304_v18 }
  0x49   : > { %401 = vst.msk [vmem:[#allocation2 + $0xd9] sm:$0xff] %vm328_vm1, %v312_v19 }
  0x4a   : > { %409 = vst.msk [vmem:[#allocation2 + $0x139] sm:$0xff] %vm328_vm1, %v320_v20 }
  0x4b   : > { %394 = vst.msk [vmem:[#allocation2 + $0x81] sm:$0xff] %vm328_vm1, %v305_v21 }
  0x4c   : > { %402 = vst.msk [vmem:[#allocation2 + $0xe1] sm:$0xff] %vm328_vm1, %v313_v22 }
  0x4d   : > { %v3776_v26 = vld [vmem:[#allocation2 + $0xc9] sm:$0xff]  ;;  %385 = vst.msk [vmem:[#allocation2 + $0x19] sm:$0xff] %vm328_vm1, %v296_v23 }
  0x4e   : > { %3231 = vmatmul.msk.f32.gmra.mxu2 %vm328_vm1, %v3776_v26  ;;  %v3782_v28 = vld [vmem:[#allocation2 + $0x129] sm:$0xff]  ;;  %410 = vst.msk [vmem:[#allocation2 + $0x141] sm:$0xff] %vm328_vm1, %v321_v24 }
  0x4f   : > { %3239 = vmatmul.msk.f32.gmra.mxu3 %vm328_vm1, %v3782_v28  ;;  %v3788_v30 = vld [vmem:[#allocation2 + $0x79] sm:$0xff]  ;;  %395 = vst.msk [vmem:[#allocation2 + $0x91] sm:$0xff] %vm328_vm1, %v306_v25 }
  0x50   : > { %3224 = vmatmul.msk.f32.gmra.mxu1 %vm328_vm1, %v3788_v30  ;;  %403 = vst.msk [vmem:[#allocation2 + $0xf1] sm:$0xff] %vm328_vm1, %v314_v27  ;;  %v3800_v35 = vld [vmem:[#allocation2 + $0xd9] sm:$0xff] }
  0x51   : > { %386 = vst.msk [vmem:[#allocation2 + $0x21] sm:$0xff] %vm328_vm1, %v297_v29  ;;  %v3804_v37 = vld [vmem:[#allocation2 + $0x139] sm:$0xff] }
  0x52   : > { %411 = vst.msk [vmem:[#allocation2 + $0x151] sm:$0xff] %vm328_vm1, %v322_v31  ;;  %v3810_v40 = vld [vmem:[#allocation2 + $0x81] sm:$0xff] }
  0x53   : > { %396 = vst.msk [vmem:[#allocation2 + $0x99] sm:$0xff] %vm328_vm1, %v307_v32  ;;  %v3834_v48 = vld [vmem:[#allocation2 + $0xe1] sm:$0xff] }
  0x54   : > { %v3806_v38 = vld [vmem:[#allocation2 + $0x19] sm:$0xff]  ;;  %404 = vst.msk [vmem:[#allocation2 + $0xf9] sm:$0xff] %vm328_vm1, %v315_v33  ;;  %v4005_v33 = vld [vmem:[#allocation2 + $0x68] sm:$0xff] }
  0x55   : > { %3216 = vmatmul.msk.f32.gmra.mxu0 %vm328_vm1, %v3806_v38  ;;  %387 = vst.msk [vmem:[#allocation2 + $0x31] sm:$0xff] %vm328_vm1, %v298_v34  ;;  %v3838_v50 = vld [vmem:[#allocation2 + $0x141] sm:$0xff]  ;;  %v1187_v11 = vld [vmem:[#allocation2 + $0x18] sm:$0xff] }
  0x56   : > { %3232 = vmatmul.msk.f32.gmra.mxu2 %vm328_vm1, %v3800_v35  ;;  %412 = vst.msk [vmem:[#allocation2 + $0x159] sm:$0xff] %vm328_vm1, %v323_v36  ;;  %v3841_v51 = vld [vmem:[#allocation2 + $0x91] sm:$0xff]  ;;  %v3991_v29 = vld [vmem:[#allocation2 + $0x60] sm:$0xff] }
  0x57   : > { %3240 = vmatmul.msk.f32.gmra.mxu3 %vm328_vm1, %v3804_v37  ;;  %397 = vst.msk [vmem:[#allocation2 + $0xa9] sm:$0xff] %vm328_vm1, %v308_v39  ;;  %v3857_v54 = vld [vmem:[#allocation2 + $0xf1] sm:$0xff]  ;;  %v4017_v34 = vld [vmem:[#allocation2 + $0x62] sm:$0xff] }
  0x58   : > { %3225 = vmatmul.msk.f32.gmra.mxu1 %vm328_vm1, %v3810_v40  ;;  %405 = vst.msk [vmem:[#allocation2 + $0x109] sm:$0xff] %vm328_vm1, %v316_v41  ;;  %v3830_v46 = vld [vmem:[#allocation2 + $0x21] sm:$0xff] }
  0x59   : > { %388 = vst.msk [vmem:[#allocation2 + $0x39] sm:$0xff] %vm328_vm1, %v299_v42  ;;  %v3859_v55 = vld [vmem:[#allocation2 + $0x151] sm:$0xff]  ;;  %v1188_v17 = vld [vmem:[#allocation2 + $0x20] sm:$0xff] }
  0x5a   : > { %413 = vst.msk [vmem:[#allocation2 + $0x169] sm:$0xff] %vm328_vm1, %v324_v43  ;;  %v3861_v56 = vld [vmem:[#allocation2 + $0x99] sm:$0xff]  ;;  %v3953_v20 = vld [vmem:[#allocation2 + $0x22] sm:$0xff]  ;;  %v4037_v42 = vld [vmem:[#allocation2 + $0x6a] sm:$0xff] }
  0x5b   : > { %398 = vst.msk [vmem:[#allocation2 + $0xb1] sm:$0xff] %vm328_vm1, %v309_v44  ;;  %v3885_v61 = vld [vmem:[#allocation2 + $0xf9] sm:$0xff]  ;;  %v4077_v59 = vld [vmem:[#allocation2 + $0x82] sm:$0xff] }
  0x5c   : > { %406 = vst.msk [vmem:[#allocation2 + $0x111] sm:$0xff] %vm328_vm1, %v317_v45  ;;  %v3855_v53 = vld [vmem:[#allocation2 + $0x31] sm:$0xff]  ;;  %v3942_v18 = vld [vmem:[#allocation2 + $0x1a] sm:$0xff] }
  0x5d   : > { %3217 = vmatmul.msk.f32.gmra.mxu0 %vm328_vm1, %v3830_v46  ;;  %389 = vst.msk [vmem:[#allocation2 + $0x49] sm:$0xff] %vm328_vm1, %v300_v47  ;;  %v3887_v62 = vld [vmem:[#allocation2 + $0x159] sm:$0xff]  ;;  %v3944_v19 = vld [vmem:[#allocation2 + $0x30] sm:$0xff] }
  0x5e   : > { %3233 = vmatmul.msk.f32.gmra.mxu2 %vm328_vm1, %v3834_v48  ;;  %414 = vst.msk [vmem:[#allocation2 + $0x171] sm:$0xff] %vm328_vm1, %v325_v49  ;;  %v3889_v63 = vld [vmem:[#allocation2 + $0xa9] sm:$0xff]  ;;  %v4039_v43 = vld [vmem:[#allocation2 + $0x80] sm:$0xff]  ;;  %v4079_v0 = vld [vmem:[#allocation2 + $0x98] sm:$0xff] }
  0x5f   : > { %3241 = vmatmul.msk.f32.gmra.mxu3 %vm328_vm1, %v3838_v50  ;;  %390 = vst.msk [vmem:[#allocation2 + $0x51] sm:$0xff] %vm328_vm1, %v301_v52  ;;  %v3905_v2 = vld [vmem:[#allocation2 + $0x109] sm:$0xff]  ;;  %v4057_v47 = vld [vmem:[#allocation2 + $0x7a] sm:$0xff] }
  0x60   : > { %3226 = vmatmul.msk.f32.gmra.mxu1 %vm328_vm1, %v3841_v51  ;;  %v3883_v60 = vld [vmem:[#allocation2 + $0x39] sm:$0xff]  ;;  %4849 = vst [vmem:[#allocation3_spill] sm:$0xff] %v4005_v33  ;;  %v4059_v49 = vld [vmem:[#allocation2 + $0x90] sm:$0xff] }
  0x61   : > { %v3907_v4 = vld [vmem:[#allocation2 + $0x169] sm:$0xff]  ;;  %v3955_v21 = vld [vmem:[#allocation2 + $0x38] sm:$0xff]  ;;  %4852 = vst [vmem:[#allocation6_spill] sm:$0xff] %v4037_v42 }
  0x62   : > { %v3909_v5 = vld [vmem:[#allocation2 + $0xb1] sm:$0xff]  ;;  %v3977_v24 = vld [vmem:[#allocation2 + $0x3a] sm:$0xff]  ;;  %4853 = vst [vmem:[#allocation7_spill] sm:$0xff] %v4039_v43 }
  0x63   : > { %v3921_v7 = vld [vmem:[#allocation2 + $0x111] sm:$0xff]  ;;  %4855 = vst [vmem:[#allocation9_spill] sm:$0xff] %v4057_v47 }
  0x64   : > { %v3903_v1 = vld [vmem:[#allocation2 + $0x49] sm:$0xff]  ;;  %v3965_v22 = vld [vmem:[#allocation2 + $0x32] sm:$0xff]  ;;  %4856 = vst [vmem:[#allocation10_spill] sm:$0xff] %v4059_v49 }
  0x65   : > { %3218 = vmatmul.msk.f32.gmra.mxu0 %vm328_vm1, %v3855_v53  ;;  %v3923_v8 = vld [vmem:[#allocation2 + $0x171] sm:$0xff]  ;;  %v3967_v23 = vld [vmem:[#allocation2 + $0x48] sm:$0xff]  ;;  %4858 = vst [vmem:[#allocation12_spill] sm:$0xff] %v4077_v59 }
  0x66   : > { %3234 = vmatmul.msk.f32.gmra.mxu2 %vm328_vm1, %v3857_v54  ;;  %v3919_v6 = vld [vmem:[#allocation2 + $0x51] sm:$0xff]  ;;  %4859 = vst [vmem:[#allocation13_spill] sm:$0xff] %v4079_v0 }
  0x67   : > { %3242 = vmatmul.msk.f32.gmra.mxu3 %vm328_vm1, %v3859_v55  ;;  %v3979_v25 = vld [vmem:[#allocation2 + $0x50] sm:$0xff] }
  0x68   : > { %3227 = vmatmul.msk.f32.gmra.mxu1 %vm328_vm1, %v3861_v56  ;;  %v3989_v27 = vld [vmem:[#allocation2 + $0x4a] sm:$0xff]  ;;  %v4003_v32 = vld [vmem:[#allocation2 + $0x52] sm:$0xff] }
  0x6d   : > { %3219 = vmatmul.msk.f32.gmra.mxu0 %vm328_vm1, %v3883_v60 }
  0x6e   : > { %3235 = vmatmul.msk.f32.gmra.mxu2 %vm328_vm1, %v3885_v61 }
  0x6f   : > { %3243 = vmatmul.msk.f32.gmra.mxu3 %vm328_vm1, %v3887_v62 }
  0x70   : > { %3228 = vmatmul.msk.f32.gmra.mxu1 %vm328_vm1, %v3889_v63 }
  0x75   : > { %3220 = vmatmul.msk.f32.gmra.mxu0 %vm328_vm1, %v3903_v1 }
  0x76   : > { %3236 = vmatmul.msk.f32.gmra.mxu2 %vm328_vm1, %v3905_v2 }
  0x77   : > { %3244 = vmatmul.msk.f32.gmra.mxu3 %vm328_vm1, %v3907_v4 }
  0x78   : > { %3229 = vmatmul.msk.f32.gmra.mxu1 %vm328_vm1, %v3909_v5 }
  0x7d   : > { %3221 = vmatmul.msk.f32.gmra.mxu0 %vm328_vm1, %v3919_v6 }
  0x7e   : > { %3237 = vmatmul.msk.f32.gmra.mxu2 %vm328_vm1, %v3921_v7 }
  0x7f   : > { %3245 = vmatmul.msk.f32.gmra.mxu3 %vm328_vm1, %v3923_v8 }
  0x80   : > { %3247 = vmatmul.msk.f32.vlgmr.msrb.gmra.mxu1 %vm328_vm1, %v417_v9 }
  0x85   : > { %3349 = vmatmul.msk.f32.vlgmr.msrb.gmra.mxu0 %vm328_vm1, %v3806_v38  ;;  %v4021_v38 = vld [vmem:[#allocation2 + $0x78] sm:$0xff] }
  0x86   : > { %3281 = vmatmul.msk.f32.vlgmr.msrb.gmra.mxu2 %vm328_vm1, %v909_v10  ;;  %4850 = vst [vmem:[#allocation4_spill] sm:$0xff] %v4021_v38 }
  0x87   : > { %3315 = vmatmul.msk.f32.vlgmr.msrb.gmra.mxu3 %vm328_vm1, %v1187_v11 }
  0x88   : > { %3248 = vmatmul.msk.f32.gmra.mxu1 %vm328_vm1, %v418_v15  ;;  %v4097_v15 = vld [vmem:[#allocation2 + $0x92] sm:$0xff] }
  0x89   : > { %4861 = vst [vmem:[#allocation15_spill] sm:$0xff] %v4097_v15 }
  0x8d   : > { %3350 = vmatmul.msk.f32.gmra.mxu0 %vm328_vm1, %v3830_v46 }
  0x8e   : > { %3282 = vmatmul.msk.f32.gmra.mxu2 %vm328_vm1, %v910_v16  ;;  %v4099_v16 = vld [vmem:[#allocation2 + $0xa8] sm:$0xff] }
  0x8f   : > { %3316 = vmatmul.msk.f32.gmra.mxu3 %vm328_vm1, %v1188_v17  ;;  %4862 = vst [vmem:[#allocation16_spill] sm:$0xff] %v4099_v16 }
  0x90   : > { %3249 = vmatmul.msk.f32.gmra.mxu1 %vm328_vm1, %v1187_v11 }
  0x95   : > { %3351 = vmatmul.msk.f32.gmra.mxu0 %vm328_vm1, %v3855_v53 }
  0x96   : > { %3283 = vmatmul.msk.f32.gmra.mxu2 %vm328_vm1, %v3942_v18 }
  0x97   : > { %3317 = vmatmul.msk.f32.gmra.mxu3 %vm328_vm1, %v3944_v19  ;;  %v4001_v31 = vpop.f32.mrf.mxu1 }
  0x98   : > { %3250 = vmatmul.msk.f32.gmra.mxu1 %vm328_vm1, %v1188_v17 }
  0x9d   : > { %3352 = vmatmul.msk.f32.gmra.mxu0 %vm328_vm1, %v3883_v60 }
  0x9e   : > { %3284 = vmatmul.msk.f32.gmra.mxu2 %vm328_vm1, %v3953_v20 }
  0x9f   : > { %3318 = vmatmul.msk.f32.gmra.mxu3 %vm328_vm1, %v3955_v21 }
  0xa0   : > { %3251 = vmatmul.msk.f32.gmra.mxu1 %vm328_vm1, %v3944_v19 }
  0xa5   : > { %3353 = vmatmul.msk.f32.gmra.mxu0 %vm328_vm1, %v3903_v1 }
  0xa6   : > { %3285 = vmatmul.msk.f32.gmra.mxu2 %vm328_vm1, %v3965_v22 }
  0xa7   : > { %3319 = vmatmul.msk.f32.gmra.mxu3 %vm328_vm1, %v3967_v23 }
  0xa8   : > { %3252 = vmatmul.msk.f32.gmra.mxu1 %vm328_vm1, %v3955_v21 }
  0xad   : > { %3354 = vmatmul.msk.f32.gmra.mxu0 %vm328_vm1, %v3919_v6 }
  0xae   : > { %3286 = vmatmul.msk.f32.gmra.mxu2 %vm328_vm1, %v3977_v24 }
  0xaf   : > { %3320 = vmatmul.msk.f32.gmra.mxu3 %vm328_vm1, %v3979_v25 }
  0xb0   : > { %3253 = vmatmul.msk.f32.gmra.mxu1 %vm328_vm1, %v3967_v23 }
  0xb5   : > { %3355 = vmatmul.msk.f32.gmra.mxu0 %vm328_vm1, %v3635_v3  ;;  %v4011_v3 = vpop.f32.mrf.mxu0 }
  0xb6   : > { %3287 = vmatmul.msk.f32.gmra.mxu2 %vm328_vm1, %v3989_v27 }
  0xb7   : > { %3321 = vmatmul.msk.f32.gmra.mxu3 %vm328_vm1, %v3991_v29 }
  0xb8   : > { %3254 = vmatmul.msk.f32.gmra.mxu1 %vm328_vm1, %v3979_v25 }
  0xb9   : > { %v4019_v36 = vpop.f32.mrf.mxu1 }
  0xbd   : > { %3356 = vmatmul.msk.f32.gmra.mxu0 %vm328_vm1, %v3732_v14  ;;  %v4029_v14 = vpop.f32.mrf.mxu2  ;;  %v4031_v39 = vpop.f32.mrf.mxu3 }
  0xbe   : > { %3288 = vmatmul.msk.f32.gmra.mxu2 %vm328_vm1, %v4003_v32  ;;  %4851 = vst [vmem:[#allocation5_spill] sm:$0xff] %v4031_v39  ;;  %v4035_v41 = vpop.f32.mrf.mxu0  ;;  %v4119_v39 = vld [vmem:[#allocation2 + $0xb0] sm:$0xff] }
  0xbf   : > { %3322 = vmatmul.msk.f32.gmra.mxu3 %vm328_vm1, %v4005_v33  ;;  %4866 = vst [vmem:[#allocation20_spill] sm:$0xff] %v4119_v39 }
  0xc0   : > { %3255 = vmatmul.msk.f32.gmra.mxu1 %vm328_vm1, %v3991_v29 }
  0xc5   : > { %3357 = vmatmul.msk.f32.gmra.mxu0 %vm328_vm1, %v3788_v30 }
  0xc6   : > { %3289 = vmatmul.msk.f32.gmra.mxu2 %vm328_vm1, %v4017_v34 }
  0xc7   : > { %3323 = vmatmul.msk.f32.gmra.mxu3 %vm328_vm1, %v4021_v38 }
  0xc8   : > { %3256 = vmatmul.msk.f32.gmra.mxu1 %vm328_vm1, %v4005_v33  ;;  %v4186_v33 = vld [vmem:[#allocation2 + $0xca] sm:$0xff] }
  0xcd   : > { %v4041_v30 = vpop.f32.mrf.mxu1  ;;  %3358 = vmatmul.msk.f32.gmra.mxu0 %vm328_vm1, %v3810_v40 }
  0xce   : > { %3290 = vmatmul.msk.f32.gmra.mxu2 %vm328_vm1, %v4037_v42 }
  0xcf   : > { %3324 = vmatmul.msk.f32.gmra.mxu3 %vm328_vm1, %v4039_v43 }
  0xd0   : > { %3257 = vmatmul.msk.f32.gmra.mxu1 %vm328_vm1, %v4021_v38  ;;  %v4159_v38 = vld [vmem:[#allocation2 + $0xc8] sm:$0xff] }
  0xd1   : > { %v4051_v44 = vpop.f32.mrf.mxu2 }
  0xd2   : > { %v4053_v45 = vpop.f32.mrf.mxu3  ;;  %v4055_v46 = vpop.f32.mrf.mxu0 }
  0xd3   : > { %4854 = vst [vmem:[#allocation8_spill] sm:$0xff] %v4053_v45  ;;  %v4117_v45 = vld [vmem:[#allocation2 + $0x9a] sm:$0xff] }
  0xd4   : > { %4865 = vst [vmem:[#allocation19_spill] sm:$0xff] %v4117_v45 }
  0xd5   : > { %v4061_v40 = vpop.f32.mrf.mxu1  ;;  %3359 = vmatmul.msk.f32.gmra.mxu0 %vm328_vm1, %v3841_v51 }
  0xd6   : > { %3291 = vmatmul.msk.f32.gmra.mxu2 %vm328_vm1, %v4057_v47  ;;  %v4175_v47 = vld [vmem:[#allocation2 + $0xd8] sm:$0xff] }
  0xd7   : > { %3325 = vmatmul.msk.f32.gmra.mxu3 %vm328_vm1, %v4059_v49 }
  0xd8   : > { %3258 = vmatmul.msk.f32.gmra.mxu1 %vm328_vm1, %v4039_v43  ;;  %v4139_v43 = vld [vmem:[#allocation2 + $0xc0] sm:$0xff] }
  0xd9   : > { %v4071_v52 = vpop.f32.mrf.mxu2  ;;  %4870 = vst [vmem:[#allocation24_spill] sm:$0xff] %v4139_v43 }
  0xda   : > { %v4073_v57 = vpop.f32.mrf.mxu3  ;;  %v4075_v58 = vpop.f32.mrf.mxu0 }
  0xdb   : > { %4857 = vst [vmem:[#allocation11_spill] sm:$0xff] %v4073_v57 }
  0xdd   : > { %v4081_v51 = vpop.f32.mrf.mxu1  ;;  %3360 = vmatmul.msk.f32.gmra.mxu0 %vm328_vm1, %v3861_v56 }
  0xde   : > { %3292 = vmatmul.msk.f32.gmra.mxu2 %vm328_vm1, %v4077_v59  ;;  %v4157_v59 = vld [vmem:[#allocation2 + $0xb2] sm:$0xff] }
  0xdf   : > { %3326 = vmatmul.msk.f32.gmra.mxu3 %vm328_vm1, %v4079_v0  ;;  %4873 = vst [vmem:[#allocation27_spill] sm:$0xff] %v4157_v59 }
  0xe0   : > { %3259 = vmatmul.msk.f32.gmra.mxu1 %vm328_vm1, %v4059_v49 }
  0xe1   : > { %v4091_v9 = vpop.f32.mrf.mxu2 }
  0xe2   : > { %v4093_v10 = vpop.f32.mrf.mxu3  ;;  %v4095_v11 = vpop.f32.mrf.mxu0 }
  0xe3   : > { %4860 = vst [vmem:[#allocation14_spill] sm:$0xff] %v4093_v10 }
  0xe5   : > { %v4101_v56 = vpop.f32.mrf.mxu1  ;;  %3361 = vmatmul.msk.f32.gmra.mxu0 %vm328_vm1, %v3889_v63 }
  0xe6   : > { %3293 = vmatmul.msk.f32.gmra.mxu2 %vm328_vm1, %v4097_v15  ;;  %v4137_v15 = vld [vmem:[#allocation2 + $0xaa] sm:$0xff] }
  0xe7   : > { %3327 = vmatmul.msk.f32.gmra.mxu3 %vm328_vm1, %v4099_v16  ;;  %4869 = vst [vmem:[#allocation23_spill] sm:$0xff] %v4137_v15 }
  0xe8   : > { %3260 = vmatmul.msk.f32.gmra.mxu1 %vm328_vm1, %v4079_v0 }
  0xe9   : > { %v4111_v17 = vpop.f32.mrf.mxu2 }
  0xea   : > { %4863 = vst [vmem:[#allocation17_spill] sm:$0xff] %v4111_v17  ;;  %v4113_v10 = vpop.f32.mrf.mxu3  ;;  %v4115_v57 = vpop.f32.mrf.mxu0  ;;  %v4188_v17 = vld [vmem:[#allocation2 + $0xe0] sm:$0xff] }
  0xeb   : > { %4864 = vst [vmem:[#allocation18_spill] sm:$0xff] %v4113_v10 }
  0xed   : > { %v4121_v63 = vpop.f32.mrf.mxu1  ;;  %3362 = vmatmul.msk.f32.gmra.mxu0 %vm328_vm1, %v3909_v5 }
  0xee   : > { %3294 = vmatmul.msk.f32.gmra.mxu2 %vm328_vm1, %v4117_v45 }
  0xef   : > { %3328 = vmatmul.msk.f32.gmra.mxu3 %vm328_vm1, %v4119_v39 }
  0xf0   : > { %3261 = vmatmul.msk.f32.gmra.mxu1 %vm328_vm1, %v4099_v16 }
  0xf1   : > { %v4131_v10 = vpop.f32.mrf.mxu2 }
  0xf2   : > { %4867 = vst [vmem:[#allocation21_spill] sm:$0xff] %v4131_v10  ;;  %v4133_v0 = vpop.f32.mrf.mxu3  ;;  %v4135_v49 = vpop.f32.mrf.mxu0 }
  0xf3   : > { %4868 = vst [vmem:[#allocation22_spill] sm:$0xff] %v4133_v0 }
  0xf5   : > { %v4141_v5 = vpop.f32.mrf.mxu1  ;;  %3363 = vmatmul.msk.f32.gmra.mxu0 %vm328_vm1, %v3718_v12 }
  0xf6   : > { %3295 = vmatmul.msk.f32.gmra.mxu2 %vm328_vm1, %v4137_v15 }
  0xf7   : > { %3329 = vmatmul.msk.f32.gmra.mxu3 %vm328_vm1, %v4139_v43 }
  0xf8   : > { %3262 = vmatmul.msk.f32.gmra.mxu1 %vm328_vm1, %v4119_v39 }
  0xf9   : > { %v4151_v0 = vpop.f32.mrf.mxu2 }
  0xfa   : > { %4871 = vst [vmem:[#allocation25_spill] sm:$0xff] %v4151_v0  ;;  %v4153_v16 = vpop.f32.mrf.mxu3  ;;  %v4155_v45 = vpop.f32.mrf.mxu0  ;;  %v4173_v0 = vld [vmem:[#allocation2 + $0xc2] sm:$0xff] }
  0xfb   : > { %4872 = vst [vmem:[#allocation26_spill] sm:$0xff] %v4153_v16 }
  0xfc   : > { %4876 = vst [vmem:[#allocation30_spill] sm:$0xff] %v4173_v0 }
  0xfd   : > { %v813_v12 = vpop.f32.mrf.mxu1  ;;  %3364 = vmatmul.msk.f32.gmra.mxu0 %vm328_vm1, %v3776_v26 }
  0xfe   : > { %3296 = vmatmul.msk.f32.gmra.mxu2 %vm328_vm1, %v4157_v59  ;;  %v814_v26 = vadd.f32 %v813_v12, %v4011_v3 }
  0xff   : > { %3330 = vmatmul.msk.f32.gmra.mxu3 %vm328_vm1, %v4159_v38 }
 0x100   : > { %3263 = vmatmul.msk.f32.gmra.mxu1 %vm328_vm1, %v4139_v43 }
 0x101   : > { %v4169_v16 = vpop.f32.mrf.mxu2 }
 0x102   : > { %4874 = vst [vmem:[#allocation28_spill] sm:$0xff] %v4169_v16  ;;  %v4171_v39 = vpop.f32.mrf.mxu3  ;;  %v1615_v15 = vpop.f32.mrf.mxu0 }
 0x103   : > { %4875 = vst [vmem:[#allocation29_spill] sm:$0xff] %v4171_v39 }
 0x105   : > { %v816_v10 = vpop.f32.mrf.mxu1  ;;  %3365 = vmatmul.msk.f32.gmra.mxu0 %vm328_vm1, %v3800_v35 }
 0x106   : > { %3297 = vmatmul.msk.f32.gmra.mxu2 %vm328_vm1, %v4173_v0  ;;  %v817_v3 = vadd.f32 %v816_v10, %v4035_v41 }
 0x107   : > { %3331 = vmatmul.msk.f32.gmra.mxu3 %vm328_vm1, %v4175_v47 }
 0x108   : > { %3264 = vmatmul.msk.f32.gmra.mxu1 %vm328_vm1, %v4159_v38 }
 0x109   : > { %v1059_v39 = vpop.f32.mrf.mxu2 }
 0x10a   : > { %v1155_v43 = vadd.f32 %v1059_v39, %v814_v26  ;;  %v1337_v59 = vpop.f32.mrf.mxu3  ;;  %v1618_v16 = vpop.f32.mrf.mxu0  ;;  %v4201_v26 = vld [vmem:[#allocation2 + $0xda] sm:$0xff] }
 0x10c   : > { %v1433_v42 = vadd.f32 %v1337_v59, %v1155_v43 }
 0x10d   : > { %v819_v35 = vpop.f32.mrf.mxu1  ;;  %3366 = vmatmul.msk.f32.gmra.mxu0 %vm328_vm1, %v3834_v48 }
 0x10e   : > { %v4192_v0 = vadd.f32 %v1615_v15, %v1433_v42  ;;  %3298 = vmatmul.msk.f32.gmra.mxu2 %vm328_vm1, %v4186_v33  ;;  %v4203_v42 = vld [vmem:[#allocation2 + $0xf0] sm:$0xff]  ;;  %v820_v41 = vadd.f32 %v819_v35, %v4055_v46 }
 0x10f   : > { %3332 = vmatmul.msk.f32.gmra.mxu3 %vm328_vm1, %v4188_v17 }
 0x110   : > { %4877 = vst [vmem:[#allocation31_spill] sm:$0xff] %v4192_v0  ;;  %3265 = vmatmul.msk.f32.gmra.mxu1 %vm328_vm1, %v4175_v47 }
 0x111   : > { %v1062_v39 = vpop.f32.mrf.mxu2 }
 0x112   : > { %v1156_v43 = vadd.f32 %v1062_v39, %v817_v3  ;;  %v1340_v59 = vpop.f32.mrf.mxu3  ;;  %v1621_v12 = vpop.f32.mrf.mxu0 }
 0x114   : > { %v1434_v48 = vadd.f32 %v1340_v59, %v1156_v43  ;;  %v4216_v59 = vld [vmem:[#allocation2 + $0xe2] sm:$0xff] }
 0x115   : > { %v822_v15 = vpop.f32.mrf.mxu1  ;;  %3367 = vmatmul.msk.f32.gmra.mxu0 %vm328_vm1, %v3857_v54 }
 0x116   : > { %v4207_v0 = vadd.f32 %v1618_v16, %v1434_v48  ;;  %3299 = vmatmul.msk.f32.gmra.mxu2 %vm328_vm1, %v4201_v26  ;;  %v4218_v16 = vld [vmem:[#allocation2 + $0xf8] sm:$0xff]  ;;  %v823_v46 = vadd.f32 %v822_v15, %v4075_v58 }
 0x117   : > { %3333 = vmatmul.msk.f32.gmra.mxu3 %vm328_vm1, %v4203_v42 }
 0x118   : > { %4878 = vst [vmem:[#allocation32_spill] sm:$0xff] %v4207_v0  ;;  %3266 = vmatmul.msk.f32.gmra.mxu1 %vm328_vm1, %v4188_v17 }
 0x119   : > { %v1065_v10 = vpop.f32.mrf.mxu2 }
 0x11a   : > { %v1157_v3 = vadd.f32 %v1065_v10, %v820_v41  ;;  %v1343_v39 = vpop.f32.mrf.mxu3  ;;  %v1624_v43 = vpop.f32.mrf.mxu0 }
 0x11c   : > { %v1435_v54 = vadd.f32 %v1343_v39, %v1157_v3  ;;  %v4231_v39 = vld [vmem:[#allocation2 + $0xf2] sm:$0xff] }
 0x11d   : > { %v825_v48 = vpop.f32.mrf.mxu1  ;;  %3368 = vmatmul.msk.f32.gmra.mxu0 %vm328_vm1, %v3885_v61 }
 0x11e   : > { %v4222_v0 = vadd.f32 %v1621_v12, %v1435_v54  ;;  %3300 = vmatmul.msk.f32.gmra.mxu2 %vm328_vm1, %v4216_v59  ;;  %v4233_v12 = vld [vmem:[#allocation2 + $0x108] sm:$0xff]  ;;  %v826_v58 = vadd.f32 %v825_v48, %v4095_v11 }
 0x11f   : > { %3334 = vmatmul.msk.f32.gmra.mxu3 %vm328_vm1, %v4218_v16 }
 0x120   : > { %4879 = vst [vmem:[#allocation33_spill] sm:$0xff] %v4222_v0  ;;  %3267 = vmatmul.msk.f32.gmra.mxu1 %vm328_vm1, %v4203_v42 }
 0x121   : > { %v1068_v35 = vpop.f32.mrf.mxu2 }
 0x122   : > { %v1158_v41 = vadd.f32 %v1068_v35, %v823_v46  ;;  %v1346_v10 = vpop.f32.mrf.mxu3  ;;  %v1627_v3 = vpop.f32.mrf.mxu0 }
 0x124   : > { %v1436_v61 = vadd.f32 %v1346_v10, %v1158_v41  ;;  %v4246_v10 = vld [vmem:[#allocation2 + $0xfa] sm:$0xff] }
 0x125   : > { %v828_v54 = vpop.f32.mrf.mxu1  ;;  %3369 = vmatmul.msk.f32.gmra.mxu0 %vm328_vm1, %v3905_v2 }
 0x126   : > { %v4237_v0 = vadd.f32 %v1624_v43, %v1436_v61  ;;  %3301 = vmatmul.msk.f32.gmra.mxu2 %vm328_vm1, %v4231_v39  ;;  %v4248_v43 = vld [vmem:[#allocation2 + $0x110] sm:$0xff]  ;;  %v829_v11 = vadd.f32 %v828_v54, %v4115_v57 }
 0x127   : > { %3335 = vmatmul.msk.f32.gmra.mxu3 %vm328_vm1, %v4233_v12  ;;  %4881 = vst [vmem:[#allocation35_spill] sm:$0xff] %v4248_v43 }
 0x128   : > { %4880 = vst [vmem:[#allocation34_spill] sm:$0xff] %v4237_v0  ;;  %3268 = vmatmul.msk.f32.gmra.mxu1 %vm328_vm1, %v4218_v16 }
 0x129   : > { %v1071_v15 = vpop.f32.mrf.mxu2 }
 0x12a   : > { %v1159_v46 = vadd.f32 %v1071_v15, %v826_v58  ;;  %v1349_v35 = vpop.f32.mrf.mxu3  ;;  %v1630_v41 = vpop.f32.mrf.mxu0 }
 0x12c   : > { %v1437_v2 = vadd.f32 %v1349_v35, %v1159_v46  ;;  %v4261_v35 = vld [vmem:[#allocation2 + $0x10a] sm:$0xff] }
 0x12d   : > { %v831_v61 = vpop.f32.mrf.mxu1  ;;  %3370 = vmatmul.msk.f32.gmra.mxu0 %vm328_vm1, %v3921_v7 }
 0x12e   : > { %v4252_v0 = vadd.f32 %v1627_v3, %v1437_v2  ;;  %3302 = vmatmul.msk.f32.gmra.mxu2 %vm328_vm1, %v4246_v10  ;;  %v4263_v3 = vld [vmem:[#allocation2 + $0x120] sm:$0xff]  ;;  %v832_v57 = vadd.f32 %v831_v61, %v4135_v49 }
 0x12f   : > { %3336 = vmatmul.msk.f32.gmra.mxu3 %vm328_vm1, %v4248_v43  ;;  %4883 = vst [vmem:[#allocation37_spill] sm:$0xff] %v4263_v3 }
 0x130   : > { %4882 = vst [vmem:[#allocation36_spill] sm:$0xff] %v4252_v0  ;;  %3269 = vmatmul.msk.f32.gmra.mxu1 %vm328_vm1, %v4233_v12 }
 0x131   : > { %v1074_v48 = vpop.f32.mrf.mxu2 }
 0x132   : > { %v1160_v58 = vadd.f32 %v1074_v48, %v829_v11  ;;  %v1352_v15 = vpop.f32.mrf.mxu3  ;;  %v1633_v46 = vpop.f32.mrf.mxu0 }
 0x134   : > { %v1438_v7 = vadd.f32 %v1352_v15, %v1160_v58  ;;  %v4276_v15 = vld [vmem:[#allocation2 + $0x112] sm:$0xff] }
 0x135   : > { %v834_v2 = vpop.f32.mrf.mxu1  ;;  %3371 = vmatmul.msk.f32.gmra.mxu0 %vm328_vm1, %v3724_v13 }
 0x136   : > { %v4267_v0 = vadd.f32 %v1630_v41, %v1438_v7  ;;  %3303 = vmatmul.msk.f32.gmra.mxu2 %vm328_vm1, %v4261_v35  ;;  %v1210_v41 = vld [vmem:[#allocation2 + $0x128] sm:$0xff]  ;;  %v835_v49 = vadd.f32 %v834_v2, %v4155_v45 }
 0x137   : > { %3337 = vmatmul.msk.f32.gmra.mxu3 %vm328_vm1, %v4263_v3 }
 0x138   : > { %4884 = vst [vmem:[#allocation38_spill] sm:$0xff] %v4267_v0  ;;  %3270 = vmatmul.msk.f32.gmra.mxu1 %vm328_vm1, %v4248_v43 }
 0x139   : > { %v1077_v54 = vpop.f32.mrf.mxu2 }
 0x13a   : > { %v1161_v11 = vadd.f32 %v1077_v54, %v832_v57  ;;  %v1355_v48 = vpop.f32.mrf.mxu3  ;;  %v1636_v58 = vpop.f32.mrf.mxu0 }
 0x13c   : > { %v1439_v13 = vadd.f32 %v1355_v48, %v1161_v11  ;;  %v4288_v48 = vld [vmem:[#allocation2 + $0x122] sm:$0xff] }
 0x13d   : > { %v837_v7 = vpop.f32.mrf.mxu1  ;;  %3372 = vmatmul.msk.f32.gmra.mxu0 %vm328_vm1, %v3782_v28  ;;  %v1211_v28 = vld [vmem:[#allocation2 + $0x138] sm:$0xff] }
 0x13e   : > { %v4280_v0 = vadd.f32 %v1633_v46, %v1439_v13  ;;  %3304 = vmatmul.msk.f32.gmra.mxu2 %vm328_vm1, %v4276_v15  ;;  %v838_v45 = vadd.f32 %v837_v7, %v4001_v31  ;;  %v326_v31 = vld [vmem:[%s3615_s29 + $0xf0] sm:$0xff] }
 0x13f   : > { %3338 = vmatmul.msk.f32.gmra.mxu3 %vm328_vm1, %v1210_v41  ;;  %415 = vst.msk [vmem:[#allocation2 + $0x181] sm:$0xff] %vm328_vm1, %v326_v31 }
 0x140   : > { %4885 = vst [vmem:[#allocation39_spill] sm:$0xff] %v4280_v0  ;;  %3271 = vmatmul.msk.f32.gmra.mxu1 %vm328_vm1, %v4263_v3  ;;  %v1212_v3 = vld [vmem:[#allocation2 + $0x140] sm:$0xff] }
 0x141   : > { %v1080_v61 = vpop.f32.mrf.mxu2 }
 0x142   : > { %v1162_v57 = vadd.f32 %v1080_v61, %v835_v49  ;;  %v1358_v54 = vpop.f32.mrf.mxu3  ;;  %v1639_v11 = vpop.f32.mrf.mxu0 }
 0x144   : > { %v1440_v43 = vadd.f32 %v1358_v54, %v1162_v57  ;;  %v934_v54 = vld [vmem:[#allocation2 + $0x12a] sm:$0xff] }
 0x145   : > { %v840_v46 = vpop.f32.mrf.mxu1  ;;  %3373 = vmatmul.msk.f32.gmra.mxu0 %vm328_vm1, %v3804_v37 }
 0x146   : > { %v4292_v13 = vadd.f32 %v1636_v58, %v1440_v43  ;;  %3305 = vmatmul.msk.f32.gmra.mxu2 %vm328_vm1, %v4288_v48  ;;  %v841_v58 = vadd.f32 %v840_v46, %v4019_v36  ;;  %v327_v36 = vld [vmem:[%s3615_s29 + $0xf8] sm:$0xff] }
 0x147   : > { %3339 = vmatmul.msk.f32.gmra.mxu3 %vm328_vm1, %v1211_v28  ;;  %416 = vst.msk [vmem:[#allocation2 + $0x189] sm:$0xff] %vm328_vm1, %v327_v36  ;;  %v937_v36 = vld [vmem:[#allocation2 + $0x152] sm:$0xff] }
 0x148   : > { %3272 = vmatmul.msk.f32.gmra.mxu1 %vm328_vm1, %v1210_v41 }
 0x149   : > { %v1083_v2 = vpop.f32.mrf.mxu2 }
 0x14a   : > { %v1163_v49 = vadd.f32 %v1083_v2, %v838_v45  ;;  %v1361_v61 = vpop.f32.mrf.mxu3  ;;  %v1642_v57 = vpop.f32.mrf.mxu0 }
 0x14c   : > { %v1441_v0 = vadd.f32 %v1361_v61, %v1163_v49  ;;  %v935_v49 = vld [vmem:[#allocation2 + $0x13a] sm:$0xff] }
 0x14d   : > { %v843_v37 = vpop.f32.mrf.mxu1  ;;  %3374 = vmatmul.msk.f32.gmra.mxu0 %vm328_vm1, %v3838_v50 }
 0x14e   : > { %v4301_v43 = vadd.f32 %v1639_v11, %v1441_v0  ;;  %3306 = vmatmul.msk.f32.gmra.mxu2 %vm328_vm1, %v934_v54  ;;  %v1213_v0 = vld [vmem:[#allocation2 + $0x150] sm:$0xff] }
 0x14f   : > { %3340 = vmatmul.msk.f32.gmra.mxu3 %vm328_vm1, %v1212_v3 }
 0x150   : > { %3273 = vmatmul.msk.f32.gmra.mxu1 %vm328_vm1, %v1211_v28  ;;  %v844_v28 = vadd.f32 %v843_v37, %v4041_v30 }
 0x151   : > { %v1086_v41 = vpop.f32.mrf.mxu2 }
 0x152   : > { %v1164_v7 = vadd.f32 %v1086_v41, %v841_v58  ;;  %v1364_v45 = vpop.f32.mrf.mxu3  ;;  %v1645_v2 = vpop.f32.mrf.mxu0  ;;  %v936_v41 = vld [vmem:[#allocation2 + $0x142] sm:$0xff] }
 0x154   : > { %v1442_v50 = vadd.f32 %v1364_v45, %v1164_v7 }
 0x155   : > { %v846_v11 = vpop.f32.mrf.mxu1  ;;  %3375 = vmatmul.msk.f32.gmra.mxu0 %vm328_vm1, %v3859_v55  ;;  %v1214_v55 = vld [vmem:[#allocation2 + $0x158] sm:$0xff] }
 0x156   : > { %v4311_v61 = vadd.f32 %v1642_v57, %v1442_v50  ;;  %3307 = vmatmul.msk.f32.gmra.mxu2 %vm328_vm1, %v935_v49  ;;  %v847_v30 = vadd.f32 %v846_v11, %v4061_v40 }
 0x157   : > { %3341 = vmatmul.msk.f32.gmra.mxu3 %vm328_vm1, %v1213_v0 }
 0x158   : > { %3274 = vmatmul.msk.f32.gmra.mxu1 %vm328_vm1, %v1212_v3 }
 0x159   : > { %v1089_v46 = vpop.f32.mrf.mxu2 }
 0x15a   : > { %v1165_v54 = vadd.f32 %v1089_v46, %v844_v28  ;;  %v1367_v31 = vpop.f32.mrf.mxu3  ;;  %v1648_v58 = vpop.f32.mrf.mxu0  ;;  %v1215_v46 = vld [vmem:[#allocation2 + $0x168] sm:$0xff] }
 0x15c   : > { %v1443_v7 = vadd.f32 %v1367_v31, %v1165_v54 }
 0x15d   : > { %v849_v57 = vpop.f32.mrf.mxu1  ;;  %3376 = vmatmul.msk.f32.gmra.mxu0 %vm328_vm1, %v3887_v62 }
 0x15e   : > { %v4321_v45 = vadd.f32 %v1645_v2, %v1443_v7  ;;  %3308 = vmatmul.msk.f32.gmra.mxu2 %vm328_vm1, %v936_v41  ;;  %v850_v40 = vadd.f32 %v849_v57, %v4081_v51  ;;  %v938_v41 = vld [vmem:[#allocation2 + $0x15a] sm:$0xff] }
 0x15f   : > { %3342 = vmatmul.msk.f32.gmra.mxu3 %vm328_vm1, %v1214_v55 }
 0x160   : > { %3275 = vmatmul.msk.f32.gmra.mxu1 %vm328_vm1, %v1213_v0 }
 0x161   : > { %v1092_v3 = vpop.f32.mrf.mxu2 }
 0x162   : > { %v1166_v37 = vadd.f32 %v1092_v3, %v847_v30  ;;  %v1370_v49 = vpop.f32.mrf.mxu3  ;;  %v1651_v50 = vpop.f32.mrf.mxu0  ;;  %v1216_v30 = vld [vmem:[#allocation2 + $0x170] sm:$0xff] }
 0x164   : > { %v1444_v28 = vadd.f32 %v1370_v49, %v1166_v37  ;;  %v1495_v49 = vld [vmem:[#allocation2 + $0x181] sm:$0xff] }
 0x165   : > { %v852_v54 = vpop.f32.mrf.mxu1  ;;  %3377 = vmatmul.msk.f32.gmra.mxu0 %vm328_vm1, %v3907_v4 }
 0x166   : > { %v4329_v62 = vadd.f32 %v1648_v58, %v1444_v28  ;;  %3309 = vmatmul.msk.f32.gmra.mxu2 %vm328_vm1, %v937_v36  ;;  %v853_v51 = vadd.f32 %v852_v54, %v4101_v56  ;;  %v939_v36 = vld [vmem:[#allocation2 + $0x16a] sm:$0xff] }
 0x167   : > { %3343 = vmatmul.msk.f32.gmra.mxu3 %vm328_vm1, %v1215_v46 }
 0x168   : > { %3276 = vmatmul.msk.f32.gmra.mxu1 %vm328_vm1, %v1214_v55 }
 0x169   : > { %v1095_v2 = vpop.f32.mrf.mxu2 }
 0x16a   : > { %v1167_v0 = vadd.f32 %v1095_v2, %v850_v40  ;;  %v1373_v11 = vpop.f32.mrf.mxu3  ;;  %v1654_v31 = vpop.f32.mrf.mxu0  ;;  %v1217_v40 = vld [vmem:[#allocation2 + $0x180] sm:$0xff] }
 0x16c   : > { %v1445_v7 = vadd.f32 %v1373_v11, %v1167_v0  ;;  %v1496_v11 = vld [vmem:[#allocation2 + $0x189] sm:$0xff] }
 0x16d   : > { %v855_v3 = vpop.f32.mrf.mxu1  ;;  %3378 = vmatmul.msk.f32.gmra.mxu0 %vm328_vm1, %v3923_v8 }
 0x16e   : > { %v4337_v4 = vadd.f32 %v1651_v50, %v1445_v7  ;;  %3310 = vmatmul.msk.f32.gmra.mxu2 %vm328_vm1, %v938_v41  ;;  %v856_v56 = vadd.f32 %v855_v3, %v4121_v63  ;;  %v940_v41 = vld [vmem:[#allocation2 + $0x172] sm:$0xff] }
 0x16f   : > { %3344 = vmatmul.msk.f32.gmra.mxu3 %vm328_vm1, %v1216_v30 }
 0x170   : > { %3277 = vmatmul.msk.f32.gmra.mxu1 %vm328_vm1, %v1215_v46 }
 0x171   : > { %v1098_v58 = vpop.f32.mrf.mxu2 }
 0x172   : > { %v1168_v55 = vadd.f32 %v1098_v58, %v853_v51  ;;  %v1376_v57 = vpop.f32.mrf.mxu3  ;;  %v1657_v37 = vpop.f32.mrf.mxu0  ;;  %v1218_v51 = vld [vmem:[#allocation2 + $0x188] sm:$0xff] }
 0x174   : > { %v1446_v28 = vadd.f32 %v1376_v57, %v1168_v55 }
 0x175   : > { %v858_v2 = vpop.f32.mrf.mxu1  ;;  %3379 = vmatmul.msk.f32.gmra.mxu0 %vm328_vm1, %v1495_v49 }
 0x176   : > { %v4344_v8 = vadd.f32 %v1654_v31, %v1446_v28  ;;  %3311 = vmatmul.msk.f32.gmra.mxu2 %vm328_vm1, %v939_v36  ;;  %v859_v63 = vadd.f32 %v858_v2, %v4141_v5 }
 0x177   : > { %3345 = vmatmul.msk.f32.gmra.mxu3 %vm328_vm1, %v1217_v40 }
 0x178   : > { %3278 = vmatmul.msk.f32.gmra.mxu1 %vm328_vm1, %v1216_v30 }
 0x179   : > { %v1101_v50 = vpop.f32.mrf.mxu2 }
 0x17a   : > { %v1169_v46 = vadd.f32 %v1101_v50, %v856_v56  ;;  %v1379_v54 = vpop.f32.mrf.mxu3  ;;  %v1660_v0 = vpop.f32.mrf.mxu0 }
 0x17c   : > { %v1447_v7 = vadd.f32 %v1379_v54, %v1169_v46 }
 0x17d   : > { %v861_v58 = vpop.f32.mrf.mxu1  ;;  %3380 = vmatmul.msk.f32.gmra.mxu0 %vm328_vm1, %v1496_v11 }
 0x17e   : > { %v4351_v31 = vadd.f32 %v1657_v37, %v1447_v7  ;;  %3312 = vmatmul.msk.f32.gmra.mxu2 %vm328_vm1, %v940_v41  ;;  %v862_v5 = vadd.f32 %v861_v58, %v4029_v14 }
 0x17f   : > { %3346 = vmatmul.msk.f32.gmra.mxu3 %vm328_vm1, %v1218_v51 }
 0x180   : > { %3383 = vmatmul.msk.f32.vlgmr.msra.gmra.mxu1 %vm328_vm1, %v3942_v18 }
 0x181   : > { %v1104_v30 = vpop.f32.mrf.mxu2 }
 0x182   : > { %v1170_v3 = vadd.f32 %v1104_v30, %v859_v63  ;;  %v1382_v55 = vpop.f32.mrf.mxu3  ;;  %v1663_v57 = vpop.f32.mrf.mxu0 }
 0x184   : > { %v1448_v49 = vadd.f32 %v1382_v55, %v1170_v3  ;;  %v2304_v55 = vld [vmem:[#allocation2 + $0x61] sm:$0xff] }
 0x185   : > { %v864_v36 = vpop.f32.mrf.mxu1  ;;  %3485 = vmatmul.msk.f32.vlgmr.msra.gmra.mxu0 %vm328_vm1, %v3965_v22 }
 0x186   : > { %v4360_v37 = vadd.f32 %v1660_v0, %v1448_v49  ;;  %3417 = vmatmul.msk.f32.vlgmr.msra.gmra.mxu2 %vm328_vm1, %v3944_v19 }
 0x187   : > { %3451 = vmatmul.msk.f32.vlgmr.msra.gmra.mxu3 %vm328_vm1, %v3855_v53  ;;  %v865_v53 = vadd.f32 %v864_v36, %v4051_v44 }
 0x188   : > { %3384 = vmatmul.msk.f32.gmra.mxu1 %vm328_vm1, %v3953_v20 }
 0x189   : > { %v1107_v18 = vpop.f32.mrf.mxu2 }
 0x18a   : > { %v1171_v28 = vadd.f32 %v1107_v18, %v862_v5  ;;  %v1385_v40 = vpop.f32.mrf.mxu3  ;;  %v1666_v2 = vpop.f32.mrf.mxu0 }
 0x18c   : > { %v1449_v56 = vadd.f32 %v1385_v40, %v1171_v28  ;;  %v2305_v28 = vld [vmem:[#allocation2 + $0x69] sm:$0xff] }
 0x18d   : > { %v867_v50 = vpop.f32.mrf.mxu1  ;;  %3486 = vmatmul.msk.f32.gmra.mxu0 %vm328_vm1, %v3977_v24 }
 0x18e   : > { %v4371_v46 = vadd.f32 %v1663_v57, %v1449_v56  ;;  %3418 = vmatmul.msk.f32.gmra.mxu2 %vm328_vm1, %v3955_v21 }
 0x18f   : > { %3452 = vmatmul.msk.f32.gmra.mxu3 %vm328_vm1, %v3883_v60  ;;  %v868_v60 = vadd.f32 %v867_v50, %v4071_v52  ;;  %v4889_v50 = vld [vmem:[#allocation21_spill] sm:$0xff] }
 0x190   : > { %3385 = vmatmul.msk.f32.gmra.mxu1 %vm328_vm1, %v3965_v22 }
 0x191   : > { %v1110_v19 = vpop.f32.mrf.mxu2 }
 0x192   : > { %v1172_v20 = vadd.f32 %v1110_v19, %v865_v53  ;;  %v1388_v14 = vpop.f32.mrf.mxu3  ;;  %v1669_v54 = vpop.f32.mrf.mxu0 }
 0x194   : > { %v1450_v0 = vadd.f32 %v1388_v14, %v1172_v20 }
 0x195   : > { %v870_v11 = vpop.f32.mrf.mxu1  ;;  %3487 = vmatmul.msk.f32.gmra.mxu0 %vm328_vm1, %v3989_v27 }
 0x196   : > { %v4382_v41 = vadd.f32 %v1666_v2, %v1450_v0  ;;  %3419 = vmatmul.msk.f32.gmra.mxu2 %vm328_vm1, %v3967_v23  ;;  %v4887_v2 = vld [vmem:[#allocation6_spill] sm:$0xff]  ;;  %v2306_v0 = vld [vmem:[#allocation2 + $0x79] sm:$0xff] }
 0x197   : > { %3453 = vmatmul.msk.f32.gmra.mxu3 %vm328_vm1, %v3903_v1  ;;  %v871_v1 = vadd.f32 %v870_v11, %v4091_v9 }
 0x198   : > { %3386 = vmatmul.msk.f32.gmra.mxu1 %vm328_vm1, %v3977_v24 }
 0x199   : > { %v1113_v21 = vpop.f32.mrf.mxu2 }
 0x19a   : > { %v1173_v22 = vadd.f32 %v1113_v21, %v868_v60  ;;  %v1391_v44 = vpop.f32.mrf.mxu3  ;;  %v1672_v7 = vpop.f32.mrf.mxu0  ;;  %v4890_v60 = vld [vmem:[#allocation9_spill] sm:$0xff] }
 0x19c   : > { %v1451_v51 = vadd.f32 %v1391_v44, %v1173_v22  ;;  %v4891_v22 = vld [vmem:[#allocation4_spill] sm:$0xff]  ;;  %v4892_v44 = vld [vmem:[#allocation25_spill] sm:$0xff] }
 0x19d   : > { %v873_v58 = vpop.f32.mrf.mxu1  ;;  %3488 = vmatmul.msk.f32.gmra.mxu0 %vm328_vm1, %v4003_v32 }
 0x19e   : > { %v4393_v63 = vadd.f32 %v1669_v54, %v1451_v51  ;;  %3420 = vmatmul.msk.f32.gmra.mxu2 %vm328_vm1, %v3979_v25 }
 0x19f   : > { %3454 = vmatmul.msk.f32.gmra.mxu3 %vm328_vm1, %v3919_v6  ;;  %v4886_v6 = vld [vmem:[#allocation17_spill] sm:$0xff] }
 0x1a0   : > { %3387 = vmatmul.msk.f32.gmra.mxu1 %vm328_vm1, %v3989_v27  ;;  %v874_v25 = vadd.f32 %v873_v58, %v4886_v6 }
 0x1a1   : > { %v1116_v23 = vpop.f32.mrf.mxu2 }
 0x1a2   : > { %v1174_v24 = vadd.f32 %v1116_v23, %v871_v1  ;;  %v1394_v52 = vpop.f32.mrf.mxu3  ;;  %v1675_v30 = vpop.f32.mrf.mxu0 }
 0x1a4   : > { %v1452_v3 = vadd.f32 %v1394_v52, %v1174_v24  ;;  %v2307_v24 = vld [vmem:[#allocation2 + $0x81] sm:$0xff] }
 0x1a5   : > { %v876_v57 = vpop.f32.mrf.mxu1  ;;  %3489 = vmatmul.msk.f32.gmra.mxu0 %vm328_vm1, %v4017_v34 }
 0x1a6   : > { %v4404_v49 = vadd.f32 %v1672_v7, %v1452_v3  ;;  %3421 = vmatmul.msk.f32.gmra.mxu2 %vm328_vm1, %v3991_v29  ;;  %v4888_v29 = vld [vmem:[#allocation3_spill] sm:$0xff]  ;;  %v877_v53 = vadd.f32 %v876_v57, %v4889_v50  ;;  %v4895_v57 = vld [vmem:[#allocation28_spill] sm:$0xff]  ;;  %v4898_v50 = vld [vmem:[#allocation5_spill] sm:$0xff] }
 0x1a7   : > { %3455 = vmatmul.msk.f32.gmra.mxu3 %vm328_vm1, %v2304_v55  ;;  %v4894_v55 = vld [vmem:[#allocation7_spill] sm:$0xff] }
 0x1a8   : > { %3388 = vmatmul.msk.f32.gmra.mxu1 %vm328_vm1, %v4003_v32 }
 0x1a9   : > { %v1119_v27 = vpop.f32.mrf.mxu2 }
 0x1aa   : > { %v1175_v9 = vadd.f32 %v1119_v27, %v874_v25  ;;  %v1397_v36 = vpop.f32.mrf.mxu3  ;;  %v1678_v5 = vpop.f32.mrf.mxu0 }
 0x1ac   : > { %v1453_v18 = vadd.f32 %v1397_v36, %v1175_v9 }
 0x1ad   : > { %v879_v40 = vpop.f32.mrf.mxu1  ;;  %3490 = vmatmul.msk.f32.gmra.mxu0 %vm328_vm1, %v4887_v2 }
 0x1ae   : > { %v4414_v56 = vadd.f32 %v1675_v30, %v1453_v18  ;;  %3422 = vmatmul.msk.f32.gmra.mxu2 %vm328_vm1, %v4888_v29  ;;  %v880_v7 = vadd.f32 %v879_v40, %v4892_v44  ;;  %v4893_v30 = vld [vmem:[#allocation12_spill] sm:$0xff]  ;;  %v4896_v40 = vld [vmem:[#allocation15_spill] sm:$0xff]  ;;  %v4897_v29 = vld [vmem:[#allocation10_spill] sm:$0xff] }
 0x1af   : > { %3456 = vmatmul.msk.f32.gmra.mxu3 %vm328_vm1, %v2305_v28  ;;  %v2308_v18 = vld [vmem:[#allocation2 + $0x91] sm:$0xff]  ;;  %v4900_v44 = vld [vmem:[#allocation13_spill] sm:$0xff] }
 0x1b0   : > { %3389 = vmatmul.msk.f32.gmra.mxu1 %vm328_vm1, %v4017_v34 }
 0x1b1   : > { %v1122_v32 = vpop.f32.mrf.mxu2 }
 0x1b2   : > { %v1176_v19 = vadd.f32 %v1122_v32, %v877_v53  ;;  %v1400_v20 = vpop.f32.mrf.mxu3  ;;  %v1681_v14 = vpop.f32.mrf.mxu0 }
 0x1b4   : > { %v1454_v54 = vadd.f32 %v1400_v20, %v1176_v19 }
 0x1b5   : > { %v882_v11 = vpop.f32.mrf.mxu1  ;;  %3491 = vmatmul.msk.f32.gmra.mxu0 %vm328_vm1, %v4890_v60 }
 0x1b6   : > { %v4424_v21 = vadd.f32 %v1678_v5, %v1454_v54  ;;  %3423 = vmatmul.msk.f32.gmra.mxu2 %vm328_vm1, %v4891_v22  ;;  %v883_v6 = vadd.f32 %v882_v11, %v4895_v57 }
 0x1b7   : > { %3457 = vmatmul.msk.f32.gmra.mxu3 %vm328_vm1, %v2306_v0  ;;  %v2309_v0 = vld [vmem:[#allocation2 + $0x99] sm:$0xff] }
 0x1b8   : > { %3390 = vmatmul.msk.f32.gmra.mxu1 %vm328_vm1, %v4887_v2 }
 0x1b9   : > { %v1125_v34 = vpop.f32.mrf.mxu2 }
 0x1ba   : > { %v1177_v51 = vadd.f32 %v1125_v34, %v880_v7  ;;  %v1403_v58 = vpop.f32.mrf.mxu3  ;;  %v1684_v1 = vpop.f32.mrf.mxu0  ;;  %v4901_v7 = vld [vmem:[#allocation8_spill] sm:$0xff] }
 0x1bc   : > { %v1455_v23 = vadd.f32 %v1403_v58, %v1177_v51 }
 0x1bd   : > { %v885_v52 = vpop.f32.mrf.mxu1  ;;  %3492 = vmatmul.msk.f32.gmra.mxu0 %vm328_vm1, %v4893_v30 }
 0x1be   : > { %v4434_v3 = vadd.f32 %v1681_v14, %v1455_v23  ;;  %3424 = vmatmul.msk.f32.gmra.mxu2 %vm328_vm1, %v4894_v55  ;;  %v886_v53 = vadd.f32 %v885_v52, %v4898_v50  ;;  %v2310_v52 = vld [vmem:[#allocation2 + $0xa9] sm:$0xff] }
 0x1bf   : > { %3458 = vmatmul.msk.f32.gmra.mxu3 %vm328_vm1, %v2307_v24  ;;  %v4902_v55 = vld [vmem:[#allocation23_spill] sm:$0xff] }
 0x1c0   : > { %3391 = vmatmul.msk.f32.gmra.mxu1 %vm328_vm1, %v4890_v60  ;;  %v4899_v60 = vld [vmem:[#allocation19_spill] sm:$0xff] }
 0x1c1   : > { %v1128_v25 = vpop.f32.mrf.mxu2  ;;  %v4905_v50 = vld [vmem:[#allocation27_spill] sm:$0xff] }
 0x1c2   : > { %v1178_v27 = vadd.f32 %v1128_v25, %v883_v6  ;;  %v1406_v9 = vpop.f32.mrf.mxu3  ;;  %v1687_v36 = vpop.f32.mrf.mxu0  ;;  %v4903_v6 = vld [vmem:[#allocation16_spill] sm:$0xff]  ;;  %v4904_v25 = vld [vmem:[#allocation11_spill] sm:$0xff] }
 0x1c4   : > { %v1456_v5 = vadd.f32 %v1406_v9, %v1178_v27 }
 0x1c5   : > { %v888_v28 = vpop.f32.mrf.mxu1  ;;  %3493 = vmatmul.msk.f32.gmra.mxu0 %vm328_vm1, %v4896_v40 }
 0x1c6   : > { %v4444_v2 = vadd.f32 %v1684_v1, %v1456_v5  ;;  %3425 = vmatmul.msk.f32.gmra.mxu2 %vm328_vm1, %v4897_v29  ;;  %v889_v34 = vadd.f32 %v888_v28, %v4901_v7 }
 0x1c7   : > { %3459 = vmatmul.msk.f32.gmra.mxu3 %vm328_vm1, %v2308_v18 }
 0x1c8   : > { %3392 = vmatmul.msk.f32.gmra.mxu1 %vm328_vm1, %v4893_v30 }
 0x1c9   : > { %v1131_v32 = vpop.f32.mrf.mxu2 }
 0x1ca   : > { %v1179_v19 = vadd.f32 %v1131_v32, %v886_v53  ;;  %v1409_v20 = vpop.f32.mrf.mxu3  ;;  %v1690_v14 = vpop.f32.mrf.mxu0  ;;  %v4906_v32 = vld [vmem:[#allocation20_spill] sm:$0xff] }
 0x1cc   : > { %v1457_v54 = vadd.f32 %v1409_v20, %v1179_v19  ;;  %v4907_v19 = vld [vmem:[#allocation14_spill] sm:$0xff] }
 0x1cd   : > { %v891_v11 = vpop.f32.mrf.mxu1  ;;  %3494 = vmatmul.msk.f32.gmra.mxu0 %vm328_vm1, %v4899_v60 }
 0x1ce   : > { %v4454_v22 = vadd.f32 %v1687_v36, %v1457_v54  ;;  %3426 = vmatmul.msk.f32.gmra.mxu2 %vm328_vm1, %v4900_v44  ;;  %v892_v27 = vadd.f32 %v891_v11, %v4904_v25  ;;  %v2312_v44 = vld [vmem:[#allocation2 + $0xc1] sm:$0xff]  ;;  %v2313_v25 = vld [vmem:[#allocation2 + $0xc9] sm:$0xff] }
 0x1cf   : > { %3460 = vmatmul.msk.f32.gmra.mxu3 %vm328_vm1, %v2309_v0 }
 0x1d0   : > { %3393 = vmatmul.msk.f32.gmra.mxu1 %vm328_vm1, %v4896_v40  ;;  %v2311_v40 = vld [vmem:[#allocation2 + $0xb1] sm:$0xff] }
 0x1d1   : > { %v1134_v51 = vpop.f32.mrf.mxu2 }
 0x1d2   : > { %v1180_v58 = vadd.f32 %v1134_v51, %v889_v34  ;;  %v1412_v1 = vpop.f32.mrf.mxu3  ;;  %v1693_v23 = vpop.f32.mrf.mxu0  ;;  %v4908_v34 = vld [vmem:[#allocation30_spill] sm:$0xff] }
 0x1d4   : > { %v1458_v24 = vadd.f32 %v1412_v1, %v1180_v58  ;;  %v4909_v58 = vld [vmem:[#allocation24_spill] sm:$0xff]  ;;  %v4910_v1 = vld [vmem:[#allocation18_spill] sm:$0xff] }
 0x1d5   : > { %v894_v30 = vpop.f32.mrf.mxu1  ;;  %3495 = vmatmul.msk.f32.gmra.mxu0 %vm328_vm1, %v4902_v55 }
 0x1d6   : > { %v4464_v57 = vadd.f32 %v1690_v14, %v1458_v24  ;;  %3427 = vmatmul.msk.f32.gmra.mxu2 %vm328_vm1, %v4903_v6  ;;  %v895_v20 = vadd.f32 %v894_v30, %v4907_v19 }
 0x1d7   : > { %3461 = vmatmul.msk.f32.gmra.mxu3 %vm328_vm1, %v2310_v52 }
 0x1d8   : > { %3394 = vmatmul.msk.f32.gmra.mxu1 %vm328_vm1, %v4899_v60 }
 0x1d9   : > { %v1137_v9 = vpop.f32.mrf.mxu2 }
 0x1da   : > { %v1181_v36 = vadd.f32 %v1137_v9, %v892_v27  ;;  %v1415_v5 = vpop.f32.mrf.mxu3  ;;  %v1696_v18 = vpop.f32.mrf.mxu0 }
 0x1dc   : > { %v1459_v28 = vadd.f32 %v1415_v5, %v1181_v36  ;;  %v4911_v36 = vld [vmem:[#allocation22_spill] sm:$0xff] }
 0x1dd   : > { %v897_v29 = vpop.f32.mrf.mxu1  ;;  %3496 = vmatmul.msk.f32.gmra.mxu0 %vm328_vm1, %v4905_v50 }
 0x1de   : > { %v4474_v53 = vadd.f32 %v1693_v23, %v1459_v28  ;;  %3428 = vmatmul.msk.f32.gmra.mxu2 %vm328_vm1, %v4906_v32  ;;  %v898_v23 = vadd.f32 %v897_v29, %v4910_v1  ;;  %v2314_v32 = vld [vmem:[#allocation2 + $0xd9] sm:$0xff] }
 0x1df   : > { %3462 = vmatmul.msk.f32.gmra.mxu3 %vm328_vm1, %v2311_v40 }
 0x1e0   : > { %3395 = vmatmul.msk.f32.gmra.mxu1 %vm328_vm1, %v4902_v55 }
 0x1e1   : > { %v1140_v14 = vpop.f32.mrf.mxu2 }
 0x1e2   : > { %v1182_v54 = vadd.f32 %v1140_v14, %v895_v20  ;;  %v1418_v0 = vpop.f32.mrf.mxu3  ;;  %v1699_v11 = vpop.f32.mrf.mxu0 }
 0x1e4   : > { %v1460_v60 = vadd.f32 %v1418_v0, %v1182_v54 }
 0x1e5   : > { %v900_v7 = vpop.f32.mrf.mxu1  ;;  %3497 = vmatmul.msk.f32.gmra.mxu0 %vm328_vm1, %v4908_v34 }
 0x1e6   : > { %v4484_v51 = vadd.f32 %v1696_v18, %v1460_v60  ;;  %3429 = vmatmul.msk.f32.gmra.mxu2 %vm328_vm1, %v4909_v58  ;;  %v901_v5 = vadd.f32 %v900_v7, %v4911_v36  ;;  %v2315_v7 = vld [vmem:[#allocation2 + $0xe1] sm:$0xff] }
 0x1e7   : > { %3463 = vmatmul.msk.f32.gmra.mxu3 %vm328_vm1, %v2312_v44 }
 0x1e8   : > { %3396 = vmatmul.msk.f32.gmra.mxu1 %vm328_vm1, %v4905_v50 }
 0x1e9   : > { %v1143_v24 = vpop.f32.mrf.mxu2 }
 0x1ea   : > { %v1183_v52 = vadd.f32 %v1143_v24, %v898_v23  ;;  %v1421_v30 = vpop.f32.mrf.mxu3  ;;  %v1702_v55 = vpop.f32.mrf.mxu0 }
 0x1ec   : > { %v1461_v6 = vadd.f32 %v1421_v30, %v1183_v52 }
 0x1ed   : > { %v903_v27 = vpop.f32.mrf.mxu1  ;;  %3498 = vmatmul.msk.f32.gmra.mxu0 %vm328_vm1, %v4186_v33 }
 0x1ee   : > { %v4494_v9 = vadd.f32 %v1699_v11, %v1461_v6  ;;  %3430 = vmatmul.msk.f32.gmra.mxu2 %vm328_vm1, %v4159_v38  ;;  %v4912_v38 = vld [vmem:[#allocation26_spill] sm:$0xff] }
 0x1ef   : > { %3464 = vmatmul.msk.f32.gmra.mxu3 %vm328_vm1, %v2313_v25  ;;  %v904_v14 = vadd.f32 %v903_v27, %v4912_v38 }
 0x1f0   : > { %3397 = vmatmul.msk.f32.gmra.mxu1 %vm328_vm1, %v4908_v34 }
 0x1f1   : > { %v1146_v18 = vpop.f32.mrf.mxu2 }
 0x1f2   : > { %v1184_v28 = vadd.f32 %v1146_v18, %v901_v5  ;;  %v1424_v40 = vpop.f32.mrf.mxu3  ;;  %v1705_v29 = vpop.f32.mrf.mxu0 }
 0x1f4   : > { %v1462_v50 = vadd.f32 %v1424_v40, %v1184_v28  ;;  %v4535_v40 = vld [vmem:[%s4817_s2] ss:$0 sm:$0xff] }
 0x1f5   : > { %v906_v19 = vpop.f32.mrf.mxu1  ;;  %3499 = vmatmul.msk.f32.gmra.mxu0 %vm328_vm1, %v4201_v26 }
 0x1f6   : > { %v4504_v20 = vadd.f32 %v1702_v55, %v1462_v50  ;;  %3431 = vmatmul.msk.f32.gmra.mxu2 %vm328_vm1, %v4175_v47  ;;  %v4913_v47 = vld [vmem:[#allocation29_spill] sm:$0xff]  ;;  %v2316_v55 = vld [vmem:[#allocation2 + $0xf1] sm:$0xff] }
 0x1f7   : > { %3465 = vmatmul.msk.f32.gmra.mxu3 %vm328_vm1, %v2314_v32  ;;  %v907_v1 = vadd.f32 %v906_v19, %v4913_v47 }
 0x1f8   : > { %3398 = vmatmul.msk.f32.gmra.mxu1 %vm328_vm1, %v4186_v33 }
 0x1f9   : > { %v1149_v54 = vpop.f32.mrf.mxu2 }
 0x1fa   : > { %v1185_v0 = vadd.f32 %v1149_v54, %v904_v14  ;;  %v1427_v11 = vpop.f32.mrf.mxu3  ;;  %v1708_v60 = vpop.f32.mrf.mxu0 }
 0x1fc   : > { %v1463_v44 = vadd.f32 %v1427_v11, %v1185_v0  ;;  %v2318_v11 = vld [vmem:[#allocation2 + $0x109] sm:$0xff] }
 0x1fd   : > { %v1893_v34 = vpop.f32.mrf.mxu1  ;;  %3500 = vmatmul.msk.f32.gmra.mxu0 %vm328_vm1, %v4216_v59 }
 0x1fe   : > { %v4514_v58 = vadd.f32 %v1705_v29, %v1463_v44  ;;  %3432 = vmatmul.msk.f32.gmra.mxu2 %vm328_vm1, %v4188_v17  ;;  %v4914_v17 = vld [vmem:[#allocation31_spill] sm:$0xff]  ;;  %v2317_v29 = vld [vmem:[#allocation2 + $0xf9] sm:$0xff] }
 0x1ff   : > { %3466 = vmatmul.msk.f32.gmra.mxu3 %vm328_vm1, %v2315_v7  ;;  %v4916_v7 = vld [vmem:[#allocation33_spill] sm:$0xff] }
 0x200   : > { %3399 = vmatmul.msk.f32.gmra.mxu1 %vm328_vm1, %v4201_v26  ;;  %v1989_v26 = vadd.f32 %v1893_v34, %v4914_v17 }
 0x201   : > { %v1152_v33 = vpop.f32.mrf.mxu2 }
 0x202   : > { %v1186_v23 = vadd.f32 %v1152_v33, %v907_v1  ;;  %v1430_v24 = vpop.f32.mrf.mxu3  ;;  %v2728_v52 = vpop.f32.mrf.mxu0 }
 0x204   : > { %v1464_v30 = vadd.f32 %v1430_v24, %v1186_v23 }
 0x205   : > { %v1896_v6 = vpop.f32.mrf.mxu1  ;;  %3501 = vmatmul.msk.f32.gmra.mxu0 %vm328_vm1, %v4231_v39 }
 0x206   : > { %v4524_v25 = vadd.f32 %v1708_v60, %v1464_v30  ;;  %3433 = vmatmul.msk.f32.gmra.mxu2 %vm328_vm1, %v4203_v42 }
 0x207   : > { %3467 = vmatmul.msk.f32.gmra.mxu3 %vm328_vm1, %v2316_v55 }
 0x208   : > { %3400 = vmatmul.msk.f32.gmra.mxu1 %vm328_vm1, %v4216_v59  ;;  %v4915_v59 = vld [vmem:[#allocation32_spill] sm:$0xff] }
 0x209   : > { %v2172_v27 = vpop.f32.mrf.mxu2  ;;  %v1990_v32 = vadd.f32 %v1896_v6, %v4915_v59 }
 0x20a   : > { %v2268_v36 = vadd.f32 %v2172_v27, %v1989_v26  ;;  %v2450_v5 = vpop.f32.mrf.mxu3  ;;  %v2731_v18 = vpop.f32.mrf.mxu0  ;;  %v2319_v27 = vld [vmem:[#allocation2 + $0x111] sm:$0xff] }
 0x20c   : > { %v2546_v28 = vadd.f32 %v2450_v5, %v2268_v36 }
 0x20d   : > { %v1899_v50 = vpop.f32.mrf.mxu1  ;;  %3502 = vmatmul.msk.f32.gmra.mxu0 %vm328_vm1, %v4246_v10 }
 0x20e   : > { %v2824_v42 = vadd.f32 %v2728_v52, %v2546_v28  ;;  %3434 = vmatmul.msk.f32.gmra.mxu2 %vm328_vm1, %v4218_v16  ;;  %v1991_v34 = vadd.f32 %v1899_v50, %v4916_v7  ;;  %v4918_v28 = vld [vmem:[#allocation34_spill] sm:$0xff]  ;;  %v4920_v7 = vld [vmem:[#allocation36_spill] sm:$0xff] }
 0x20f   : > { %3468 = vmatmul.msk.f32.gmra.mxu3 %vm328_vm1, %v2317_v29 }
 0x210   : > { %v2860_v19 = vadd.f32 %v4535_v40, %v2824_v42  ;;  %3401 = vmatmul.msk.f32.gmra.mxu1 %vm328_vm1, %v4231_v39 }
 0x211   : > { %v2175_v38 = vpop.f32.mrf.mxu2 }
 0x212   : > { %2893 = vst.msk [vmem:[%s4546_s28] sm:$0xff] %vm2892_vm3, %v2860_v19  ;;  %v2269_v16 = vadd.f32 %v2175_v38, %v1990_v32  ;;  %v2453_v14 = vpop.f32.mrf.mxu3  ;;  %v2734_v54 = vpop.f32.mrf.mxu0  ;;  %v2996_v39 = vmul.f32 %v2860_v19, %v2860_v19  ;;  %v2925_v33 = vsel %vm2892_vm3, %v2860_v19, 0.0 }
 0x214   : > { %v2547_v0 = vadd.f32 %v2453_v14, %v2269_v16  ;;  %v3028_v6 = vsel %vm2892_vm3, %v2996_v39, 0.0  ;;  %v4919_v39 = vld [vmem:[#allocation37_spill] sm:$0xff] }
 0x215   : > { %v1902_v60 = vpop.f32.mrf.mxu1  ;;  %3503 = vmatmul.msk.f32.gmra.mxu0 %vm328_vm1, %v4261_v35 }
 0x216   : > { %v2825_v44 = vadd.f32 %v2731_v18, %v2547_v0  ;;  %3435 = vmatmul.msk.f32.gmra.mxu2 %vm328_vm1, %v4233_v12  ;;  %v4917_v18 = vld [vmem:[#allocation35_spill] sm:$0xff]  ;;  %v1992_v29 = vadd.f32 %v1902_v60, %v4918_v28  ;;  %v2320_v0 = vld [vmem:[#allocation2 + $0x121] sm:$0xff] }
 0x217   : > { %3469 = vmatmul.msk.f32.gmra.mxu3 %vm328_vm1, %v2318_v11 }
 0x218   : > { %v2861_v47 = vadd.f32 %v4535_v40, %v2825_v44  ;;  %3402 = vmatmul.msk.f32.gmra.mxu1 %vm328_vm1, %v4246_v10  ;;  %v1764_v44 = vld [vmem:[#allocation2 + $0x112] sm:$0xff] }
 0x219   : > { %v2178_v1 = vpop.f32.mrf.mxu2 }
 0x21a   : > { %2894 = vst.msk [vmem:[%s4546_s28 + $0x8] sm:$0xff] %vm2892_vm3, %v2861_v47  ;;  %v2926_v23 = vsel %vm2892_vm3, %v2861_v47, 0.0  ;;  %v2997_v24 = vmul.f32 %v2861_v47, %v2861_v47  ;;  %v2270_v52 = vadd.f32 %v2178_v1, %v1991_v34  ;;  %v2456_v12 = vpop.f32.mrf.mxu3  ;;  %v2737_v30 = vpop.f32.mrf.mxu0 }
 0x21b   : > { %v2927_v55 = vadd.f32 %v2926_v23, %v2925_v33 }
 0x21c   : > { %v3029_v17 = vsel %vm2892_vm3, %v2997_v24, 0.0  ;;  %v2548_v26 = vadd.f32 %v2456_v12, %v2270_v52  ;;  %v2599_v12 = vld [vmem:[#allocation2 + $0x12a] sm:$0xff] }
 0x21d   : > { %v3030_v10 = vadd.f32 %v3029_v17, %v3028_v6  ;;  %v1905_v36 = vpop.f32.mrf.mxu1  ;;  %3504 = vmatmul.msk.f32.gmra.mxu0 %vm328_vm1, %v4276_v15 }
 0x21e   : > { %v2826_v5 = vadd.f32 %v2734_v54, %v2548_v26  ;;  %3436 = vmatmul.msk.f32.gmra.mxu2 %vm328_vm1, %v4917_v18  ;;  %v1993_v34 = vadd.f32 %v1905_v36, %v4920_v7  ;;  %v2321_v26 = vld [vmem:[#allocation2 + $0x129] sm:$0xff] }
 0x21f   : > { %3470 = vmatmul.msk.f32.gmra.mxu3 %vm328_vm1, %v2319_v27  ;;  %v1765_v36 = vld [vmem:[#allocation2 + $0x122] sm:$0xff] }
 0x220   : > { %v2862_v50 = vadd.f32 %v4535_v40, %v2826_v5  ;;  %3403 = vmatmul.msk.f32.gmra.mxu1 %vm328_vm1, %v4261_v35  ;;  %v4921_v18 = vld [vmem:[#allocation38_spill] sm:$0xff] }
 0x221   : > { %v2181_v42 = vpop.f32.mrf.mxu2 }
 0x222   : > { %2895 = vst.msk [vmem:[%s4546_s28 + $0x10] sm:$0xff] %vm2892_vm3, %v2862_v50  ;;  %v2928_v59 = vsel %vm2892_vm3, %v2862_v50, 0.0  ;;  %v2998_v32 = vmul.f32 %v2862_v50, %v2862_v50  ;;  %v2271_v15 = vadd.f32 %v2181_v42, %v1992_v29  ;;  %v2459_v19 = vpop.f32.mrf.mxu3  ;;  %v2740_v38 = vpop.f32.mrf.mxu0 }
 0x223   : > { %v2929_v16 = vadd.f32 %v2928_v59, %v2927_v55  ;;  %v2043_v55 = vld [vmem:[#allocation2 + $0x128] sm:$0xff] }
 0x224   : > { %v3031_v14 = vsel %vm2892_vm3, %v2998_v32, 0.0  ;;  %v2549_v54 = vadd.f32 %v2459_v19, %v2271_v15 }
 0x225   : > { %v3032_v11 = vadd.f32 %v3031_v14, %v3030_v10  ;;  %v1908_v60 = vpop.f32.mrf.mxu1  ;;  %3505 = vmatmul.msk.f32.gmra.mxu0 %vm328_vm1, %v4288_v48  ;;  %v2044_v14 = vld [vmem:[#allocation2 + $0x138] sm:$0xff] }
 0x226   : > { %v2827_v35 = vadd.f32 %v2737_v30, %v2549_v54  ;;  %3437 = vmatmul.msk.f32.gmra.mxu2 %vm328_vm1, %v4919_v39  ;;  %v1994_v28 = vadd.f32 %v1908_v60, %v4921_v18  ;;  %v4922_v39 = vld [vmem:[#allocation39_spill] sm:$0xff] }
 0x227   : > { %3471 = vmatmul.msk.f32.gmra.mxu3 %vm328_vm1, %v2320_v0 }
 0x228   : > { %v2863_v47 = vadd.f32 %v4535_v40, %v2827_v35  ;;  %3404 = vmatmul.msk.f32.gmra.mxu1 %vm328_vm1, %v1764_v44 }
 0x229   : > { %v2184_v1 = vpop.f32.mrf.mxu2 }
 0x22a   : > { %2896 = vst.msk [vmem:[%s4546_s28 + $0x18] sm:$0xff] %vm2892_vm3, %v2863_v47  ;;  %v2930_v33 = vsel %vm2892_vm3, %v2863_v47, 0.0  ;;  %v2999_v23 = vmul.f32 %v2863_v47, %v2863_v47  ;;  %v2272_v24 = vadd.f32 %v2184_v1, %v1993_v34  ;;  %v2462_v48 = vpop.f32.mrf.mxu3  ;;  %v2743_v52 = vpop.f32.mrf.mxu0 }
 0x22b   : > { %v2931_v30 = vadd.f32 %v2930_v33, %v2929_v16 }
 0x22c   : > { %v3033_v6 = vsel %vm2892_vm3, %v2999_v23, 0.0  ;;  %v2550_v17 = vadd.f32 %v2462_v48, %v2272_v24 }
 0x22d   : > { %v3034_v27 = vadd.f32 %v3033_v6, %v3032_v11  ;;  %v1911_v10 = vpop.f32.mrf.mxu1  ;;  %3506 = vmatmul.msk.f32.gmra.mxu0 %vm328_vm1, %v2599_v12  ;;  %v2322_v11 = vld [vmem:[#allocation2 + $0x139] sm:$0xff] }
 0x22e   : > { %v2828_v5 = vadd.f32 %v2740_v38, %v2550_v17  ;;  %3438 = vmatmul.msk.f32.gmra.mxu2 %vm328_vm1, %v2043_v55  ;;  %v2600_v38 = vld [vmem:[#allocation2 + $0x13a] sm:$0xff]  ;;  %v1995_v7 = vadd.f32 %v1911_v10, %v4922_v39 }
 0x22f   : > { %3472 = vmatmul.msk.f32.gmra.mxu3 %vm328_vm1, %v2321_v26  ;;  %v2045_v55 = vld [vmem:[#allocation2 + $0x140] sm:$0xff] }
 0x230   : > { %v2864_v29 = vadd.f32 %v4535_v40, %v2828_v5  ;;  %3405 = vmatmul.msk.f32.gmra.mxu1 %vm328_vm1, %v1765_v36  ;;  %v2323_v26 = vld [vmem:[#allocation2 + $0x141] sm:$0xff] }
 0x231   : > { %v2187_v50 = vpop.f32.mrf.mxu2 }
 0x232   : > { %2897 = vst.msk [vmem:[%s4546_s28 + $0x20] sm:$0xff] %vm2892_vm3, %v2864_v29  ;;  %v2932_v42 = vsel %vm2892_vm3, %v2864_v29, 0.0  ;;  %v3000_v59 = vmul.f32 %v2864_v29, %v2864_v29  ;;  %v2273_v32 = vadd.f32 %v2187_v50, %v1994_v28  ;;  %v2465_v15 = vpop.f32.mrf.mxu3  ;;  %v2746_v19 = vpop.f32.mrf.mxu0 }
 0x233   : > { %v2933_v16 = vadd.f32 %v2932_v42, %v2931_v30 }
 0x234   : > { %v3035_v54 = vsel %vm2892_vm3, %v3000_v59, 0.0  ;;  %v2551_v0 = vadd.f32 %v2465_v15, %v2273_v32  ;;  %v2602_v32 = vld [vmem:[#allocation2 + $0x152] sm:$0xff] }
 0x235   : > { %v3036_v60 = vadd.f32 %v3035_v54, %v3034_v27  ;;  %v1914_v44 = vpop.f32.mrf.mxu1  ;;  %3507 = vmatmul.msk.f32.gmra.mxu0 %vm328_vm1, %v2600_v38 }
 0x236   : > { %v2829_v35 = vadd.f32 %v2743_v52, %v2551_v0  ;;  %3439 = vmatmul.msk.f32.gmra.mxu2 %vm328_vm1, %v2044_v14  ;;  %v2601_v52 = vld [vmem:[#allocation2 + $0x142] sm:$0xff]  ;;  %v1996_v36 = vadd.f32 %v1914_v44, %v4292_v13  ;;  %v2324_v14 = vld [vmem:[#allocation2 + $0x151] sm:$0xff] }
 0x237   : > { %3473 = vmatmul.msk.f32.gmra.mxu3 %vm328_vm1, %v2322_v11 }
 0x238   : > { %v2865_v34 = vadd.f32 %v4535_v40, %v2829_v35  ;;  %3406 = vmatmul.msk.f32.gmra.mxu1 %vm328_vm1, %v2599_v12 }
 0x239   : > { %v2190_v47 = vpop.f32.mrf.mxu2 }
 0x23a   : > { %2898 = vst.msk [vmem:[%s4546_s28 + $0x28] sm:$0xff] %vm2892_vm3, %v2865_v34  ;;  %v2934_v1 = vsel %vm2892_vm3, %v2865_v34, 0.0  ;;  %v3001_v33 = vmul.f32 %v2865_v34, %v2865_v34  ;;  %v2274_v23 = vadd.f32 %v2190_v47, %v1995_v7  ;;  %v2468_v24 = vpop.f32.mrf.mxu3  ;;  %v2749_v48 = vpop.f32.mrf.mxu0 }
 0x23b   : > { %v2935_v30 = vadd.f32 %v2934_v1, %v2933_v16  ;;  %v2603_v1 = vld [vmem:[#allocation2 + $0x15a] sm:$0xff] }
 0x23c   : > { %v3037_v6 = vsel %vm2892_vm3, %v3001_v33, 0.0  ;;  %v2552_v17 = vadd.f32 %v2468_v24, %v2274_v23  ;;  %v2047_v23 = vld [vmem:[#allocation2 + $0x158] sm:$0xff] }
 0x23d   : > { %v3038_v27 = vadd.f32 %v3037_v6, %v3036_v60  ;;  %v1917_v10 = vpop.f32.mrf.mxu1  ;;  %3508 = vmatmul.msk.f32.gmra.mxu0 %vm328_vm1, %v2601_v52 }
 0x23e   : > { %v2830_v12 = vadd.f32 %v2746_v19, %v2552_v17  ;;  %3440 = vmatmul.msk.f32.gmra.mxu2 %vm328_vm1, %v2045_v55  ;;  %v2046_v19 = vld [vmem:[#allocation2 + $0x150] sm:$0xff]  ;;  %v1997_v11 = vadd.f32 %v1917_v10, %v4301_v43 }
 0x23f   : > { %3474 = vmatmul.msk.f32.gmra.mxu3 %vm328_vm1, %v2323_v26 }
 0x240   : > { %v2866_v5 = vadd.f32 %v4535_v40, %v2830_v12  ;;  %3407 = vmatmul.msk.f32.gmra.mxu1 %vm328_vm1, %v2600_v38 }
 0x241   : > { %v2193_v18 = vpop.f32.mrf.mxu2 }
 0x242   : > { %2899 = vst.msk [vmem:[%s4546_s28 + $0x30] sm:$0xff] %vm2892_vm3, %v2866_v5  ;;  %v2936_v28 = vsel %vm2892_vm3, %v2866_v5, 0.0  ;;  %v3002_v29 = vmul.f32 %v2866_v5, %v2866_v5  ;;  %v2275_v50 = vadd.f32 %v2193_v18, %v1996_v36  ;;  %v2471_v42 = vpop.f32.mrf.mxu3  ;;  %v2752_v59 = vpop.f32.mrf.mxu0  ;;  %v2604_v18 = vld [vmem:[#allocation2 + $0x16a] sm:$0xff] }
 0x243   : > { %v2937_v15 = vadd.f32 %v2936_v28, %v2935_v30 }
 0x244   : > { %v3039_v16 = vsel %vm2892_vm3, %v3002_v29, 0.0  ;;  %v2553_v13 = vadd.f32 %v2471_v42, %v2275_v50  ;;  %v2048_v29 = vld [vmem:[#allocation2 + $0x168] sm:$0xff] }
 0x245   : > { %v3040_v54 = vadd.f32 %v3039_v16, %v3038_v27  ;;  %v1920_v0 = vpop.f32.mrf.mxu1  ;;  %3509 = vmatmul.msk.f32.gmra.mxu0 %vm328_vm1, %v2602_v32  ;;  %v2326_v42 = vld [vmem:[#allocation2 + $0x169] sm:$0xff] }
 0x246   : > { %v2831_v38 = vadd.f32 %v2749_v48, %v2553_v13  ;;  %3441 = vmatmul.msk.f32.gmra.mxu2 %vm328_vm1, %v2046_v19  ;;  %v2325_v48 = vld [vmem:[#allocation2 + $0x159] sm:$0xff]  ;;  %v1998_v6 = vadd.f32 %v1920_v0, %v4311_v61 }
 0x247   : > { %3475 = vmatmul.msk.f32.gmra.mxu3 %vm328_vm1, %v2324_v14 }
 0x248   : > { %v2867_v60 = vadd.f32 %v4535_v40, %v2831_v38  ;;  %3408 = vmatmul.msk.f32.gmra.mxu1 %vm328_vm1, %v2601_v52 }
 0x249   : > { %v2196_v44 = vpop.f32.mrf.mxu2 }
 0x24a   : > { %2900 = vst.msk [vmem:[%s4546_s28 + $0x38] sm:$0xff] %vm2892_vm3, %v2867_v60  ;;  %v2938_v35 = vsel %vm2892_vm3, %v2867_v60, 0.0  ;;  %v3003_v39 = vmul.f32 %v2867_v60, %v2867_v60  ;;  %v2276_v7 = vadd.f32 %v2196_v44, %v1997_v11  ;;  %v2474_v34 = vpop.f32.mrf.mxu3  ;;  %v2755_v47 = vpop.f32.mrf.mxu0  ;;  %v2605_v60 = vld [vmem:[#allocation2 + $0x172] sm:$0xff] }
 0x24b   : > { %v2939_v33 = vadd.f32 %v2938_v35, %v2937_v15  ;;  %v2049_v35 = vld [vmem:[#allocation2 + $0x170] sm:$0xff] }
 0x24c   : > { %v3041_v24 = vsel %vm2892_vm3, %v3003_v39, 0.0  ;;  %v2554_v43 = vadd.f32 %v2474_v34, %v2276_v7  ;;  %v2327_v7 = vld [vmem:[#allocation2 + $0x171] sm:$0xff] }
 0x24d   : > { %v3042_v30 = vadd.f32 %v3041_v24, %v3040_v54  ;;  %v1923_v55 = vpop.f32.mrf.mxu1  ;;  %3510 = vmatmul.msk.f32.gmra.mxu0 %vm328_vm1, %v2603_v1 }
 0x24e   : > { %v2832_v52 = vadd.f32 %v2752_v59, %v2554_v43  ;;  %3442 = vmatmul.msk.f32.gmra.mxu2 %vm328_vm1, %v2047_v23  ;;  %v1999_v19 = vadd.f32 %v1923_v55, %v4321_v45 }
 0x24f   : > { %3476 = vmatmul.msk.f32.gmra.mxu3 %vm328_vm1, %v2325_v48 }
 0x250   : > { %v2868_v17 = vadd.f32 %v4535_v40, %v2832_v52  ;;  %3409 = vmatmul.msk.f32.gmra.mxu1 %vm328_vm1, %v2602_v32 }
 0x251   : > { %v2199_v26 = vpop.f32.mrf.mxu2 }
 0x252   : > { %2901 = vst.msk [vmem:[%s4546_s28 + $0x40] sm:$0xff] %vm2892_vm3, %v2868_v17  ;;  %v2940_v27 = vsel %vm2892_vm3, %v2868_v17, 0.0  ;;  %v3004_v10 = vmul.f32 %v2868_v17, %v2868_v17  ;;  %v2277_v12 = vadd.f32 %v2199_v26, %v1998_v6  ;;  %v2477_v36 = vpop.f32.mrf.mxu3  ;;  %v2758_v5 = vpop.f32.mrf.mxu0  ;;  %v2606_v6 = vld [vmem:[#allocation2 + $0x182] sm:$0xff] }
 0x253   : > { %v2941_v28 = vadd.f32 %v2940_v27, %v2939_v33  ;;  %v2050_v26 = vld [vmem:[#allocation2 + $0x180] sm:$0xff] }
 0x254   : > { %v3043_v50 = vsel %vm2892_vm3, %v3004_v10, 0.0  ;;  %v2555_v61 = vadd.f32 %v2477_v36, %v2277_v12  ;;  %v2328_v10 = vld [vmem:[#allocation2 + $0x181] sm:$0xff] }
 0x255   : > { %v3044_v59 = vadd.f32 %v3043_v50, %v3042_v30  ;;  %v1926_v15 = vpop.f32.mrf.mxu1  ;;  %3511 = vmatmul.msk.f32.gmra.mxu0 %vm328_vm1, %v2604_v18 }
 0x256   : > { %v2833_v32 = vadd.f32 %v2755_v47, %v2555_v61  ;;  %3443 = vmatmul.msk.f32.gmra.mxu2 %vm328_vm1, %v2048_v29  ;;  %v2000_v33 = vadd.f32 %v1926_v15, %v4329_v62 }
 0x257   : > { %3477 = vmatmul.msk.f32.gmra.mxu3 %vm328_vm1, %v2326_v42 }
 0x258   : > { %v2869_v16 = vadd.f32 %v4535_v40, %v2833_v32  ;;  %3410 = vmatmul.msk.f32.gmra.mxu1 %vm328_vm1, %v2603_v1  ;;  %v2607_v32 = vld [vmem:[#allocation2 + $0x18a] sm:$0xff] }
 0x259   : > { %v2202_v13 = vpop.f32.mrf.mxu2 }
 0x25a   : > { %2902 = vst.msk [vmem:[%s4546_s28 + $0x48] sm:$0xff] %vm2892_vm3, %v2869_v16  ;;  %v2942_v14 = vsel %vm2892_vm3, %v2869_v16, 0.0  ;;  %v3005_v54 = vmul.f32 %v2869_v16, %v2869_v16  ;;  %v2278_v0 = vadd.f32 %v2202_v13, %v1999_v19  ;;  %v2480_v38 = vpop.f32.mrf.mxu3  ;;  %v2761_v11 = vpop.f32.mrf.mxu0  ;;  %v2051_v16 = vld [vmem:[#allocation2 + $0x188] sm:$0xff] }
 0x25b   : > { %v2943_v44 = vadd.f32 %v2942_v14, %v2941_v28  ;;  %v2329_v14 = vld [vmem:[#allocation2 + $0x189] sm:$0xff] }
 0x25c   : > { %v3045_v39 = vsel %vm2892_vm3, %v3005_v54, 0.0  ;;  %v2556_v45 = vadd.f32 %v2480_v38, %v2278_v0 }
 0x25d   : > { %v3046_v34 = vadd.f32 %v3045_v39, %v3044_v59  ;;  %v1929_v47 = vpop.f32.mrf.mxu1  ;;  %3512 = vmatmul.msk.f32.gmra.mxu0 %vm328_vm1, %v2605_v60 }
 0x25e   : > { %v2834_v1 = vadd.f32 %v2758_v5, %v2556_v45  ;;  %3444 = vmatmul.msk.f32.gmra.mxu2 %vm328_vm1, %v2049_v35 }
 0x25f   : > { %3478 = vmatmul.msk.f32.gmra.mxu3 %vm328_vm1, %v2327_v7 }
 0x260   : > { %v2870_v23 = vadd.f32 %v4535_v40, %v2834_v1  ;;  %3411 = vmatmul.msk.f32.gmra.mxu1 %vm328_vm1, %v2604_v18  ;;  %v2001_v18 = vadd.f32 %v1929_v47, %v4337_v4  ;;  %v2608_v47 = vld [vmem:[#allocation2 + $0x19a] sm:$0xff] }
 0x261   : > { %v2205_v24 = vpop.f32.mrf.mxu2 }
 0x262   : > { %2903 = vst.msk [vmem:[%s4546_s28 + $0x50] sm:$0xff] %vm2892_vm3, %v2870_v23  ;;  %v2944_v43 = vsel %vm2892_vm3, %v2870_v23, 0.0  ;;  %v3006_v48 = vmul.f32 %v2870_v23, %v2870_v23  ;;  %v2279_v30 = vadd.f32 %v2205_v24, %v2000_v33  ;;  %v2483_v55 = vpop.f32.mrf.mxu3  ;;  %v2764_v52 = vpop.f32.mrf.mxu0  ;;  %v2052_v33 = vld [vmem:[#allocation2 + $0x198] sm:$0xff] }
 0x263   : > { %v2945_v17 = vadd.f32 %v2944_v43, %v2943_v44  ;;  %v2330_v24 = vld [vmem:[#allocation2 + $0x199] sm:$0xff] }
 0x264   : > { %v3047_v27 = vsel %vm2892_vm3, %v3006_v48, 0.0  ;;  %v2557_v62 = vadd.f32 %v2483_v55, %v2279_v30 }
 0x265   : > { %v3048_v12 = vadd.f32 %v3047_v27, %v3046_v34  ;;  %v1932_v36 = vpop.f32.mrf.mxu1  ;;  %3513 = vmatmul.msk.f32.gmra.mxu0 %vm328_vm1, %v2606_v6 }
 0x266   : > { %v2835_v5 = vadd.f32 %v2761_v11, %v2557_v62  ;;  %3445 = vmatmul.msk.f32.gmra.mxu2 %vm328_vm1, %v2050_v26  ;;  %v2002_v11 = vadd.f32 %v1932_v36, %v4344_v8 }
 0x267   : > { %3479 = vmatmul.msk.f32.gmra.mxu3 %vm328_vm1, %v2328_v10 }
 0x268   : > { %v2871_v28 = vadd.f32 %v4535_v40, %v2835_v5  ;;  %3412 = vmatmul.msk.f32.gmra.mxu1 %vm328_vm1, %v2605_v60  ;;  %v2053_v5 = vld [vmem:[#allocation2 + $0x1a0] sm:$0xff] }
 0x269   : > { %v2208_v29 = vpop.f32.mrf.mxu2 }
 0x26a   : > { %2904 = vst.msk [vmem:[%s4546_s28 + $0x58] sm:$0xff] %vm2892_vm3, %v2871_v28  ;;  %v2946_v50 = vsel %vm2892_vm3, %v2871_v28, 0.0  ;;  %v3007_v61 = vmul.f32 %v2871_v28, %v2871_v28  ;;  %v2280_v42 = vadd.f32 %v2208_v29, %v2001_v18  ;;  %v2486_v59 = vpop.f32.mrf.mxu3  ;;  %v2767_v15 = vpop.f32.mrf.mxu0  ;;  %v2331_v28 = vld [vmem:[#allocation2 + $0x1a1] sm:$0xff] }
 0x26b   : > { %v2947_v19 = vadd.f32 %v2946_v50, %v2945_v17 }
 0x26c   : > { %v3049_v13 = vsel %vm2892_vm3, %v3007_v61, 0.0  ;;  %v2558_v4 = vadd.f32 %v2486_v59, %v2280_v42 }
 0x26d   : > { %v3050_v54 = vadd.f32 %v3049_v13, %v3048_v12  ;;  %v1935_v0 = vpop.f32.mrf.mxu1  ;;  %3514 = vmatmul.msk.f32.gmra.mxu0 %vm328_vm1, %v2607_v32  ;;  %v2609_v12 = vld [vmem:[#allocation2 + $0x1a2] sm:$0xff] }
 0x26e   : > { %v2836_v38 = vadd.f32 %v2764_v52, %v2558_v4  ;;  %3446 = vmatmul.msk.f32.gmra.mxu2 %vm328_vm1, %v2051_v16  ;;  %v2003_v55 = vadd.f32 %v1935_v0, %v4351_v31 }
 0x26f   : > { %3480 = vmatmul.msk.f32.gmra.mxu3 %vm328_vm1, %v2329_v14 }
 0x270   : > { %v2872_v60 = vadd.f32 %v4535_v40, %v2836_v38  ;;  %3413 = vmatmul.msk.f32.gmra.mxu1 %vm328_vm1, %v2606_v6 }
 0x271   : > { %v2211_v44 = vpop.f32.mrf.mxu2 }
 0x272   : > { %2905 = vst.msk [vmem:[%s4546_s28 + $0x60] sm:$0xff] %vm2892_vm3, %v2872_v60  ;;  %v2948_v35 = vsel %vm2892_vm3, %v2872_v60, 0.0  ;;  %v3008_v39 = vmul.f32 %v2872_v60, %v2872_v60  ;;  %v2281_v45 = vadd.f32 %v2211_v44, %v2002_v11  ;;  %v2489_v7 = vpop.f32.mrf.mxu3  ;;  %v2770_v34 = vpop.f32.mrf.mxu0 }
 0x273   : > { %v2949_v1 = vadd.f32 %v2948_v35, %v2947_v19 }
 0x274   : > { %v3051_v23 = vsel %vm2892_vm3, %v3008_v39, 0.0  ;;  %v2559_v8 = vadd.f32 %v2489_v7, %v2281_v45 }
 0x275   : > { %v3052_v43 = vadd.f32 %v3051_v23, %v3050_v54  ;;  %v1938_v48 = vpop.f32.mrf.mxu1  ;;  %3515 = vmatmul.msk.f32.gmra.mxu0 %vm328_vm1, %v2608_v47 }
 0x276   : > { %v2837_v30 = vadd.f32 %v2767_v15, %v2559_v8  ;;  %3447 = vmatmul.msk.f32.gmra.mxu2 %vm328_vm1, %v2052_v33  ;;  %v2004_v42 = vadd.f32 %v1938_v48, %v4360_v37 }
 0x277   : > { %3481 = vmatmul.msk.f32.gmra.mxu3 %vm328_vm1, %v2330_v24 }
 0x278   : > { %v2873_v52 = vadd.f32 %v4535_v40, %v2837_v30  ;;  %3414 = vmatmul.msk.f32.gmra.mxu1 %vm328_vm1, %v2607_v32 }
 0x279   : > { %v2214_v6 = vpop.f32.mrf.mxu2 }
 0x27a   : > { %2906 = vst.msk [vmem:[%s4546_s28 + $0x68] sm:$0xff] %vm2892_vm3, %v2873_v52  ;;  %v2950_v17 = vsel %vm2892_vm3, %v2873_v52, 0.0  ;;  %v3009_v26 = vmul.f32 %v2873_v52, %v2873_v52  ;;  %v2282_v27 = vadd.f32 %v2214_v6, %v2003_v55  ;;  %v2492_v62 = vpop.f32.mrf.mxu3  ;;  %v2773_v10 = vpop.f32.mrf.mxu0 }
 0x27b   : > { %v2951_v36 = vadd.f32 %v2950_v17, %v2949_v1 }
 0x27c   : > { %v3053_v18 = vsel %vm2892_vm3, %v3009_v26, 0.0  ;;  %v2560_v31 = vadd.f32 %v2492_v62, %v2282_v27 }
 0x27d   : > { %v3054_v29 = vadd.f32 %v3053_v18, %v3052_v43  ;;  %v1941_v50 = vpop.f32.mrf.mxu1  ;;  %3516 = vmatmul.msk.f32.gmra.mxu0 %vm328_vm1, %v2609_v12 }
 0x27e   : > { %v2838_v61 = vadd.f32 %v2770_v34, %v2560_v31  ;;  %3448 = vmatmul.msk.f32.gmra.mxu2 %vm328_vm1, %v2053_v5  ;;  %v2005_v37 = vadd.f32 %v1941_v50, %v4371_v46 }
 0x27f   : > { %3482 = vmatmul.msk.f32.gmra.mxu3 %vm328_vm1, %v2331_v28 }
 0x280   : > { %v2874_v59 = vadd.f32 %v4535_v40, %v2838_v61 }
 0x281   : > { %v2217_v15 = vpop.f32.mrf.mxu2 }
 0x282   : > { %2907 = vst.msk [vmem:[%s4546_s28 + $0x70] sm:$0xff] %vm2892_vm3, %v2874_v59  ;;  %v2952_v32 = vsel %vm2892_vm3, %v2874_v59, 0.0  ;;  %v3010_v19 = vmul.f32 %v2874_v59, %v2874_v59  ;;  %v2283_v16 = vadd.f32 %v2217_v15, %v2004_v42  ;;  %v2495_v13 = vpop.f32.mrf.mxu3  ;;  %v2776_v4 = vpop.f32.mrf.mxu0 }
 0x283   : > { %v2953_v14 = vadd.f32 %v2952_v32, %v2951_v36 }
 0x284   : > { %v3055_v54 = vsel %vm2892_vm3, %v3010_v19, 0.0  ;;  %v2561_v0 = vadd.f32 %v2495_v13, %v2283_v16 }
 0x285   : > { %v3056_v38 = vadd.f32 %v3055_v54, %v3054_v29  ;;  %v1944_v11 = vpop.f32.mrf.mxu1 }
 0x286   : > { %v2839_v60 = vadd.f32 %v2773_v10, %v2561_v0  ;;  %v2006_v46 = vadd.f32 %v1944_v11, %v4382_v41 }
 0x288   : > { %v2875_v44 = vadd.f32 %v4535_v40, %v2839_v60 }
 0x289   : > { %v2220_v35 = vpop.f32.mrf.mxu2 }
 0x28a   : > { %2908 = vst.msk [vmem:[%s4546_s28 + $0x78] sm:$0xff] %vm2892_vm3, %v2875_v44  ;;  %v2954_v39 = vsel %vm2892_vm3, %v2875_v44, 0.0  ;;  %v3011_v45 = vmul.f32 %v2875_v44, %v2875_v44  ;;  %v2284_v7 = vadd.f32 %v2220_v35, %v2005_v37  ;;  %v2498_v34 = vpop.f32.mrf.mxu3  ;;  %v2779_v47 = vpop.f32.mrf.mxu0 }
 0x28b   : > { %v2955_v1 = vadd.f32 %v2954_v39, %v2953_v14 }
 0x28c   : > { %v3057_v33 = vsel %vm2892_vm3, %v3011_v45, 0.0  ;;  %v2562_v23 = vadd.f32 %v2498_v34, %v2284_v7 }
 0x28d   : > { %v3058_v8 = vadd.f32 %v3057_v33, %v3056_v38  ;;  %v1947_v24 = vpop.f32.mrf.mxu1 }
 0x28e   : > { %v2840_v43 = vadd.f32 %v2776_v4, %v2562_v23  ;;  %v2007_v41 = vadd.f32 %v1947_v24, %v4393_v63 }
 0x290   : > { %v2876_v48 = vadd.f32 %v4535_v40, %v2840_v43 }
 0x291   : > { %v2223_v30 = vpop.f32.mrf.mxu2 }
 0x292   : > { %2909 = vst.msk [vmem:[%s4546_s28 + $0x80] sm:$0xff] %vm2892_vm3, %v2876_v48  ;;  %v2956_v55 = vsel %vm2892_vm3, %v2876_v48, 0.0  ;;  %v3012_v52 = vmul.f32 %v2876_v48, %v2876_v48  ;;  %v2285_v6 = vadd.f32 %v2223_v30, %v2006_v46  ;;  %v2501_v17 = vpop.f32.mrf.mxu3  ;;  %v2782_v26 = vpop.f32.mrf.mxu0 }
 0x293   : > { %v2957_v27 = vadd.f32 %v2956_v55, %v2955_v1 }
 0x294   : > { %v3059_v62 = vsel %vm2892_vm3, %v3012_v52, 0.0  ;;  %v2563_v10 = vadd.f32 %v2501_v17, %v2285_v6 }
 0x295   : > { %v3060_v12 = vadd.f32 %v3059_v62, %v3058_v8  ;;  %v1950_v36 = vpop.f32.mrf.mxu1 }
 0x296   : > { %v2841_v5 = vadd.f32 %v2779_v47, %v2563_v10  ;;  %v2008_v63 = vadd.f32 %v1950_v36, %v4404_v49 }
 0x298   : > { %v2877_v18 = vadd.f32 %v4535_v40, %v2841_v5 }
 0x299   : > { %v2226_v31 = vpop.f32.mrf.mxu2 }
 0x29a   : > { %2910 = vst.msk [vmem:[%s4546_s28 + $0x88] sm:$0xff] %vm2892_vm3, %v2877_v18  ;;  %v2958_v28 = vsel %vm2892_vm3, %v2877_v18, 0.0  ;;  %v3013_v29 = vmul.f32 %v2877_v18, %v2877_v18  ;;  %v2286_v50 = vadd.f32 %v2226_v31, %v2007_v41  ;;  %v2504_v61 = vpop.f32.mrf.mxu3  ;;  %v2785_v42 = vpop.f32.mrf.mxu0 }
 0x29b   : > { %v2959_v59 = vadd.f32 %v2958_v28, %v2957_v27 }
 0x29c   : > { %v3061_v15 = vsel %vm2892_vm3, %v3013_v29, 0.0  ;;  %v2564_v32 = vadd.f32 %v2504_v61, %v2286_v50 }
 0x29d   : > { %v3062_v19 = vadd.f32 %v3061_v15, %v3060_v12  ;;  %v1953_v16 = vpop.f32.mrf.mxu1 }
 0x29e   : > { %v2842_v13 = vadd.f32 %v2782_v26, %v2564_v32  ;;  %v2009_v49 = vadd.f32 %v1953_v16, %v4414_v56 }
 0x2a0   : > { %v2878_v4 = vadd.f32 %v4535_v40, %v2842_v13 }
 0x2a1   : > { %v2229_v14 = vpop.f32.mrf.mxu2 }
 0x2a2   : > { %2911 = vst.msk [vmem:[%s4546_s28 + $0x90] sm:$0xff] %vm2892_vm3, %v2878_v4  ;;  %v2960_v54 = vsel %vm2892_vm3, %v2878_v4, 0.0  ;;  %v3014_v0 = vmul.f32 %v2878_v4, %v2878_v4  ;;  %v2287_v38 = vadd.f32 %v2229_v14, %v2008_v63  ;;  %v2507_v11 = vpop.f32.mrf.mxu3  ;;  %v2788_v60 = vpop.f32.mrf.mxu0 }
 0x2a3   : > { %v2961_v37 = vadd.f32 %v2960_v54, %v2959_v59 }
 0x2a4   : > { %v3063_v44 = vsel %vm2892_vm3, %v3014_v0, 0.0  ;;  %v2565_v35 = vadd.f32 %v2507_v11, %v2287_v38 }
 0x2a5   : > { %v3064_v39 = vadd.f32 %v3063_v44, %v3062_v19  ;;  %v1956_v45 = vpop.f32.mrf.mxu1 }
 0x2a6   : > { %v2843_v7 = vadd.f32 %v2785_v42, %v2565_v35  ;;  %v2010_v56 = vadd.f32 %v1956_v45, %v4424_v21 }
 0x2a8   : > { %v2879_v34 = vadd.f32 %v4535_v40, %v2843_v7 }
 0x2a9   : > { %v2232_v47 = vpop.f32.mrf.mxu2 }
 0x2aa   : > { %2912 = vst.msk [vmem:[%s4546_s28 + $0x98] sm:$0xff] %vm2892_vm3, %v2879_v34  ;;  %v2962_v1 = vsel %vm2892_vm3, %v2879_v34, 0.0  ;;  %v3015_v33 = vmul.f32 %v2879_v34, %v2879_v34  ;;  %v2288_v23 = vadd.f32 %v2232_v47, %v2009_v49  ;;  %v2510_v8 = vpop.f32.mrf.mxu3  ;;  %v2791_v24 = vpop.f32.mrf.mxu0 }
 0x2ab   : > { %v2963_v43 = vadd.f32 %v2962_v1, %v2961_v37 }
 0x2ac   : > { %v3065_v46 = vsel %vm2892_vm3, %v3015_v33, 0.0  ;;  %v2566_v48 = vadd.f32 %v2510_v8, %v2288_v23 }
 0x2ad   : > { %v3066_v30 = vadd.f32 %v3065_v46, %v3064_v39  ;;  %v1959_v55 = vpop.f32.mrf.mxu1 }
 0x2ae   : > { %v2844_v52 = vadd.f32 %v2788_v60, %v2566_v48  ;;  %v2011_v21 = vadd.f32 %v1959_v55, %v4434_v3 }
 0x2b0   : > { %v2880_v6 = vadd.f32 %v4535_v40, %v2844_v52 }
 0x2b1   : > { %v2235_v17 = vpop.f32.mrf.mxu2 }
 0x2b2   : > { %2913 = vst.msk [vmem:[%s4546_s28 + $0xa0] sm:$0xff] %vm2892_vm3, %v2880_v6  ;;  %v2964_v26 = vsel %vm2892_vm3, %v2880_v6, 0.0  ;;  %v3016_v27 = vmul.f32 %v2880_v6, %v2880_v6  ;;  %v2289_v62 = vadd.f32 %v2235_v17, %v2010_v56  ;;  %v2513_v10 = vpop.f32.mrf.mxu3  ;;  %v2794_v12 = vpop.f32.mrf.mxu0 }
 0x2b3   : > { %v2965_v36 = vadd.f32 %v2964_v26, %v2963_v43 }
 0x2b4   : > { %v3067_v5 = vsel %vm2892_vm3, %v3016_v27, 0.0  ;;  %v2567_v41 = vadd.f32 %v2513_v10, %v2289_v62 }
 0x2b5   : > { %v3068_v18 = vadd.f32 %v3067_v5, %v3066_v30  ;;  %v1962_v31 = vpop.f32.mrf.mxu1 }
 0x2b6   : > { %v2845_v28 = vadd.f32 %v2791_v24, %v2567_v41  ;;  %v2012_v3 = vadd.f32 %v1962_v31, %v4444_v2 }
 0x2b8   : > { %v2881_v29 = vadd.f32 %v4535_v40, %v2845_v28 }
 0x2b9   : > { %v2238_v50 = vpop.f32.mrf.mxu2 }
 0x2ba   : > { %2914 = vst.msk [vmem:[%s4546_s28 + $0xa8] sm:$0xff] %vm2892_vm3, %v2881_v29  ;;  %v2966_v61 = vsel %vm2892_vm3, %v2881_v29, 0.0  ;;  %v3017_v42 = vmul.f32 %v2881_v29, %v2881_v29  ;;  %v2290_v59 = vadd.f32 %v2238_v50, %v2011_v21  ;;  %v2516_v15 = vpop.f32.mrf.mxu3  ;;  %v2797_v32 = vpop.f32.mrf.mxu0 }
 0x2bb   : > { %v2967_v19 = vadd.f32 %v2966_v61, %v2965_v36 }
 0x2bc   : > { %v3069_v16 = vsel %vm2892_vm3, %v3017_v42, 0.0  ;;  %v2568_v13 = vadd.f32 %v2516_v15, %v2290_v59 }
 0x2bd   : > { %v3070_v63 = vadd.f32 %v3069_v16, %v3068_v18  ;;  %v1965_v4 = vpop.f32.mrf.mxu1 }
 0x2be   : > { %v2846_v14 = vadd.f32 %v2794_v12, %v2568_v13  ;;  %v2013_v2 = vadd.f32 %v1965_v4, %v4454_v22 }
 0x2c0   : > { %v2882_v54 = vadd.f32 %v4535_v40, %v2846_v14 }
 0x2c1   : > { %v2241_v0 = vpop.f32.mrf.mxu2 }
 0x2c2   : > { %2915 = vst.msk [vmem:[%s4546_s28 + $0xb0] sm:$0xff] %vm2892_vm3, %v2882_v54  ;;  %v2968_v38 = vsel %vm2892_vm3, %v2882_v54, 0.0  ;;  %v3018_v11 = vmul.f32 %v2882_v54, %v2882_v54  ;;  %v2291_v60 = vadd.f32 %v2241_v0, %v2012_v3  ;;  %v2519_v37 = vpop.f32.mrf.mxu3  ;;  %v2800_v44 = vpop.f32.mrf.mxu0 }
 0x2c3   : > { %v2969_v35 = vadd.f32 %v2968_v38, %v2967_v19 }
 0x2c4   : > { %v3071_v39 = vsel %vm2892_vm3, %v3018_v11, 0.0  ;;  %v2569_v45 = vadd.f32 %v2519_v37, %v2291_v60 }
 0x2c5   : > { %v3072_v7 = vadd.f32 %v3071_v39, %v3070_v63  ;;  %v1968_v49 = vpop.f32.mrf.mxu1 }
 0x2c6   : > { %v2847_v34 = vadd.f32 %v2797_v32, %v2569_v45  ;;  %v2014_v22 = vadd.f32 %v1968_v49, %v4464_v57 }
 0x2c8   : > { %v2883_v47 = vadd.f32 %v4535_v40, %v2847_v34 }
 0x2c9   : > { %v2244_v1 = vpop.f32.mrf.mxu2 }
 0x2ca   : > { %2916 = vst.msk [vmem:[%s4546_s28 + $0xb8] sm:$0xff] %vm2892_vm3, %v2883_v47  ;;  %v2970_v33 = vsel %vm2892_vm3, %v2883_v47, 0.0  ;;  %v3019_v23 = vmul.f32 %v2883_v47, %v2883_v47  ;;  %v2292_v8 = vadd.f32 %v2244_v1, %v2013_v2  ;;  %v2522_v24 = vpop.f32.mrf.mxu3  ;;  %v2803_v43 = vpop.f32.mrf.mxu0 }
 0x2cb   : > { %v2971_v46 = vadd.f32 %v2970_v33, %v2969_v35 }
 0x2cc   : > { %v3073_v48 = vsel %vm2892_vm3, %v3019_v23, 0.0  ;;  %v2570_v30 = vadd.f32 %v2522_v24, %v2292_v8 }
 0x2cd   : > { %v3074_v55 = vadd.f32 %v3073_v48, %v3072_v7  ;;  %v1971_v52 = vpop.f32.mrf.mxu1 }
 0x2ce   : > { %v2848_v56 = vadd.f32 %v2800_v44, %v2570_v30  ;;  %v2015_v57 = vadd.f32 %v1971_v52, %v4474_v53 }
 0x2d0   : > { %v2884_v6 = vadd.f32 %v4535_v40, %v2848_v56 }
 0x2d1   : > { %v2247_v17 = vpop.f32.mrf.mxu2 }
 0x2d2   : > { %2917 = vst.msk [vmem:[%s4546_s28 + $0xc0] sm:$0xff] %vm2892_vm3, %v2884_v6  ;;  %v2972_v26 = vsel %vm2892_vm3, %v2884_v6, 0.0  ;;  %v3020_v27 = vmul.f32 %v2884_v6, %v2884_v6  ;;  %v2293_v62 = vadd.f32 %v2247_v17, %v2014_v22  ;;  %v2525_v10 = vpop.f32.mrf.mxu3  ;;  %v2806_v12 = vpop.f32.mrf.mxu0 }
 0x2d3   : > { %v2973_v36 = vadd.f32 %v2972_v26, %v2971_v46 }
 0x2d4   : > { %v3075_v5 = vsel %vm2892_vm3, %v3020_v27, 0.0  ;;  %v2571_v41 = vadd.f32 %v2525_v10, %v2293_v62 }
 0x2d5   : > { %v3076_v18 = vadd.f32 %v3075_v5, %v3074_v55  ;;  %v1974_v31 = vpop.f32.mrf.mxu1 }
 0x2d6   : > { %v2849_v28 = vadd.f32 %v2803_v43, %v2571_v41  ;;  %v2016_v53 = vadd.f32 %v1974_v31, %v4484_v51 }
 0x2d8   : > { %v2885_v21 = vadd.f32 %v4535_v40, %v2849_v28 }
 0x2d9   : > { %v2250_v29 = vpop.f32.mrf.mxu2 }
 0x2da   : > { %2918 = vst.msk [vmem:[%s4546_s28 + $0xc8] sm:$0xff] %vm2892_vm3, %v2885_v21  ;;  %v2974_v50 = vsel %vm2892_vm3, %v2885_v21, 0.0  ;;  %v3021_v61 = vmul.f32 %v2885_v21, %v2885_v21  ;;  %v2294_v42 = vadd.f32 %v2250_v29, %v2015_v57  ;;  %v2528_v59 = vpop.f32.mrf.mxu3  ;;  %v2809_v32 = vpop.f32.mrf.mxu0 }
 0x2db   : > { %v2975_v15 = vadd.f32 %v2974_v50, %v2973_v36 }
 0x2dc   : > { %v3077_v19 = vsel %vm2892_vm3, %v3021_v61, 0.0  ;;  %v2572_v16 = vadd.f32 %v2528_v59, %v2294_v42 }
 0x2dd   : > { %v3078_v13 = vadd.f32 %v3077_v19, %v3076_v18  ;;  %v1977_v4 = vpop.f32.mrf.mxu1 }
 0x2de   : > { %v2850_v63 = vadd.f32 %v2806_v12, %v2572_v16  ;;  %v2017_v51 = vadd.f32 %v1977_v4, %v4494_v9 }
 0x2e0   : > { %v2886_v14 = vadd.f32 %v4535_v40, %v2850_v63 }
 0x2e1   : > { %v2253_v3 = vpop.f32.mrf.mxu2 }
 0x2e2   : > { %2919 = vst.msk [vmem:[%s4546_s28 + $0xd0] sm:$0xff] %vm2892_vm3, %v2886_v14  ;;  %v2976_v54 = vsel %vm2892_vm3, %v2886_v14, 0.0  ;;  %v3022_v0 = vmul.f32 %v2886_v14, %v2886_v14  ;;  %v2295_v38 = vadd.f32 %v2253_v3, %v2016_v53  ;;  %v2531_v11 = vpop.f32.mrf.mxu3  ;;  %v2812_v39 = vpop.f32.mrf.mxu0 }
 0x2e3   : > { %v2977_v60 = vadd.f32 %v2976_v54, %v2975_v15 }
 0x2e4   : > { %v3079_v37 = vsel %vm2892_vm3, %v3022_v0, 0.0  ;;  %v2573_v44 = vadd.f32 %v2531_v11, %v2295_v38 }
 0x2e5   : > { %v3080_v35 = vadd.f32 %v3079_v37, %v3078_v13  ;;  %v1980_v34 = vpop.f32.mrf.mxu1 }
 0x2e6   : > { %v2851_v45 = vadd.f32 %v2809_v32, %v2573_v44  ;;  %v2018_v9 = vadd.f32 %v1980_v34, %v4504_v20 }
 0x2e8   : > { %v2887_v7 = vadd.f32 %v4535_v40, %v2851_v45  ;;  %v3534_v40 = vld [vmem:[%s4817_s2] ss:$0 sm:$0xff] }
 0x2e9   : > { %v2256_v49 = vpop.f32.mrf.mxu2 }
 0x2ea   : > { %2920 = vst.msk [vmem:[%s4546_s28 + $0xd8] sm:$0xff] %vm2892_vm3, %v2887_v7  ;;  %v2978_v2 = vsel %vm2892_vm3, %v2887_v7, 0.0  ;;  %v3023_v47 = vmul.f32 %v2887_v7, %v2887_v7  ;;  %v2296_v1 = vadd.f32 %v2256_v49, %v2017_v51  ;;  %v2534_v33 = vpop.f32.mrf.mxu3  ;;  %v2815_v48 = vpop.f32.mrf.mxu0 }
 0x2eb   : > { %v2979_v23 = vadd.f32 %v2978_v2, %v2977_v60 }
 0x2ec   : > { %v3081_v8 = vsel %vm2892_vm3, %v3023_v47, 0.0  ;;  %v2574_v24 = vadd.f32 %v2534_v33, %v2296_v1 }
 0x2ed   : > { %v3082_v43 = vadd.f32 %v3081_v8, %v3080_v35  ;;  %v1983_v26 = vpop.f32.mrf.mxu1 }
 0x2ee   : > { %v2852_v46 = vadd.f32 %v2812_v39, %v2574_v24  ;;  %v2019_v12 = vadd.f32 %v1983_v26, %v4514_v58 }
 0x2f0   : > { %v2888_v30 = vadd.f32 %v3534_v40, %v2852_v46 }
 0x2f1   : > { %v2259_v55 = vpop.f32.mrf.mxu2 }
 0x2f2   : > { %2921 = vst.msk [vmem:[%s4546_s28 + $0xe0] sm:$0xff] %vm2892_vm3, %v2888_v30  ;;  %v2980_v52 = vsel %vm2892_vm3, %v2888_v30, 0.0  ;;  %v3024_v56 = vmul.f32 %v2888_v30, %v2888_v30  ;;  %v2297_v22 = vadd.f32 %v2259_v55, %v2018_v9  ;;  %v2537_v6 = vpop.f32.mrf.mxu3  ;;  %v2818_v41 = vpop.f32.mrf.mxu0 }
 0x2f3   : > { %v2981_v17 = vadd.f32 %v2980_v52, %v2979_v23 }
 0x2f4   : > { %v3083_v27 = vsel %vm2892_vm3, %v3024_v56, 0.0  ;;  %v2575_v62 = vadd.f32 %v2537_v6, %v2297_v22 }
 0x2f5   : > { %v3084_v20 = vadd.f32 %v3083_v27, %v3082_v43  ;;  %v1986_v42 = vpop.f32.mrf.mxu1 }
 0x2f6   : > { %v2853_v10 = vadd.f32 %v2815_v48, %v2575_v62  ;;  %v2020_v58 = vadd.f32 %v1986_v42, %v4524_v25 }
 0x2f8   : > { %v2889_v36 = vadd.f32 %v3534_v40, %v2853_v10 }
 0x2f9   : > { %v2262_v5 = vpop.f32.mrf.mxu2 }
 0x2fa   : > { %2922 = vst.msk [vmem:[%s4546_s28 + $0xe8] sm:$0xff] %vm2892_vm3, %v2889_v36  ;;  %v2982_v18 = vsel %vm2892_vm3, %v2889_v36, 0.0  ;;  %v3025_v31 = vmul.f32 %v2889_v36, %v2889_v36  ;;  %v2298_v28 = vadd.f32 %v2262_v5, %v2019_v12  ;;  %v2540_v57 = vpop.f32.mrf.mxu3  ;;  %v2821_v53 = vpop.f32.mrf.mxu0 }
 0x2fb   : > { %v2983_v21 = vadd.f32 %v2982_v18, %v2981_v17 }
 0x2fc   : > { %v3085_v29 = vsel %vm2892_vm3, %v3025_v31, 0.0  ;;  %v2576_v50 = vadd.f32 %v2540_v57, %v2298_v28 }
 0x2fd   : > { %v3086_v61 = vadd.f32 %v3085_v29, %v3084_v20 }
 0x2fe   : > { %v2854_v59 = vadd.f32 %v2818_v41, %v2576_v50 }
 0x300   : > { %v2890_v15 = vadd.f32 %v3534_v40, %v2854_v59 }
 0x301   : > { %v2265_v32 = vpop.f32.mrf.mxu2 }
 0x302   : > { %2923 = vst.msk [vmem:[%s4546_s28 + $0xf0] sm:$0xff] %vm2892_vm3, %v2890_v15  ;;  %v2984_v19 = vsel %vm2892_vm3, %v2890_v15, 0.0  ;;  %v3026_v16 = vmul.f32 %v2890_v15, %v2890_v15  ;;  %v2299_v13 = vadd.f32 %v2265_v32, %v2020_v58  ;;  %v2543_v63 = vpop.f32.mrf.mxu3 }
 0x303   : > { %v2985_v4 = vadd.f32 %v2984_v19, %v2983_v21 }
 0x304   : > { %v3087_v14 = vsel %vm2892_vm3, %v3026_v16, 0.0  ;;  %v2577_v3 = vadd.f32 %v2543_v63, %v2299_v13 }
 0x305   : > { %v3088_v54 = vadd.f32 %v3087_v14, %v3086_v61 }
 0x306   : > { %v2855_v0 = vadd.f32 %v2821_v53, %v2577_v3 }
 0x308   : > { %v2891_v38 = vadd.f32 %v3534_v40, %v2855_v0 }
 0x30a   : > { %2924 = vst.msk [vmem:[%s4546_s28 + $0xf8] sm:$0xff] %vm2892_vm3, %v2891_v38  ;;  %v2986_v25 = vsel %vm2892_vm3, %v2891_v38, 0.0  ;;  %v3027_v11 = vmul.f32 %v2891_v38, %v2891_v38 }
 0x30b   : > { %v2987_v60 = vadd.f32 %v2986_v25, %v2985_v4 }
 0x30c   : > { %v3089_v37 = vsel %vm2892_vm3, %v3027_v11, 0.0 }
 0x30d   : > { %v2988_v44 = vrot.slane %v2987_v60, 4  ;;  %v3090_v35 = vadd.f32 %v3089_v37, %v3088_v54 }
 0x30f   : > { %v2989_v39 = vadd.f32 %v2988_v44, %v2987_v60  ;;  %v3091_v45 = vrot.slane %v3090_v35, 4 }
 0x311   : > { %v2990_v51 = vrot.slane %v2989_v39, 2  ;;  %v3092_v7 = vadd.f32 %v3091_v45, %v3090_v35 }
 0x313   : > { %v2991_v49 = vadd.f32 %v2990_v51, %v2989_v39  ;;  %v3093_v34 = vrot.slane %v3092_v7, 2 }
 0x315   : > { %v2992_v2 = vrot.slane %v2991_v49, 1  ;;  %v3094_v47 = vadd.f32 %v3093_v34, %v3092_v7 }
 0x317   : > { %v2993_v1 = vadd.f32 %v2992_v2, %v2991_v49  ;;  %v3095_v33 = vrot.slane %v3094_v47, 1 }
 0x319   : > { %2995 = vst.msk [vmem:[%s292_s9] sm:$0x1] %vm2994_vm4, %v2993_v1  ;;  %v3096_v23 = vadd.f32 %v3095_v33, %v3094_v47 }
 0x31b   : > { %3097 = vst.msk [vmem:[%s295_s12] sm:$0x1] %vm2994_vm4, %v3096_v23 }
 0x31c PF: > { %s18_s24 = sadd.s32 1, %s3541_s24  }
 0x31d   : > { %p15_p4 = scmp.ge.s32.totalorder %s18_s24, 4  }
 0x31f   :  { %17 = sbr.rel (!%p15_p4) target bundleno = 1 (0x1), region = 104 }

// kernel: _lambda_.4
= control target key start
LH: loop header
LB: loop body
LE: loop exit
PB: predicated region body
PF: predicated region fallthrough
CT: control target
= control target key end

     0   :  { %s3654_s24 = smov 0   ;;  %s4939_s0 = inlined_call_operand.vmem [shape: f32[2,16,16,8], index: 0, kind: input, shape index: {}]   ;;  %s4940_s1 = inlined_call_operand.vmem [shape: f32[9,8,8], index: 1, kind: input, shape index: {}]   ;;  %s4941_s2 = inlined_call_operand.vmem [shape: f32[1,8], index: 2, kind: input, shape index: {}]   ;;  %s4942_s3 = inlined_call_operand.vmem [shape: f32[1,8], index: 3, kind: input, shape index: {}]   ;;  %s4943_s4 = inlined_call_operand.vmem [shape: f32[1,8], index: 4, kind: input, shape index: {}]   ;;  %s4944_s5 = inlined_call_operand.vmem [shape: f32[2,16,16,8], index: 5, kind: output, shape index: {0}]   ;;  %s4945_s6 = inlined_call_operand.vmem [shape: f32[2,1,8], index: 6, kind: output, shape index: {1}]   ;;  %s4946_s7 = inlined_call_operand.vmem [shape: f32[2,1,8], index: 7, kind: output, shape index: {2}]  }
   0x1 LB: > { %s3278_s25 = sadd.s32 4294967295, %s3611_s24   ;;  %p3282_p0 = scmp.ge.s32.totalorder %s3611_s24, 1  ;;  %s3611_s24 = sphi %s3654_s24, %s18_s24  }
   0x2   : > { %p242_p1 = scmp.lt.s32.totalorder %s3611_s24, 3 }
   0x4   : > { %p243_p2 = pnand %p3282_p0, %p242_p1 }
   0x6   : > { %246 = sbr.rel (%p243_p2) target bundleno = 796 (0x31c), region = 40 }
   0xb   : > { %v3287_v0 = vld [vmem:[%s4940_s1 + $0x8] sm:$0xff]  ;;  %p280_p3 = scmp.lt.s32.totalorder %s3278_s25, 1  ;;  %vm432_vm0 = vcmask 64512   ;;  %v3613_v1 = vmov 0.0   ;;  %v3672_v2 = vld [vmem:[%s4942_s3] ss:$0 sm:$0xff] }
   0xc   : > { %3587 = vmatpush.msra.mxu1 %v3287_v0  ;;  %3588 = vmatpush.msra.mxu2 %v3287_v0  ;;  %446 = vst.msk [vmem:[#allocation2 + $0x60] sm:$0xff] %vm432_vm0, %v3613_v1  ;;  %v3689_v3 = vld [vmem:[%s4943_s4] ss:$0 sm:$0xff]  ;;  %v3352_v8 = vld [vmem:[%s4940_s1 + $0x10] sm:$0xff]  ;;  %v3385_v9 = vld [vmem:[%s4940_s1 + $0x18] sm:$0xff]  ;;  %vm435_vm1 = vcmask 58368  }
   0xd   : > { %s5052_s25 = smov (!%p280_p3, %s3278_s25), 1  ;;  %3589 = vmatpush.msra.mxu3 %v3287_v0  ;;  %699 = vmatpush.msra.mxu0 %v3287_v0  ;;  %447 = vst.msk [vmem:[#allocation2 + $0x68] sm:$0xff] %vm432_vm0, %v3613_v1  ;;  %v553_v10 = vld [vmem:[%s4940_s1] sm:$0xff]  ;;  %vm3069_vm2 = vcmask 57344  }
   0xe   : > { %s3585_s30 = sshll.u32 %s5052_s25, 8  ;;  %433 = vst.msk [vmem:[#allocation2] sm:$0xff] %vm432_vm0, %v3613_v1  ;;  %1151 = vmatpush.msrb.mxu2 %v3352_v8  ;;  %908 = vmatpush.msrb.mxu1 %v553_v10  ;;  %v3418_v24 = vld [vmem:[%s4940_s1 + $0x20] sm:$0xff]  ;;  %s292_s21 = scalar_lea.vmem %s4945_s6, %s5052_s25 }
   0xf   : > { %s3684_s10 = scalar_lea.vmem %s4939_s0, %s3585_s30  ;;  %434 = vst.msk [vmem:[#allocation2 + $0x8] sm:$0xff] %vm432_vm0, %v3613_v1  ;;  %1426 = vmatpush.msrb.mxu3 %v3385_v9  ;;  %1701 = vmatpush.msrb.mxu0 %v3418_v24  ;;  %s4673_s17 = scalar_lea.vmem %s4944_s5, %s3585_s30 }
  0x10   : > { %v302_v4 = vld [vmem:[%s3684_s10 + $0x30] sm:$0xff]  ;;  %437 = vst.msk [vmem:[#allocation2 + $0x18] sm:$0xff] %vm432_vm0, %v3613_v1  ;;  %v303_v15 = vld [vmem:[%s3684_s10 + $0x38] sm:$0xff]  ;;  %v304_v30 = vld [vmem:[%s3684_s10 + $0x40] sm:$0xff]  ;;  %s295_s26 = scalar_lea.vmem %s4946_s7, %s5052_s25 }
  0x11   : > { %v338_v5 = vmul.f32 %v3672_v2, %v302_v4  ;;  %438 = vst.msk [vmem:[#allocation2 + $0x20] sm:$0xff] %vm432_vm0, %v3613_v1  ;;  %v310_v12 = vld [vmem:[%s3684_s10 + $0x70] sm:$0xff]  ;;  %v339_v17 = vmul.f32 %v3672_v2, %v303_v15  ;;  %v311_v26 = vld [vmem:[%s3684_s10 + $0x78] sm:$0xff]  ;;  %v312_v32 = vld [vmem:[%s3684_s10 + $0x80] sm:$0xff]  ;;  %v340_v36 = vmul.f32 %v3672_v2, %v304_v30 }
  0x12   : > { %440 = vst.msk [vmem:[#allocation2 + $0x30] sm:$0xff] %vm432_vm0, %v3613_v1  ;;  %v318_v13 = vld [vmem:[%s3684_s10 + $0xb0] sm:$0xff]  ;;  %v346_v14 = vmul.f32 %v3672_v2, %v310_v12  ;;  %v319_v28 = vld [vmem:[%s3684_s10 + $0xb8] sm:$0xff]  ;;  %v347_v31 = vmul.f32 %v3672_v2, %v311_v26  ;;  %v320_v35 = vld [vmem:[%s3684_s10 + $0xc0] sm:$0xff]  ;;  %v348_v39 = vmul.f32 %v3672_v2, %v312_v32 }
  0x13   : > { %v374_v6 = vadd.f32 %v3689_v3, %v338_v5  ;;  %441 = vst.msk [vmem:[#allocation2 + $0x38] sm:$0xff] %vm432_vm0, %v3613_v1  ;;  %v354_v16 = vmul.f32 %v3672_v2, %v318_v13  ;;  %v375_v20 = vadd.f32 %v3689_v3, %v339_v17  ;;  %v355_v34 = vmul.f32 %v3672_v2, %v319_v28  ;;  %v305_v38 = vld [vmem:[%s3684_s10 + $0x48] sm:$0xff]  ;;  %v296_v43 = vld [vmem:[%s3684_s10] sm:$0xff]  ;;  %v306_v49 = vld [vmem:[%s3684_s10 + $0x50] sm:$0xff] }
  0x14   : > { %443 = vst.msk [vmem:[#allocation2 + $0x48] sm:$0xff] %vm432_vm0, %v3613_v1  ;;  %v382_v18 = vadd.f32 %v3689_v3, %v346_v14  ;;  %v313_v40 = vld [vmem:[%s3684_s10 + $0x88] sm:$0xff]  ;;  %v383_v41 = vadd.f32 %v3689_v3, %v347_v31  ;;  %v356_v42 = vmul.f32 %v3672_v2, %v320_v35  ;;  %v341_v45 = vmul.f32 %v3672_v2, %v305_v38  ;;  %v314_v52 = vld [vmem:[%s3684_s10 + $0x90] sm:$0xff]  ;;  %v307_v0 = vld [vmem:[%s3684_s10 + $0x58] sm:$0xff] }
  0x15   : > { %v406_v7 = vmax.f32 %v374_v6, 0.0  ;;  %444 = vst.msk [vmem:[#allocation2 + $0x50] sm:$0xff] %vm432_vm0, %v3613_v1  ;;  %v390_v19 = vadd.f32 %v3689_v3, %v354_v16  ;;  %v407_v25 = vmax.f32 %v375_v20, 0.0  ;;  %v391_v44 = vadd.f32 %v3689_v3, %v355_v34  ;;  %v321_v46 = vld [vmem:[%s3684_s10 + $0xc8] sm:$0xff]  ;;  %v322_v60 = vld [vmem:[%s3684_s10 + $0xd0] sm:$0xff]  ;;  %v323_v15 = vld [vmem:[%s3684_s10 + $0xd8] sm:$0xff] }
  0x16   : > { %449 = vst.msk [vmem:[#allocation2 + $0x78] sm:$0xff] %vm432_vm0, %v3613_v1  ;;  %v414_v21 = vmax.f32 %v382_v18, 0.0  ;;  %v554_v23 = vld [vmem:[#allocation2 + $0x1] sm:$0xff]  ;;  %v376_v47 = vadd.f32 %v3689_v3, %v340_v36  ;;  %v349_v48 = vmul.f32 %v3672_v2, %v313_v40  ;;  %v384_v50 = vadd.f32 %v3689_v3, %v348_v39  ;;  %v298_v12 = vld [vmem:[%s3684_s10 + $0x10] sm:$0xff]  ;;  %v299_v28 = vld [vmem:[%s3684_s10 + $0x18] sm:$0xff] }
  0x17   : > { %495 = vst.msk [vmem:[#allocation2 + $0x61] sm:$0xff] %vm432_vm0, %v406_v7  ;;  %v422_v22 = vmax.f32 %v390_v19, 0.0  ;;  %3288 = vmatmul.msk.f32.vlgmr.msra.gmra.mxu0 %vm432_vm0, %v554_v23  ;;  %v332_v51 = vmul.f32 %v3672_v2, %v296_v43  ;;  %v415_v53 = vmax.f32 %v383_v41, 0.0  ;;  %v392_v54 = vadd.f32 %v3689_v3, %v356_v42  ;;  %v297_v56 = vld [vmem:[%s3684_s10 + $0x8] sm:$0xff]  ;;  %v315_v7 = vld [vmem:[%s3684_s10 + $0x98] sm:$0xff]  ;;  %v308_v19 = vld [vmem:[%s3684_s10 + $0x60] sm:$0xff] }
  0x18   : > { %450 = vst.msk [vmem:[#allocation2 + $0x80] sm:$0xff] %vm432_vm0, %v3613_v1  ;;  %v357_v55 = vmul.f32 %v3672_v2, %v321_v46  ;;  %v423_v57 = vmax.f32 %v391_v44, 0.0  ;;  %v377_v58 = vadd.f32 %v3689_v3, %v341_v45  ;;  %v342_v59 = vmul.f32 %v3672_v2, %v306_v49  ;;  %v316_v23 = vld [vmem:[%s3684_s10 + $0xa0] sm:$0xff]  ;;  %v309_v49 = vld [vmem:[%s3684_s10 + $0x68] sm:$0xff] }
  0x19   : > { %452 = vst.msk [vmem:[#allocation2 + $0x90] sm:$0xff] %vm432_vm0, %v3613_v1  ;;  %v408_v61 = vmax.f32 %v376_v47, 0.0  ;;  %v385_v62 = vadd.f32 %v3689_v3, %v349_v48  ;;  %v350_v63 = vmul.f32 %v3672_v2, %v314_v52  ;;  %v416_v4 = vmax.f32 %v384_v50, 0.0  ;;  %v324_v34 = vld [vmem:[%s3684_s10 + $0xe0] sm:$0xff]  ;;  %v317_v50 = vld [vmem:[%s3684_s10 + $0xa8] sm:$0xff] }
  0x1a   : > { %453 = vst.msk [vmem:[#allocation2 + $0x98] sm:$0xff] %vm432_vm0, %v3613_v1  ;;  %v368_v5 = vadd.f32 %v3689_v3, %v332_v51  ;;  %v333_v6 = vmul.f32 %v3672_v2, %v297_v56  ;;  %v424_v8 = vmax.f32 %v392_v54, 0.0  ;;  %v393_v9 = vadd.f32 %v3689_v3, %v357_v55 }
  0x1b   : > { %455 = vst.msk [vmem:[#allocation2 + $0xa8] sm:$0xff] %vm432_vm0, %v3613_v1  ;;  %v358_v10 = vmul.f32 %v3672_v2, %v322_v60  ;;  %v409_v13 = vmax.f32 %v377_v58, 0.0  ;;  %v343_v14 = vmul.f32 %v3672_v2, %v307_v0  ;;  %v417_v16 = vmax.f32 %v385_v62, 0.0  ;;  %v325_v58 = vld [vmem:[%s3684_s10 + $0xe8] sm:$0xff] }
  0x1c   : > { %456 = vst.msk [vmem:[#allocation2 + $0xb0] sm:$0xff] %vm432_vm0, %v3613_v1  ;;  %v386_v17 = vadd.f32 %v3689_v3, %v350_v63  ;;  %v351_v18 = vmul.f32 %v3672_v2, %v315_v7  ;;  %v400_v20 = vmax.f32 %v368_v5, 0.0  ;;  %v425_v24 = vmax.f32 %v393_v9, 0.0 }
  0x1d   : > { %458 = vst.msk [vmem:[#allocation2 + $0xc0] sm:$0xff] %vm432_vm0, %v3613_v1  ;;  %v359_v26 = vmul.f32 %v3672_v2, %v323_v15  ;;  %v379_v31 = vadd.f32 %v3689_v3, %v343_v14  ;;  %v344_v32 = vmul.f32 %v3672_v2, %v308_v19  ;;  %v335_v41 = vmul.f32 %v3672_v2, %v299_v28 }
  0x1e   : > { %v3732_v11 = vld [vmem:[#allocation2 + $0x61] sm:$0xff]  ;;  %459 = vst.msk [vmem:[#allocation2 + $0xc8] sm:$0xff] %vm432_vm0, %v3613_v1  ;;  %v418_v35 = vmax.f32 %v386_v17, 0.0  ;;  %v387_v36 = vadd.f32 %v3689_v3, %v351_v18  ;;  %v360_v45 = vmul.f32 %v3672_v2, %v324_v34  ;;  %v353_v54 = vmul.f32 %v3672_v2, %v317_v50 }
  0x1f   : > { %3296 = vmatmul.msk.f32.vlgmr.msra.gmra.mxu1 %vm432_vm0, %v3732_v11  ;;  %461 = vst.msk [vmem:[#allocation2 + $0xd8] sm:$0xff] %vm432_vm0, %v3613_v1  ;;  %v395_v44 = vadd.f32 %v3689_v3, %v359_v26  ;;  %v411_v47 = vmax.f32 %v379_v31, 0.0  ;;  %v380_v48 = vadd.f32 %v3689_v3, %v344_v32  ;;  %v371_v56 = vadd.f32 %v3689_v3, %v335_v41  ;;  %v301_v17 = vld [vmem:[%s3684_s10 + $0x28] sm:$0xff]  ;;  %v3517_v31 = vld [vmem:[%s4940_s1 + $0x38] sm:$0xff] }
  0x20   : > { %462 = vst.msk [vmem:[#allocation2 + $0xe0] sm:$0xff] %vm432_vm0, %v3613_v1  ;;  %v419_v51 = vmax.f32 %v387_v36, 0.0  ;;  %v396_v60 = vadd.f32 %v3689_v3, %v360_v45  ;;  %v361_v62 = vmul.f32 %v3672_v2, %v325_v58  ;;  %v3451_v32 = vld [vmem:[%s4940_s1 + $0x28] sm:$0xff] }
  0x21   : > { %464 = vst.msk [vmem:[#allocation2 + $0xf0] sm:$0xff] %vm432_vm0, %v3613_v1  ;;  %v412_v0 = vmax.f32 %v380_v48, 0.0  ;;  %1976 = vmatpush.msra.mxu1 %v3451_v32  ;;  %v1006_v50 = vld [vmem:[#allocation2 + $0x2] sm:$0xff] }
  0x22   : > { %465 = vst.msk [vmem:[#allocation2 + $0xf8] sm:$0xff] %vm432_vm0, %v3613_v1 }
  0x23   : > { %467 = vst.msk [vmem:[#allocation2 + $0x108] sm:$0xff] %vm432_vm0, %v3613_v1 }
  0x24   : > { %468 = vst.msk [vmem:[#allocation2 + $0x110] sm:$0xff] %vm432_vm0, %v3613_v1 }
  0x25   : > { %470 = vst.msk [vmem:[#allocation2 + $0x120] sm:$0xff] %vm432_vm0, %v3613_v1 }
  0x26   : > { %471 = vst.msk [vmem:[#allocation2 + $0x128] sm:$0xff] %vm432_vm0, %v3613_v1 }
  0x27   : > { %473 = vst.msk [vmem:[#allocation2 + $0x138] sm:$0xff] %vm432_vm0, %v3613_v1 }
  0x28   : > { %474 = vst.msk [vmem:[#allocation2 + $0x140] sm:$0xff] %vm432_vm0, %v3613_v1 }
  0x29   : > { %476 = vst.msk [vmem:[#allocation2 + $0x150] sm:$0xff] %vm432_vm0, %v3613_v1 }
  0x2a   : > { %477 = vst.msk [vmem:[#allocation2 + $0x158] sm:$0xff] %vm432_vm0, %v3613_v1 }
  0x2b   : > { %479 = vst.msk [vmem:[#allocation2 + $0x168] sm:$0xff] %vm432_vm0, %v3613_v1 }
  0x2c   : > { %480 = vst.msk [vmem:[#allocation2 + $0x170] sm:$0xff] %vm432_vm0, %v3613_v1 }
  0x2d   : > { %482 = vst.msk [vmem:[#allocation2 + $0x180] sm:$0xff] %vm432_vm0, %v3613_v1 }
  0x2e   : > { %483 = vst.msk [vmem:[#allocation2 + $0x188] sm:$0xff] %vm432_vm0, %v3613_v1 }
  0x2f   : > { %485 = vst.msk [vmem:[#allocation2 + $0x198] sm:$0xff] %vm432_vm0, %v3613_v1 }
  0x30   : > { %486 = vst.msk [vmem:[#allocation2 + $0x1a0] sm:$0xff] %vm432_vm0, %v3613_v1 }
  0x31   : > { %503 = vst.msk [vmem:[#allocation2 + $0xc1] sm:$0xff] %vm432_vm0, %v414_v21  ;;  %v369_v21 = vadd.f32 %v3689_v3, %v333_v6 }
  0x32   : > { %511 = vst.msk [vmem:[#allocation2 + $0x121] sm:$0xff] %vm432_vm0, %v422_v22  ;;  %v334_v22 = vmul.f32 %v3672_v2, %v298_v12 }
  0x33   : > { %448 = vst.msk [vmem:[#allocation2 + $0x70] sm:$0x3] %vm435_vm1, %v3613_v1  ;;  %v401_v39 = vmax.f32 %v369_v21, 0.0 }
  0x34   : > { %496 = vst.msk [vmem:[#allocation2 + $0x69] sm:$0xff] %vm432_vm0, %v407_v25  ;;  %v394_v25 = vadd.f32 %v3689_v3, %v358_v10  ;;  %v370_v40 = vadd.f32 %v3689_v3, %v334_v22  ;;  %v403_v10 = vmax.f32 %v371_v56, 0.0 }
  0x35   : > { %436 = vst.msk [vmem:[#allocation2 + $0x10] sm:$0x3] %vm435_vm1, %v3613_v1 }
  0x36   : > { %439 = vst.msk [vmem:[#allocation2 + $0x28] sm:$0x3] %vm435_vm1, %v3613_v1  ;;  %v426_v43 = vmax.f32 %v394_v25, 0.0  ;;  %v402_v55 = vmax.f32 %v370_v40, 0.0 }
  0x37   : > { %442 = vst.msk [vmem:[#allocation2 + $0x40] sm:$0x3] %vm435_vm1, %v3613_v1 }
  0x38   : > { %v3799_v27 = vld [vmem:[#allocation2 + $0xc1] sm:$0xff]  ;;  %445 = vst.msk [vmem:[#allocation2 + $0x58] sm:$0x3] %vm435_vm1, %v3613_v1 }
  0x39   : > { %3304 = vmatmul.msk.f32.vlgmr.msra.gmra.mxu2 %vm432_vm0, %v3799_v27  ;;  %v3806_v29 = vld [vmem:[#allocation2 + $0x121] sm:$0xff]  ;;  %451 = vst.msk [vmem:[#allocation2 + $0x88] sm:$0x3] %vm435_vm1, %v3613_v1 }
  0x3a   : > { %3312 = vmatmul.msk.f32.vlgmr.msra.gmra.mxu3 %vm432_vm0, %v3806_v29  ;;  %454 = vst.msk [vmem:[#allocation2 + $0xa0] sm:$0x3] %vm435_vm1, %v3613_v1 }
  0x3b   : > { %v3817_v33 = vld [vmem:[#allocation2 + $0x69] sm:$0xff]  ;;  %457 = vst.msk [vmem:[#allocation2 + $0xb8] sm:$0x3] %vm435_vm1, %v3613_v1  ;;  %2527 = vmatpush.msra.mxu3 %v3517_v31 }
  0x3c   : > { %3297 = vmatmul.msk.f32.gmra.mxu1 %vm432_vm0, %v3817_v33  ;;  %460 = vst.msk [vmem:[#allocation2 + $0xd0] sm:$0x3] %vm435_vm1, %v3613_v1  ;;  %v555_v37 = vld [vmem:[#allocation2 + $0x9] sm:$0xff] }
  0x3d   : > { %463 = vst.msk [vmem:[#allocation2 + $0xe8] sm:$0x3] %vm435_vm1, %v3613_v1  ;;  %3289 = vmatmul.msk.f32.gmra.mxu0 %vm432_vm0, %v555_v37  ;;  %v352_v37 = vmul.f32 %v3672_v2, %v316_v23 }
  0x3e   : > { %466 = vst.msk [vmem:[#allocation2 + $0x100] sm:$0x3] %vm435_vm1, %v3613_v1 }
  0x3f   : > { %469 = vst.msk [vmem:[#allocation2 + $0x118] sm:$0x3] %vm435_vm1, %v3613_v1  ;;  %v388_v52 = vadd.f32 %v3689_v3, %v352_v37 }
  0x40   : > { %472 = vst.msk [vmem:[#allocation2 + $0x130] sm:$0x3] %vm435_vm1, %v3613_v1 }
  0x41   : > { %475 = vst.msk [vmem:[#allocation2 + $0x148] sm:$0x3] %vm435_vm1, %v3613_v1  ;;  %v420_v7 = vmax.f32 %v388_v52, 0.0  ;;  %v522_v52 = vld [vmem:[#allocation2 + $0x8] sm:$0xff] }
  0x42   : > { %478 = vst.msk [vmem:[#allocation2 + $0x160] sm:$0x3] %vm435_vm1, %v3613_v1 }
  0x43   : > { %481 = vst.msk [vmem:[#allocation2 + $0x178] sm:$0x3] %vm435_vm1, %v3613_v1 }
  0x44   : > { %484 = vst.msk [vmem:[#allocation2 + $0x190] sm:$0x3] %vm435_vm1, %v3613_v1 }
  0x45   : > { %487 = vst.msk [vmem:[#allocation2 + $0x1a8] sm:$0x3] %vm435_vm1, %v3613_v1  ;;  %v378_v1 = vadd.f32 %v3689_v3, %v342_v59  ;;  %v427_v59 = vmax.f32 %v395_v44, 0.0 }
  0x46   : > { %504 = vst.msk [vmem:[#allocation2 + $0xc9] sm:$0xff] %vm432_vm0, %v415_v53  ;;  %v345_v53 = vmul.f32 %v3672_v2, %v309_v49  ;;  %v521_v49 = vld [vmem:[#allocation2] sm:$0xff] }
  0x47   : > { %512 = vst.msk [vmem:[#allocation2 + $0x129] sm:$0xff] %vm432_vm0, %v423_v57  ;;  %v410_v30 = vmax.f32 %v378_v1, 0.0  ;;  %v300_v57 = vld [vmem:[%s3684_s10 + $0x20] sm:$0xff]  ;;  %v397_v1 = vadd.f32 %v3689_v3, %v361_v62 }
  0x48   : > { %497 = vst.msk [vmem:[#allocation2 + $0x79] sm:$0xff] %vm432_vm0, %v408_v61  ;;  %v336_v61 = vmul.f32 %v3672_v2, %v300_v57 }
  0x49   : > { %505 = vst.msk [vmem:[#allocation2 + $0xd9] sm:$0xff] %vm432_vm0, %v416_v4  ;;  %v381_v4 = vadd.f32 %v3689_v3, %v345_v53  ;;  %v429_v19 = vmax.f32 %v397_v1, 0.0  ;;  %v1007_v53 = vld [vmem:[#allocation2 + $0xa] sm:$0xff] }
  0x4a   : > { %513 = vst.msk [vmem:[#allocation2 + $0x139] sm:$0xff] %vm432_vm0, %v424_v8  ;;  %v389_v8 = vadd.f32 %v3689_v3, %v353_v54  ;;  %v372_v12 = vadd.f32 %v3689_v3, %v336_v61 }
  0x4b   : > { %498 = vst.msk [vmem:[#allocation2 + $0x81] sm:$0xff] %vm432_vm0, %v409_v13  ;;  %v428_v13 = vmax.f32 %v396_v60, 0.0  ;;  %v413_v14 = vmax.f32 %v381_v4, 0.0  ;;  %v4119_v4 = vld [vmem:[#allocation2 + $0x60] sm:$0xff] }
  0x4c   : > { %506 = vst.msk [vmem:[#allocation2 + $0xe1] sm:$0xff] %vm432_vm0, %v417_v16  ;;  %v421_v15 = vmax.f32 %v389_v8, 0.0  ;;  %v404_v16 = vmax.f32 %v372_v12, 0.0  ;;  %v4133_v8 = vld [vmem:[#allocation2 + $0x68] sm:$0xff] }
  0x4d   : > { %v3901_v38 = vld [vmem:[#allocation2 + $0xc9] sm:$0xff]  ;;  %489 = vst.msk [vmem:[#allocation2 + $0x19] sm:$0xff] %vm432_vm0, %v400_v20  ;;  %v337_v20 = vmul.f32 %v3672_v2, %v301_v17 }
  0x4e   : > { %3305 = vmatmul.msk.f32.gmra.mxu2 %vm432_vm0, %v3901_v38  ;;  %v3908_v42 = vld [vmem:[#allocation2 + $0x129] sm:$0xff]  ;;  %514 = vst.msk [vmem:[#allocation2 + $0x141] sm:$0xff] %vm432_vm0, %v425_v24 }
  0x4f   : > { %3313 = vmatmul.msk.f32.gmra.mxu3 %vm432_vm0, %v3908_v42  ;;  %v3915_v46 = vld [vmem:[#allocation2 + $0x79] sm:$0xff]  ;;  %499 = vst.msk [vmem:[#allocation2 + $0x91] sm:$0xff] %vm432_vm0, %v410_v30  ;;  %v373_v23 = vadd.f32 %v3689_v3, %v337_v20  ;;  %v3484_v30 = vld [vmem:[%s4940_s1 + $0x30] sm:$0xff] }
  0x50   : > { %3298 = vmatmul.msk.f32.gmra.mxu1 %vm432_vm0, %v3915_v46  ;;  %507 = vst.msk [vmem:[#allocation2 + $0xf1] sm:$0xff] %vm432_vm0, %v418_v35  ;;  %v3935_v63 = vld [vmem:[#allocation2 + $0xd9] sm:$0xff]  ;;  %2252 = vmatpush.msra.mxu2 %v3484_v30 }
  0x51   : > { %490 = vst.msk [vmem:[#allocation2 + $0x21] sm:$0xff] %vm432_vm0, %v401_v39  ;;  %v3939_v5 = vld [vmem:[#allocation2 + $0x139] sm:$0xff]  ;;  %v405_v2 = vmax.f32 %v373_v23, 0.0 }
  0x52   : > { %515 = vst.msk [vmem:[#allocation2 + $0x151] sm:$0xff] %vm432_vm0, %v426_v43  ;;  %v3945_v9 = vld [vmem:[#allocation2 + $0x81] sm:$0xff] }
  0x53   : > { %500 = vst.msk [vmem:[#allocation2 + $0x99] sm:$0xff] %vm432_vm0, %v411_v47  ;;  %v3967_v21 = vld [vmem:[#allocation2 + $0xe1] sm:$0xff] }
  0x54   : > { %v3941_v6 = vld [vmem:[#allocation2 + $0x19] sm:$0xff]  ;;  %508 = vst.msk [vmem:[#allocation2 + $0xf9] sm:$0xff] %vm432_vm0, %v419_v51  ;;  %v4205_v32 = vld [vmem:[#allocation2 + $0x82] sm:$0xff] }
  0x55   : > { %3290 = vmatmul.msk.f32.gmra.mxu0 %vm432_vm0, %v3941_v6  ;;  %491 = vst.msk [vmem:[#allocation2 + $0x31] sm:$0xff] %vm432_vm0, %v402_v55  ;;  %v3970_v22 = vld [vmem:[#allocation2 + $0x141] sm:$0xff]  ;;  %v1281_v51 = vld [vmem:[#allocation2 + $0x18] sm:$0xff] }
  0x56   : > { %3306 = vmatmul.msk.f32.gmra.mxu2 %vm432_vm0, %v3935_v63  ;;  %516 = vst.msk [vmem:[#allocation2 + $0x159] sm:$0xff] %vm432_vm0, %v427_v59  ;;  %v3974_v24 = vld [vmem:[#allocation2 + $0x91] sm:$0xff]  ;;  %v3550_v39 = vld [vmem:[%s4940_s1 + $0x40] sm:$0xff] }
  0x57   : > { %3314 = vmatmul.msk.f32.gmra.mxu3 %vm432_vm0, %v3939_v5  ;;  %501 = vst.msk [vmem:[#allocation2 + $0xa9] sm:$0xff] %vm432_vm0, %v412_v0  ;;  %v3989_v25 = vld [vmem:[#allocation2 + $0xf1] sm:$0xff]  ;;  %2802 = vmatpush.msra.mxu0 %v3550_v39  ;;  %v4185_v20 = vld [vmem:[#allocation2 + $0x7a] sm:$0xff] }
  0x58   : > { %3299 = vmatmul.msk.f32.gmra.mxu1 %vm432_vm0, %v3945_v9  ;;  %509 = vst.msk [vmem:[#allocation2 + $0x109] sm:$0xff] %vm432_vm0, %v420_v7  ;;  %v3963_v18 = vld [vmem:[#allocation2 + $0x21] sm:$0xff]  ;;  %v4187_v23 = vld [vmem:[#allocation2 + $0x90] sm:$0xff] }
  0x59   : > { %492 = vst.msk [vmem:[#allocation2 + $0x39] sm:$0xff] %vm432_vm0, %v403_v10  ;;  %v3991_v26 = vld [vmem:[#allocation2 + $0x151] sm:$0xff]  ;;  %v1282_v54 = vld [vmem:[#allocation2 + $0x20] sm:$0xff] }
  0x5a   : > { %517 = vst.msk [vmem:[#allocation2 + $0x169] sm:$0xff] %vm432_vm0, %v428_v13  ;;  %v3993_v28 = vld [vmem:[#allocation2 + $0x99] sm:$0xff]  ;;  %v4081_v57 = vld [vmem:[#allocation2 + $0x22] sm:$0xff] }
  0x5b   : > { %502 = vst.msk [vmem:[#allocation2 + $0xb1] sm:$0xff] %vm432_vm0, %v413_v14  ;;  %v4014_v35 = vld [vmem:[#allocation2 + $0xf9] sm:$0xff]  ;;  %v4145_v10 = vld [vmem:[#allocation2 + $0x62] sm:$0xff] }
  0x5c   : > { %510 = vst.msk [vmem:[#allocation2 + $0x111] sm:$0xff] %vm432_vm0, %v421_v15  ;;  %v3987_v3 = vld [vmem:[#allocation2 + $0x31] sm:$0xff]  ;;  %v4070_v55 = vld [vmem:[#allocation2 + $0x1a] sm:$0xff] }
  0x5d   : > { %3291 = vmatmul.msk.f32.gmra.mxu0 %vm432_vm0, %v3963_v18  ;;  %493 = vst.msk [vmem:[#allocation2 + $0x49] sm:$0xff] %vm432_vm0, %v404_v16  ;;  %v4016_v36 = vld [vmem:[#allocation2 + $0x159] sm:$0xff]  ;;  %v4072_v56 = vld [vmem:[#allocation2 + $0x30] sm:$0xff] }
  0x5e   : > { %3307 = vmatmul.msk.f32.gmra.mxu2 %vm432_vm0, %v3967_v21  ;;  %518 = vst.msk [vmem:[#allocation2 + $0x171] sm:$0xff] %vm432_vm0, %v429_v19  ;;  %v4018_v37 = vld [vmem:[#allocation2 + $0xa9] sm:$0xff]  ;;  %v4149_v13 = vld [vmem:[#allocation2 + $0x78] sm:$0xff]  ;;  %v4167_v16 = vld [vmem:[#allocation2 + $0x80] sm:$0xff] }
  0x5f   : > { %3315 = vmatmul.msk.f32.gmra.mxu3 %vm432_vm0, %v3970_v22  ;;  %494 = vst.msk [vmem:[#allocation2 + $0x51] sm:$0xff] %vm432_vm0, %v405_v2  ;;  %v4033_v41 = vld [vmem:[#allocation2 + $0x109] sm:$0xff]  ;;  %v4207_v39 = vld [vmem:[#allocation2 + $0x98] sm:$0xff] }
  0x60   : > { %3300 = vmatmul.msk.f32.gmra.mxu1 %vm432_vm0, %v3974_v24  ;;  %v4012_v34 = vld [vmem:[#allocation2 + $0x39] sm:$0xff]  ;;  %4973 = vst [vmem:[#allocation3_spill] sm:$0xff] %v4133_v8  ;;  %v4165_v15 = vld [vmem:[#allocation2 + $0x6a] sm:$0xff] }
  0x61   : > { %v4035_v43 = vld [vmem:[#allocation2 + $0x169] sm:$0xff]  ;;  %v4083_v58 = vld [vmem:[#allocation2 + $0x38] sm:$0xff]  ;;  %4974 = vst [vmem:[#allocation4_spill] sm:$0xff] %v4149_v13 }
  0x62   : > { %v4037_v44 = vld [vmem:[#allocation2 + $0xb1] sm:$0xff]  ;;  %v4105_v61 = vld [vmem:[#allocation2 + $0x3a] sm:$0xff]  ;;  %4976 = vst [vmem:[#allocation6_spill] sm:$0xff] %v4165_v15 }
  0x63   : > { %v4049_v47 = vld [vmem:[#allocation2 + $0x111] sm:$0xff]  ;;  %4977 = vst [vmem:[#allocation7_spill] sm:$0xff] %v4167_v16 }
  0x64   : > { %v4031_v40 = vld [vmem:[#allocation2 + $0x49] sm:$0xff]  ;;  %v4093_v59 = vld [vmem:[#allocation2 + $0x32] sm:$0xff]  ;;  %4979 = vst [vmem:[#allocation9_spill] sm:$0xff] %v4185_v20 }
  0x65   : > { %3292 = vmatmul.msk.f32.gmra.mxu0 %vm432_vm0, %v3987_v3  ;;  %v4051_v48 = vld [vmem:[#allocation2 + $0x171] sm:$0xff]  ;;  %v4095_v60 = vld [vmem:[#allocation2 + $0x48] sm:$0xff]  ;;  %4980 = vst [vmem:[#allocation10_spill] sm:$0xff] %v4187_v23 }
  0x66   : > { %3308 = vmatmul.msk.f32.gmra.mxu2 %vm432_vm0, %v3989_v25  ;;  %v4047_v45 = vld [vmem:[#allocation2 + $0x51] sm:$0xff]  ;;  %4982 = vst [vmem:[#allocation12_spill] sm:$0xff] %v4205_v32 }
  0x67   : > { %3316 = vmatmul.msk.f32.gmra.mxu3 %vm432_vm0, %v3991_v26  ;;  %v4107_v62 = vld [vmem:[#allocation2 + $0x50] sm:$0xff]  ;;  %4983 = vst [vmem:[#allocation13_spill] sm:$0xff] %v4207_v39 }
  0x68   : > { %3301 = vmatmul.msk.f32.gmra.mxu1 %vm432_vm0, %v3993_v28  ;;  %v4117_v0 = vld [vmem:[#allocation2 + $0x4a] sm:$0xff]  ;;  %v4131_v7 = vld [vmem:[#allocation2 + $0x52] sm:$0xff] }
  0x6d   : > { %3293 = vmatmul.msk.f32.gmra.mxu0 %vm432_vm0, %v4012_v34 }
  0x6e   : > { %3309 = vmatmul.msk.f32.gmra.mxu2 %vm432_vm0, %v4014_v35 }
  0x6f   : > { %3317 = vmatmul.msk.f32.gmra.mxu3 %vm432_vm0, %v4016_v36 }
  0x70   : > { %3302 = vmatmul.msk.f32.gmra.mxu1 %vm432_vm0, %v4018_v37 }
  0x75   : > { %3294 = vmatmul.msk.f32.gmra.mxu0 %vm432_vm0, %v4031_v40 }
  0x76   : > { %3310 = vmatmul.msk.f32.gmra.mxu2 %vm432_vm0, %v4033_v41 }
  0x77   : > { %3318 = vmatmul.msk.f32.gmra.mxu3 %vm432_vm0, %v4035_v43 }
  0x78   : > { %3303 = vmatmul.msk.f32.gmra.mxu1 %vm432_vm0, %v4037_v44 }
  0x7d   : > { %3295 = vmatmul.msk.f32.gmra.mxu0 %vm432_vm0, %v4047_v45 }
  0x7e   : > { %3311 = vmatmul.msk.f32.gmra.mxu2 %vm432_vm0, %v4049_v47 }
  0x7f   : > { %3319 = vmatmul.msk.f32.gmra.mxu3 %vm432_vm0, %v4051_v48 }
  0x80   : > { %3320 = vmatmul.msk.f32.vlgmr.msrb.gmra.mxu1 %vm432_vm0, %v521_v49 }
  0x85   : > { %3419 = vmatmul.msk.f32.vlgmr.msrb.gmra.mxu0 %vm432_vm0, %v3941_v6 }
  0x86   : > { %3353 = vmatmul.msk.f32.vlgmr.msrb.gmra.mxu2 %vm432_vm0, %v1006_v50 }
  0x87   : > { %3386 = vmatmul.msk.f32.vlgmr.msrb.gmra.mxu3 %vm432_vm0, %v1281_v51 }
  0x88   : > { %3321 = vmatmul.msk.f32.gmra.mxu1 %vm432_vm0, %v522_v52  ;;  %v4225_v52 = vld [vmem:[#allocation2 + $0x92] sm:$0xff] }
  0x89   : > { %4985 = vst [vmem:[#allocation15_spill] sm:$0xff] %v4225_v52 }
  0x8d   : > { %3420 = vmatmul.msk.f32.gmra.mxu0 %vm432_vm0, %v3963_v18 }
  0x8e   : > { %3354 = vmatmul.msk.f32.gmra.mxu2 %vm432_vm0, %v1007_v53  ;;  %v4227_v53 = vld [vmem:[#allocation2 + $0xa8] sm:$0xff] }
  0x8f   : > { %3387 = vmatmul.msk.f32.gmra.mxu3 %vm432_vm0, %v1282_v54  ;;  %4986 = vst [vmem:[#allocation16_spill] sm:$0xff] %v4227_v53 }
  0x90   : > { %3322 = vmatmul.msk.f32.gmra.mxu1 %vm432_vm0, %v1281_v51 }
  0x95   : > { %3421 = vmatmul.msk.f32.gmra.mxu0 %vm432_vm0, %v3987_v3 }
  0x96   : > { %3355 = vmatmul.msk.f32.gmra.mxu2 %vm432_vm0, %v4070_v55 }
  0x97   : > { %3388 = vmatmul.msk.f32.gmra.mxu3 %vm432_vm0, %v4072_v56 }
  0x98   : > { %3323 = vmatmul.msk.f32.gmra.mxu1 %vm432_vm0, %v1282_v54 }
  0x9c   : > { %v4129_v6 = vpop.f32.mrf.mxu1 }
  0x9d   : > { %3422 = vmatmul.msk.f32.gmra.mxu0 %vm432_vm0, %v4012_v34 }
  0x9e   : > { %3356 = vmatmul.msk.f32.gmra.mxu2 %vm432_vm0, %v4081_v57 }
  0x9f   : > { %3389 = vmatmul.msk.f32.gmra.mxu3 %vm432_vm0, %v4083_v58 }
  0xa0   : > { %3324 = vmatmul.msk.f32.gmra.mxu1 %vm432_vm0, %v4072_v56 }
  0xa5   : > { %3423 = vmatmul.msk.f32.gmra.mxu0 %vm432_vm0, %v4031_v40 }
  0xa6   : > { %3357 = vmatmul.msk.f32.gmra.mxu2 %vm432_vm0, %v4093_v59 }
  0xa7   : > { %3390 = vmatmul.msk.f32.gmra.mxu3 %vm432_vm0, %v4095_v60 }
  0xa8   : > { %3325 = vmatmul.msk.f32.gmra.mxu1 %vm432_vm0, %v4083_v58 }
  0xad   : > { %3424 = vmatmul.msk.f32.gmra.mxu0 %vm432_vm0, %v4047_v45 }
  0xae   : > { %3358 = vmatmul.msk.f32.gmra.mxu2 %vm432_vm0, %v4105_v61 }
  0xaf   : > { %3391 = vmatmul.msk.f32.gmra.mxu3 %vm432_vm0, %v4107_v62 }
  0xb0   : > { %3326 = vmatmul.msk.f32.gmra.mxu1 %vm432_vm0, %v4095_v60 }
  0xb5   : > { %3425 = vmatmul.msk.f32.gmra.mxu0 %vm432_vm0, %v3732_v11  ;;  %v4139_v11 = vpop.f32.mrf.mxu0 }
  0xb6   : > { %3359 = vmatmul.msk.f32.gmra.mxu2 %vm432_vm0, %v4117_v0 }
  0xb7   : > { %3392 = vmatmul.msk.f32.gmra.mxu3 %vm432_vm0, %v4119_v4 }
  0xb8   : > { %3327 = vmatmul.msk.f32.gmra.mxu1 %vm432_vm0, %v4107_v62 }
  0xb9   : > { %v4147_v12 = vpop.f32.mrf.mxu1 }
  0xbd   : > { %3426 = vmatmul.msk.f32.gmra.mxu0 %vm432_vm0, %v3817_v33  ;;  %v4157_v33 = vpop.f32.mrf.mxu2  ;;  %v4159_v1 = vpop.f32.mrf.mxu3 }
  0xbe   : > { %3360 = vmatmul.msk.f32.gmra.mxu2 %vm432_vm0, %v4131_v7  ;;  %4975 = vst [vmem:[#allocation5_spill] sm:$0xff] %v4159_v1  ;;  %v4163_v14 = vpop.f32.mrf.mxu0  ;;  %v4247_v1 = vld [vmem:[#allocation2 + $0xb0] sm:$0xff] }
  0xbf   : > { %3393 = vmatmul.msk.f32.gmra.mxu3 %vm432_vm0, %v4133_v8  ;;  %4990 = vst [vmem:[#allocation20_spill] sm:$0xff] %v4247_v1 }
  0xc0   : > { %3328 = vmatmul.msk.f32.gmra.mxu1 %vm432_vm0, %v4119_v4 }
  0xc5   : > { %3427 = vmatmul.msk.f32.gmra.mxu0 %vm432_vm0, %v3915_v46 }
  0xc6   : > { %3361 = vmatmul.msk.f32.gmra.mxu2 %vm432_vm0, %v4145_v10 }
  0xc7   : > { %3394 = vmatmul.msk.f32.gmra.mxu3 %vm432_vm0, %v4149_v13 }
  0xc8   : > { %3329 = vmatmul.msk.f32.gmra.mxu1 %vm432_vm0, %v4133_v8  ;;  %v4314_v8 = vld [vmem:[#allocation2 + $0xca] sm:$0xff] }
  0xcd   : > { %v4169_v46 = vpop.f32.mrf.mxu1  ;;  %3428 = vmatmul.msk.f32.gmra.mxu0 %vm432_vm0, %v3945_v9 }
  0xce   : > { %3362 = vmatmul.msk.f32.gmra.mxu2 %vm432_vm0, %v4165_v15 }
  0xcf   : > { %3395 = vmatmul.msk.f32.gmra.mxu3 %vm432_vm0, %v4167_v16 }
  0xd0   : > { %3330 = vmatmul.msk.f32.gmra.mxu1 %vm432_vm0, %v4149_v13  ;;  %v4287_v13 = vld [vmem:[#allocation2 + $0xc8] sm:$0xff] }
  0xd1   : > { %v4179_v17 = vpop.f32.mrf.mxu2 }
  0xd2   : > { %v4181_v18 = vpop.f32.mrf.mxu3  ;;  %v4183_v19 = vpop.f32.mrf.mxu0 }
  0xd3   : > { %4978 = vst [vmem:[#allocation8_spill] sm:$0xff] %v4181_v18  ;;  %v4245_v18 = vld [vmem:[#allocation2 + $0x9a] sm:$0xff] }
  0xd4   : > { %4989 = vst [vmem:[#allocation19_spill] sm:$0xff] %v4245_v18 }
  0xd5   : > { %v4189_v9 = vpop.f32.mrf.mxu1  ;;  %3429 = vmatmul.msk.f32.gmra.mxu0 %vm432_vm0, %v3974_v24 }
  0xd6   : > { %3363 = vmatmul.msk.f32.gmra.mxu2 %vm432_vm0, %v4185_v20  ;;  %v4303_v20 = vld [vmem:[#allocation2 + $0xd8] sm:$0xff] }
  0xd7   : > { %3396 = vmatmul.msk.f32.gmra.mxu3 %vm432_vm0, %v4187_v23 }
  0xd8   : > { %3331 = vmatmul.msk.f32.gmra.mxu1 %vm432_vm0, %v4167_v16  ;;  %v4267_v16 = vld [vmem:[#allocation2 + $0xc0] sm:$0xff] }
  0xd9   : > { %v4199_v2 = vpop.f32.mrf.mxu2  ;;  %4994 = vst [vmem:[#allocation24_spill] sm:$0xff] %v4267_v16 }
  0xda   : > { %v4201_v30 = vpop.f32.mrf.mxu3  ;;  %v4203_v31 = vpop.f32.mrf.mxu0 }
  0xdb   : > { %4981 = vst [vmem:[#allocation11_spill] sm:$0xff] %v4201_v30 }
  0xdd   : > { %v4209_v24 = vpop.f32.mrf.mxu1  ;;  %3430 = vmatmul.msk.f32.gmra.mxu0 %vm432_vm0, %v3993_v28 }
  0xde   : > { %3364 = vmatmul.msk.f32.gmra.mxu2 %vm432_vm0, %v4205_v32  ;;  %v4285_v32 = vld [vmem:[#allocation2 + $0xb2] sm:$0xff] }
  0xdf   : > { %3397 = vmatmul.msk.f32.gmra.mxu3 %vm432_vm0, %v4207_v39  ;;  %4997 = vst [vmem:[#allocation27_spill] sm:$0xff] %v4285_v32 }
  0xe0   : > { %3332 = vmatmul.msk.f32.gmra.mxu1 %vm432_vm0, %v4187_v23 }
  0xe1   : > { %v4219_v49 = vpop.f32.mrf.mxu2 }
  0xe2   : > { %v4221_v50 = vpop.f32.mrf.mxu3  ;;  %v4223_v51 = vpop.f32.mrf.mxu0 }
  0xe3   : > { %4984 = vst [vmem:[#allocation14_spill] sm:$0xff] %v4221_v50 }
  0xe5   : > { %v4229_v28 = vpop.f32.mrf.mxu1  ;;  %3431 = vmatmul.msk.f32.gmra.mxu0 %vm432_vm0, %v4018_v37 }
  0xe6   : > { %3365 = vmatmul.msk.f32.gmra.mxu2 %vm432_vm0, %v4225_v52  ;;  %v4265_v52 = vld [vmem:[#allocation2 + $0xaa] sm:$0xff] }
  0xe7   : > { %3398 = vmatmul.msk.f32.gmra.mxu3 %vm432_vm0, %v4227_v53  ;;  %4993 = vst [vmem:[#allocation23_spill] sm:$0xff] %v4265_v52 }
  0xe8   : > { %3333 = vmatmul.msk.f32.gmra.mxu1 %vm432_vm0, %v4207_v39 }
  0xe9   : > { %v4239_v54 = vpop.f32.mrf.mxu2 }
  0xea   : > { %4987 = vst [vmem:[#allocation17_spill] sm:$0xff] %v4239_v54  ;;  %v4241_v50 = vpop.f32.mrf.mxu3  ;;  %v4243_v30 = vpop.f32.mrf.mxu0  ;;  %v4316_v54 = vld [vmem:[#allocation2 + $0xe0] sm:$0xff] }
  0xeb   : > { %4988 = vst [vmem:[#allocation18_spill] sm:$0xff] %v4241_v50 }
  0xed   : > { %v4249_v37 = vpop.f32.mrf.mxu1  ;;  %3432 = vmatmul.msk.f32.gmra.mxu0 %vm432_vm0, %v4037_v44 }
  0xee   : > { %3366 = vmatmul.msk.f32.gmra.mxu2 %vm432_vm0, %v4245_v18 }
  0xef   : > { %3399 = vmatmul.msk.f32.gmra.mxu3 %vm432_vm0, %v4247_v1 }
  0xf0   : > { %3334 = vmatmul.msk.f32.gmra.mxu1 %vm432_vm0, %v4227_v53 }
  0xf1   : > { %v4259_v50 = vpop.f32.mrf.mxu2 }
  0xf2   : > { %4991 = vst [vmem:[#allocation21_spill] sm:$0xff] %v4259_v50  ;;  %v4261_v39 = vpop.f32.mrf.mxu3  ;;  %v4263_v23 = vpop.f32.mrf.mxu0 }
  0xf3   : > { %4992 = vst [vmem:[#allocation22_spill] sm:$0xff] %v4261_v39 }
  0xf5   : > { %v4269_v44 = vpop.f32.mrf.mxu1  ;;  %3433 = vmatmul.msk.f32.gmra.mxu0 %vm432_vm0, %v3799_v27 }
  0xf6   : > { %3367 = vmatmul.msk.f32.gmra.mxu2 %vm432_vm0, %v4265_v52 }
  0xf7   : > { %3400 = vmatmul.msk.f32.gmra.mxu3 %vm432_vm0, %v4267_v16 }
  0xf8   : > { %3335 = vmatmul.msk.f32.gmra.mxu1 %vm432_vm0, %v4247_v1 }
  0xf9   : > { %v4279_v39 = vpop.f32.mrf.mxu2 }
  0xfa   : > { %4995 = vst [vmem:[#allocation25_spill] sm:$0xff] %v4279_v39  ;;  %v4281_v53 = vpop.f32.mrf.mxu3  ;;  %v4283_v18 = vpop.f32.mrf.mxu0  ;;  %v4301_v39 = vld [vmem:[#allocation2 + $0xc2] sm:$0xff] }
  0xfb   : > { %4996 = vst [vmem:[#allocation26_spill] sm:$0xff] %v4281_v53 }
  0xfc   : > { %5000 = vst [vmem:[#allocation30_spill] sm:$0xff] %v4301_v39 }
  0xfd   : > { %v910_v27 = vpop.f32.mrf.mxu1  ;;  %3434 = vmatmul.msk.f32.gmra.mxu0 %vm432_vm0, %v3901_v38 }
  0xfe   : > { %3368 = vmatmul.msk.f32.gmra.mxu2 %vm432_vm0, %v4285_v32  ;;  %v911_v38 = vadd.f32 %v910_v27, %v4139_v11 }
  0xff   : > { %3401 = vmatmul.msk.f32.gmra.mxu3 %vm432_vm0, %v4287_v13 }
 0x100   : > { %3336 = vmatmul.msk.f32.gmra.mxu1 %vm432_vm0, %v4267_v16 }
 0x101   : > { %v4297_v53 = vpop.f32.mrf.mxu2 }
 0x102   : > { %4998 = vst [vmem:[#allocation28_spill] sm:$0xff] %v4297_v53  ;;  %v4299_v1 = vpop.f32.mrf.mxu3  ;;  %v1703_v52 = vpop.f32.mrf.mxu0 }
 0x103   : > { %4999 = vst [vmem:[#allocation29_spill] sm:$0xff] %v4299_v1 }
 0x105   : > { %v913_v50 = vpop.f32.mrf.mxu1  ;;  %3435 = vmatmul.msk.f32.gmra.mxu0 %vm432_vm0, %v3935_v63 }
 0x106   : > { %3369 = vmatmul.msk.f32.gmra.mxu2 %vm432_vm0, %v4301_v39  ;;  %v914_v11 = vadd.f32 %v913_v50, %v4163_v14 }
 0x107   : > { %3402 = vmatmul.msk.f32.gmra.mxu3 %vm432_vm0, %v4303_v20 }
 0x108   : > { %3337 = vmatmul.msk.f32.gmra.mxu1 %vm432_vm0, %v4287_v13 }
 0x109   : > { %v1153_v1 = vpop.f32.mrf.mxu2 }
 0x10a   : > { %v1249_v16 = vadd.f32 %v1153_v1, %v911_v38  ;;  %v1428_v32 = vpop.f32.mrf.mxu3  ;;  %v1706_v53 = vpop.f32.mrf.mxu0  ;;  %v4329_v38 = vld [vmem:[#allocation2 + $0xda] sm:$0xff] }
 0x10c   : > { %v1524_v15 = vadd.f32 %v1428_v32, %v1249_v16 }
 0x10d   : > { %v916_v63 = vpop.f32.mrf.mxu1  ;;  %3436 = vmatmul.msk.f32.gmra.mxu0 %vm432_vm0, %v3967_v21 }
 0x10e   : > { %v4320_v39 = vadd.f32 %v1703_v52, %v1524_v15  ;;  %3370 = vmatmul.msk.f32.gmra.mxu2 %vm432_vm0, %v4314_v8  ;;  %v4331_v15 = vld [vmem:[#allocation2 + $0xf0] sm:$0xff]  ;;  %v917_v14 = vadd.f32 %v916_v63, %v4183_v19 }
 0x10f   : > { %3403 = vmatmul.msk.f32.gmra.mxu3 %vm432_vm0, %v4316_v54 }
 0x110   : > { %5001 = vst [vmem:[#allocation31_spill] sm:$0xff] %v4320_v39  ;;  %3338 = vmatmul.msk.f32.gmra.mxu1 %vm432_vm0, %v4303_v20 }
 0x111   : > { %v1156_v1 = vpop.f32.mrf.mxu2 }
 0x112   : > { %v1250_v16 = vadd.f32 %v1156_v1, %v914_v11  ;;  %v1431_v32 = vpop.f32.mrf.mxu3  ;;  %v1709_v27 = vpop.f32.mrf.mxu0 }
 0x114   : > { %v1525_v21 = vadd.f32 %v1431_v32, %v1250_v16  ;;  %v4344_v32 = vld [vmem:[#allocation2 + $0xe2] sm:$0xff] }
 0x115   : > { %v919_v52 = vpop.f32.mrf.mxu1  ;;  %3437 = vmatmul.msk.f32.gmra.mxu0 %vm432_vm0, %v3989_v25 }
 0x116   : > { %v4335_v39 = vadd.f32 %v1706_v53, %v1525_v21  ;;  %3371 = vmatmul.msk.f32.gmra.mxu2 %vm432_vm0, %v4329_v38  ;;  %v4346_v53 = vld [vmem:[#allocation2 + $0xf8] sm:$0xff]  ;;  %v920_v19 = vadd.f32 %v919_v52, %v4203_v31 }
 0x117   : > { %3404 = vmatmul.msk.f32.gmra.mxu3 %vm432_vm0, %v4331_v15 }
 0x118   : > { %5002 = vst [vmem:[#allocation32_spill] sm:$0xff] %v4335_v39  ;;  %3339 = vmatmul.msk.f32.gmra.mxu1 %vm432_vm0, %v4316_v54 }
 0x119   : > { %v1159_v50 = vpop.f32.mrf.mxu2 }
 0x11a   : > { %v1251_v11 = vadd.f32 %v1159_v50, %v917_v14  ;;  %v1434_v1 = vpop.f32.mrf.mxu3  ;;  %v1712_v16 = vpop.f32.mrf.mxu0 }
 0x11c   : > { %v1526_v25 = vadd.f32 %v1434_v1, %v1251_v11  ;;  %v4359_v1 = vld [vmem:[#allocation2 + $0xf2] sm:$0xff] }
 0x11d   : > { %v922_v21 = vpop.f32.mrf.mxu1  ;;  %3438 = vmatmul.msk.f32.gmra.mxu0 %vm432_vm0, %v4014_v35 }
 0x11e   : > { %v4350_v39 = vadd.f32 %v1709_v27, %v1526_v25  ;;  %3372 = vmatmul.msk.f32.gmra.mxu2 %vm432_vm0, %v4344_v32  ;;  %v4361_v27 = vld [vmem:[#allocation2 + $0x108] sm:$0xff]  ;;  %v923_v31 = vadd.f32 %v922_v21, %v4223_v51 }
 0x11f   : > { %3405 = vmatmul.msk.f32.gmra.mxu3 %vm432_vm0, %v4346_v53  ;;  %5004 = vst [vmem:[#allocation34_spill] sm:$0xff] %v4361_v27 }
 0x120   : > { %5003 = vst [vmem:[#allocation33_spill] sm:$0xff] %v4350_v39  ;;  %3340 = vmatmul.msk.f32.gmra.mxu1 %vm432_vm0, %v4331_v15 }
 0x121   : > { %v1162_v63 = vpop.f32.mrf.mxu2 }
 0x122   : > { %v1252_v14 = vadd.f32 %v1162_v63, %v920_v19  ;;  %v1437_v50 = vpop.f32.mrf.mxu3  ;;  %v1715_v11 = vpop.f32.mrf.mxu0 }
 0x124   : > { %v1527_v35 = vadd.f32 %v1437_v50, %v1252_v14  ;;  %v4374_v50 = vld [vmem:[#allocation2 + $0xfa] sm:$0xff] }
 0x125   : > { %v925_v25 = vpop.f32.mrf.mxu1  ;;  %3439 = vmatmul.msk.f32.gmra.mxu0 %vm432_vm0, %v4033_v41 }
 0x126   : > { %v4365_v39 = vadd.f32 %v1712_v16, %v1527_v35  ;;  %3373 = vmatmul.msk.f32.gmra.mxu2 %vm432_vm0, %v4359_v1  ;;  %v4376_v16 = vld [vmem:[#allocation2 + $0x110] sm:$0xff]  ;;  %v926_v51 = vadd.f32 %v925_v25, %v4243_v30 }
 0x127   : > { %3406 = vmatmul.msk.f32.gmra.mxu3 %vm432_vm0, %v4361_v27  ;;  %5006 = vst [vmem:[#allocation36_spill] sm:$0xff] %v4376_v16 }
 0x128   : > { %5005 = vst [vmem:[#allocation35_spill] sm:$0xff] %v4365_v39  ;;  %3341 = vmatmul.msk.f32.gmra.mxu1 %vm432_vm0, %v4346_v53 }
 0x129   : > { %v1165_v52 = vpop.f32.mrf.mxu2 }
 0x12a   : > { %v1253_v19 = vadd.f32 %v1165_v52, %v923_v31  ;;  %v1440_v63 = vpop.f32.mrf.mxu3  ;;  %v1718_v14 = vpop.f32.mrf.mxu0 }
 0x12c   : > { %v1528_v41 = vadd.f32 %v1440_v63, %v1253_v19  ;;  %v4389_v63 = vld [vmem:[#allocation2 + $0x10a] sm:$0xff] }
 0x12d   : > { %v928_v35 = vpop.f32.mrf.mxu1  ;;  %3440 = vmatmul.msk.f32.gmra.mxu0 %vm432_vm0, %v4049_v47 }
 0x12e   : > { %v4380_v39 = vadd.f32 %v1715_v11, %v1528_v41  ;;  %3374 = vmatmul.msk.f32.gmra.mxu2 %vm432_vm0, %v4374_v50  ;;  %v1303_v11 = vld [vmem:[#allocation2 + $0x120] sm:$0xff]  ;;  %v929_v30 = vadd.f32 %v928_v35, %v4263_v23 }
 0x12f   : > { %3407 = vmatmul.msk.f32.gmra.mxu3 %vm432_vm0, %v4376_v16 }
 0x130   : > { %5007 = vst [vmem:[#allocation37_spill] sm:$0xff] %v4380_v39  ;;  %3342 = vmatmul.msk.f32.gmra.mxu1 %vm432_vm0, %v4361_v27 }
 0x131   : > { %v1168_v21 = vpop.f32.mrf.mxu2 }
 0x132   : > { %v1254_v31 = vadd.f32 %v1168_v21, %v926_v51  ;;  %v1443_v52 = vpop.f32.mrf.mxu3  ;;  %v1721_v19 = vpop.f32.mrf.mxu0 }
 0x134   : > { %v1529_v47 = vadd.f32 %v1443_v52, %v1254_v31  ;;  %v4401_v52 = vld [vmem:[#allocation2 + $0x112] sm:$0xff] }
 0x135   : > { %v931_v41 = vpop.f32.mrf.mxu1  ;;  %3441 = vmatmul.msk.f32.gmra.mxu0 %vm432_vm0, %v3806_v29  ;;  %v1304_v29 = vld [vmem:[#allocation2 + $0x128] sm:$0xff] }
 0x136   : > { %v4393_v39 = vadd.f32 %v1718_v14, %v1529_v47  ;;  %3375 = vmatmul.msk.f32.gmra.mxu2 %vm432_vm0, %v4389_v63  ;;  %v932_v23 = vadd.f32 %v931_v41, %v4283_v18 }
 0x137   : > { %3408 = vmatmul.msk.f32.gmra.mxu3 %vm432_vm0, %v1303_v11 }
 0x138   : > { %5008 = vst [vmem:[#allocation38_spill] sm:$0xff] %v4393_v39  ;;  %3343 = vmatmul.msk.f32.gmra.mxu1 %vm432_vm0, %v4376_v16  ;;  %v1305_v16 = vld [vmem:[#allocation2 + $0x138] sm:$0xff] }
 0x139   : > { %v1171_v25 = vpop.f32.mrf.mxu2 }
 0x13a   : > { %v1255_v51 = vadd.f32 %v1171_v25, %v929_v30  ;;  %v1446_v21 = vpop.f32.mrf.mxu3  ;;  %v1724_v31 = vpop.f32.mrf.mxu0 }
 0x13c   : > { %v1530_v27 = vadd.f32 %v1446_v21, %v1255_v51  ;;  %v1030_v21 = vld [vmem:[#allocation2 + $0x122] sm:$0xff] }
 0x13d   : > { %v934_v14 = vpop.f32.mrf.mxu1  ;;  %3442 = vmatmul.msk.f32.gmra.mxu0 %vm432_vm0, %v3908_v42 }
 0x13e   : > { %v4405_v47 = vadd.f32 %v1721_v19, %v1530_v27  ;;  %3376 = vmatmul.msk.f32.gmra.mxu2 %vm432_vm0, %v4401_v52  ;;  %v935_v18 = vadd.f32 %v934_v14, %v4129_v6  ;;  %v3603_v6 = vld [vmem:[%s4943_s4] ss:$0 sm:$0xff] }
 0x13f   : > { %3409 = vmatmul.msk.f32.gmra.mxu3 %vm432_vm0, %v1304_v29 }
 0x140   : > { %5009 = vst [vmem:[#allocation39_spill] sm:$0xff] %v4405_v47  ;;  %3344 = vmatmul.msk.f32.gmra.mxu1 %vm432_vm0, %v1303_v11  ;;  %v326_v11 = vld [vmem:[%s3684_s10 + $0xf0] sm:$0xff] }
 0x141   : > { %v1174_v35 = vpop.f32.mrf.mxu2 }
 0x142   : > { %v1256_v30 = vadd.f32 %v1174_v35, %v932_v23  ;;  %v1449_v25 = vpop.f32.mrf.mxu3  ;;  %v1727_v51 = vpop.f32.mrf.mxu0 }
 0x144   : > { %v1531_v39 = vadd.f32 %v1449_v25, %v1256_v30  ;;  %v3602_v30 = vld [vmem:[%s4942_s3] ss:$0 sm:$0xff] }
 0x145   : > { %v937_v42 = vpop.f32.mrf.mxu1  ;;  %3443 = vmatmul.msk.f32.gmra.mxu0 %vm432_vm0, %v3939_v5  ;;  %v362_v5 = vmul.f32 %v3602_v30, %v326_v11  ;;  %v1306_v25 = vld [vmem:[#allocation2 + $0x140] sm:$0xff] }
 0x146   : > { %v4414_v27 = vadd.f32 %v1724_v31, %v1531_v39  ;;  %3377 = vmatmul.msk.f32.gmra.mxu2 %vm432_vm0, %v1030_v21  ;;  %v1031_v39 = vld [vmem:[#allocation2 + $0x12a] sm:$0xff] }
 0x147   : > { %3410 = vmatmul.msk.f32.gmra.mxu3 %vm432_vm0, %v1305_v16  ;;  %v398_v14 = vadd.f32 %v3603_v6, %v362_v5 }
 0x148   : > { %5010 = vst [vmem:[#allocation40_spill] sm:$0xff] %v4414_v27  ;;  %3345 = vmatmul.msk.f32.gmra.mxu1 %vm432_vm0, %v1304_v29 }
 0x149   : > { %v1177_v19 = vpop.f32.mrf.mxu2 }
 0x14a   : > { %v1257_v41 = vadd.f32 %v1177_v19, %v935_v18  ;;  %v1452_v23 = vpop.f32.mrf.mxu3  ;;  %v1730_v35 = vpop.f32.mrf.mxu0  ;;  %v430_v18 = vmax.f32 %v398_v14, 0.0  ;;  %v938_v19 = vadd.f32 %v937_v42, %v4147_v12 }
 0x14c   : > { %v1532_v31 = vadd.f32 %v1452_v23, %v1257_v41  ;;  %519 = vst.msk [vmem:[#allocation2 + $0x181] sm:$0xff] %vm432_vm0, %v430_v18  ;;  %v327_v41 = vld [vmem:[%s3684_s10 + $0xf8] sm:$0xff]  ;;  %v1033_v18 = vld [vmem:[#allocation2 + $0x142] sm:$0xff] }
 0x14d   : > { %v940_v29 = vpop.f32.mrf.mxu1  ;;  %3444 = vmatmul.msk.f32.gmra.mxu0 %vm432_vm0, %v3970_v22  ;;  %v363_v47 = vmul.f32 %v3602_v30, %v327_v41  ;;  %v1032_v22 = vld [vmem:[#allocation2 + $0x13a] sm:$0xff] }
 0x14e   : > { %v4429_v21 = vadd.f32 %v1727_v51, %v1532_v31  ;;  %3378 = vmatmul.msk.f32.gmra.mxu2 %vm432_vm0, %v1031_v39  ;;  %v1307_v31 = vld [vmem:[#allocation2 + $0x150] sm:$0xff] }
 0x14f   : > { %3411 = vmatmul.msk.f32.gmra.mxu3 %vm432_vm0, %v1306_v25 }
 0x150   : > { %5011 = vst [vmem:[#allocation41_spill] sm:$0xff] %v4429_v21  ;;  %3346 = vmatmul.msk.f32.gmra.mxu1 %vm432_vm0, %v1305_v16  ;;  %v399_v21 = vadd.f32 %v3603_v6, %v363_v47  ;;  %v941_v16 = vadd.f32 %v940_v29, %v4169_v46 }
 0x151   : > { %v1180_v11 = vpop.f32.mrf.mxu2 }
 0x152   : > { %v1258_v23 = vadd.f32 %v1180_v11, %v938_v19  ;;  %v1455_v5 = vpop.f32.mrf.mxu3  ;;  %v1733_v27 = vpop.f32.mrf.mxu0  ;;  %v431_v12 = vmax.f32 %v399_v21, 0.0 }
 0x154   : > { %v1533_v51 = vadd.f32 %v1455_v5, %v1258_v23  ;;  %520 = vst.msk [vmem:[#allocation2 + $0x189] sm:$0xff] %vm432_vm0, %v431_v12  ;;  %v1034_v23 = vld [vmem:[#allocation2 + $0x152] sm:$0xff] }
 0x155   : > { %v943_v39 = vpop.f32.mrf.mxu1  ;;  %3445 = vmatmul.msk.f32.gmra.mxu0 %vm432_vm0, %v3991_v26  ;;  %v1308_v26 = vld [vmem:[#allocation2 + $0x158] sm:$0xff] }
 0x156   : > { %v4439_v14 = vadd.f32 %v1730_v35, %v1533_v51  ;;  %3379 = vmatmul.msk.f32.gmra.mxu2 %vm432_vm0, %v1032_v22  ;;  %v944_v46 = vadd.f32 %v943_v39, %v4189_v9  ;;  %v1309_v22 = vld [vmem:[#allocation2 + $0x168] sm:$0xff] }
 0x157   : > { %3412 = vmatmul.msk.f32.gmra.mxu3 %vm432_vm0, %v1307_v31 }
 0x158   : > { %3347 = vmatmul.msk.f32.gmra.mxu1 %vm432_vm0, %v1306_v25 }
 0x159   : > { %v1183_v42 = vpop.f32.mrf.mxu2 }
 0x15a   : > { %v1259_v30 = vadd.f32 %v1183_v42, %v941_v16  ;;  %v1458_v47 = vpop.f32.mrf.mxu3  ;;  %v1736_v6 = vpop.f32.mrf.mxu0  ;;  %v1035_v16 = vld [vmem:[#allocation2 + $0x15a] sm:$0xff] }
 0x15c   : > { %v1534_v19 = vadd.f32 %v1458_v47, %v1259_v30  ;;  %v1310_v30 = vld [vmem:[#allocation2 + $0x170] sm:$0xff] }
 0x15d   : > { %v946_v35 = vpop.f32.mrf.mxu1  ;;  %3446 = vmatmul.msk.f32.gmra.mxu0 %vm432_vm0, %v4016_v36 }
 0x15e   : > { %v4448_v21 = vadd.f32 %v1733_v27, %v1534_v19  ;;  %3380 = vmatmul.msk.f32.gmra.mxu2 %vm432_vm0, %v1033_v18  ;;  %v947_v9 = vadd.f32 %v946_v35, %v4209_v24  ;;  %v1586_v35 = vld [vmem:[#allocation2 + $0x181] sm:$0xff] }
 0x15f   : > { %3413 = vmatmul.msk.f32.gmra.mxu3 %vm432_vm0, %v1308_v26 }
 0x160   : > { %3348 = vmatmul.msk.f32.gmra.mxu1 %vm432_vm0, %v1307_v31 }
 0x161   : > { %v1186_v25 = vpop.f32.mrf.mxu2 }
 0x162   : > { %v1260_v29 = vadd.f32 %v1186_v25, %v944_v46  ;;  %v1461_v11 = vpop.f32.mrf.mxu3  ;;  %v1739_v41 = vpop.f32.mrf.mxu0  ;;  %v1036_v46 = vld [vmem:[#allocation2 + $0x16a] sm:$0xff] }
 0x164   : > { %v1535_v5 = vadd.f32 %v1461_v11, %v1260_v29  ;;  %v1311_v29 = vld [vmem:[#allocation2 + $0x180] sm:$0xff] }
 0x165   : > { %v949_v51 = vpop.f32.mrf.mxu1  ;;  %3447 = vmatmul.msk.f32.gmra.mxu0 %vm432_vm0, %v4035_v43 }
 0x166   : > { %v4456_v36 = vadd.f32 %v1736_v6, %v1535_v5  ;;  %3381 = vmatmul.msk.f32.gmra.mxu2 %vm432_vm0, %v1034_v23  ;;  %v950_v24 = vadd.f32 %v949_v51, %v4229_v28  ;;  %v1587_v51 = vld [vmem:[#allocation2 + $0x189] sm:$0xff] }
 0x167   : > { %3414 = vmatmul.msk.f32.gmra.mxu3 %vm432_vm0, %v1309_v22 }
 0x168   : > { %3349 = vmatmul.msk.f32.gmra.mxu1 %vm432_vm0, %v1308_v26 }
 0x169   : > { %v1189_v27 = vpop.f32.mrf.mxu2 }
 0x16a   : > { %v1261_v31 = vadd.f32 %v1189_v27, %v947_v9  ;;  %v1464_v39 = vpop.f32.mrf.mxu3  ;;  %v1742_v12 = vpop.f32.mrf.mxu0  ;;  %v1037_v9 = vld [vmem:[#allocation2 + $0x172] sm:$0xff] }
 0x16c   : > { %v1536_v42 = vadd.f32 %v1464_v39, %v1261_v31  ;;  %v1312_v31 = vld [vmem:[#allocation2 + $0x188] sm:$0xff] }
 0x16d   : > { %v952_v47 = vpop.f32.mrf.mxu1  ;;  %3448 = vmatmul.msk.f32.gmra.mxu0 %vm432_vm0, %v4051_v48 }
 0x16e   : > { %v4464_v43 = vadd.f32 %v1739_v41, %v1536_v42  ;;  %3382 = vmatmul.msk.f32.gmra.mxu2 %vm432_vm0, %v1035_v16  ;;  %v953_v28 = vadd.f32 %v952_v47, %v4249_v37 }
 0x16f   : > { %3415 = vmatmul.msk.f32.gmra.mxu3 %vm432_vm0, %v1310_v30 }
 0x170   : > { %3350 = vmatmul.msk.f32.gmra.mxu1 %vm432_vm0, %v1309_v22 }
 0x171   : > { %v1192_v6 = vpop.f32.mrf.mxu2 }
 0x172   : > { %v1262_v18 = vadd.f32 %v1192_v6, %v950_v24  ;;  %v1467_v19 = vpop.f32.mrf.mxu3  ;;  %v1745_v26 = vpop.f32.mrf.mxu0 }
 0x174   : > { %v1537_v25 = vadd.f32 %v1467_v19, %v1262_v18 }
 0x175   : > { %v955_v11 = vpop.f32.mrf.mxu1  ;;  %3449 = vmatmul.msk.f32.gmra.mxu0 %vm432_vm0, %v1586_v35 }
 0x176   : > { %v4471_v48 = vadd.f32 %v1742_v12, %v1537_v25  ;;  %3383 = vmatmul.msk.f32.gmra.mxu2 %vm432_vm0, %v1036_v46  ;;  %v956_v37 = vadd.f32 %v955_v11, %v4269_v44 }
 0x177   : > { %3416 = vmatmul.msk.f32.gmra.mxu3 %vm432_vm0, %v1311_v29 }
 0x178   : > { %3351 = vmatmul.msk.f32.gmra.mxu1 %vm432_vm0, %v1310_v30 }
 0x179   : > { %v1195_v41 = vpop.f32.mrf.mxu2 }
 0x17a   : > { %v1263_v23 = vadd.f32 %v1195_v41, %v953_v28  ;;  %v1470_v5 = vpop.f32.mrf.mxu3  ;;  %v1748_v22 = vpop.f32.mrf.mxu0 }
 0x17c   : > { %v1538_v27 = vadd.f32 %v1470_v5, %v1263_v23 }
 0x17d   : > { %v958_v39 = vpop.f32.mrf.mxu1  ;;  %3450 = vmatmul.msk.f32.gmra.mxu0 %vm432_vm0, %v1587_v51 }
 0x17e   : > { %v4478_v12 = vadd.f32 %v1745_v26, %v1538_v27  ;;  %3384 = vmatmul.msk.f32.gmra.mxu2 %vm432_vm0, %v1037_v9  ;;  %v959_v44 = vadd.f32 %v958_v39, %v4157_v33  ;;  %v2386_v39 = vld [vmem:[#allocation2 + $0x61] sm:$0xff] }
 0x17f   : > { %3417 = vmatmul.msk.f32.gmra.mxu3 %vm432_vm0, %v1312_v31 }
 0x180   : > { %3452 = vmatmul.msk.f32.vlgmr.msra.gmra.mxu1 %vm432_vm0, %v4070_v55 }
 0x181   : > { %v1198_v16 = vpop.f32.mrf.mxu2 }
 0x182   : > { %v1264_v42 = vadd.f32 %v1198_v16, %v956_v37  ;;  %v1473_v30 = vpop.f32.mrf.mxu3  ;;  %v1751_v47 = vpop.f32.mrf.mxu0 }
 0x184   : > { %v1539_v24 = vadd.f32 %v1473_v30, %v1264_v42 }
 0x185   : > { %v961_v6 = vpop.f32.mrf.mxu1  ;;  %3551 = vmatmul.msk.f32.vlgmr.msra.gmra.mxu0 %vm432_vm0, %v4093_v59 }
 0x186   : > { %v4487_v18 = vadd.f32 %v1748_v22, %v1539_v24  ;;  %3485 = vmatmul.msk.f32.vlgmr.msra.gmra.mxu2 %vm432_vm0, %v4072_v56  ;;  %v2387_v24 = vld [vmem:[#allocation2 + $0x69] sm:$0xff] }
 0x187   : > { %3518 = vmatmul.msk.f32.vlgmr.msra.gmra.mxu3 %vm432_vm0, %v3987_v3  ;;  %v962_v3 = vadd.f32 %v961_v6, %v4179_v17 }
 0x188   : > { %3453 = vmatmul.msk.f32.gmra.mxu1 %vm432_vm0, %v4081_v57 }
 0x189   : > { %v1201_v55 = vpop.f32.mrf.mxu2 }
 0x18a   : > { %v1265_v19 = vadd.f32 %v1201_v55, %v959_v44  ;;  %v1476_v26 = vpop.f32.mrf.mxu3  ;;  %v1754_v35 = vpop.f32.mrf.mxu0  ;;  %v5013_v44 = vld [vmem:[#allocation6_spill] sm:$0xff] }
 0x18c   : > { %v1540_v46 = vadd.f32 %v1476_v26, %v1265_v19  ;;  %v5015_v19 = vld [vmem:[#allocation21_spill] sm:$0xff] }
 0x18d   : > { %v964_v25 = vpop.f32.mrf.mxu1  ;;  %3552 = vmatmul.msk.f32.gmra.mxu0 %vm432_vm0, %v4105_v61 }
 0x18e   : > { %v4498_v29 = vadd.f32 %v1751_v47, %v1540_v46  ;;  %3486 = vmatmul.msk.f32.gmra.mxu2 %vm432_vm0, %v4083_v58 }
 0x18f   : > { %3519 = vmatmul.msk.f32.gmra.mxu3 %vm432_vm0, %v4012_v34  ;;  %v965_v34 = vadd.f32 %v964_v25, %v4199_v2 }
 0x190   : > { %3454 = vmatmul.msk.f32.gmra.mxu1 %vm432_vm0, %v4093_v59 }
 0x191   : > { %v1204_v56 = vpop.f32.mrf.mxu2 }
 0x192   : > { %v1266_v57 = vadd.f32 %v1204_v56, %v962_v3  ;;  %v1479_v33 = vpop.f32.mrf.mxu3  ;;  %v1757_v11 = vpop.f32.mrf.mxu0  ;;  %v2388_v56 = vld [vmem:[#allocation2 + $0x79] sm:$0xff] }
 0x194   : > { %v1541_v28 = vadd.f32 %v1479_v33, %v1266_v57  ;;  %v5016_v33 = vld [vmem:[#allocation9_spill] sm:$0xff] }
 0x195   : > { %v967_v41 = vpop.f32.mrf.mxu1  ;;  %3553 = vmatmul.msk.f32.gmra.mxu0 %vm432_vm0, %v4117_v0 }
 0x196   : > { %v4509_v23 = vadd.f32 %v1754_v35, %v1541_v28  ;;  %3487 = vmatmul.msk.f32.gmra.mxu2 %vm432_vm0, %v4095_v60  ;;  %v5017_v28 = vld [vmem:[#allocation4_spill] sm:$0xff] }
 0x197   : > { %3520 = vmatmul.msk.f32.gmra.mxu3 %vm432_vm0, %v4031_v40  ;;  %v968_v40 = vadd.f32 %v967_v41, %v4219_v49  ;;  %v5018_v41 = vld [vmem:[#allocation25_spill] sm:$0xff] }
 0x198   : > { %3455 = vmatmul.msk.f32.gmra.mxu1 %vm432_vm0, %v4105_v61 }
 0x199   : > { %v1207_v58 = vpop.f32.mrf.mxu2 }
 0x19a   : > { %v1267_v59 = vadd.f32 %v1207_v58, %v965_v34  ;;  %v1482_v17 = vpop.f32.mrf.mxu3  ;;  %v1760_v5 = vpop.f32.mrf.mxu0 }
 0x19c   : > { %v1542_v22 = vadd.f32 %v1482_v17, %v1267_v59 }
 0x19d   : > { %v970_v51 = vpop.f32.mrf.mxu1  ;;  %3554 = vmatmul.msk.f32.gmra.mxu0 %vm432_vm0, %v4131_v7 }
 0x19e   : > { %v4520_v9 = vadd.f32 %v1757_v11, %v1542_v22  ;;  %3488 = vmatmul.msk.f32.gmra.mxu2 %vm432_vm0, %v4107_v62  ;;  %v2389_v22 = vld [vmem:[#allocation2 + $0x81] sm:$0xff] }
 0x19f   : > { %3521 = vmatmul.msk.f32.gmra.mxu3 %vm432_vm0, %v4047_v45  ;;  %v5012_v45 = vld [vmem:[#allocation17_spill] sm:$0xff] }
 0x1a0   : > { %3456 = vmatmul.msk.f32.gmra.mxu1 %vm432_vm0, %v4117_v0  ;;  %v971_v62 = vadd.f32 %v970_v51, %v5012_v45 }
 0x1a1   : > { %v1210_v60 = vpop.f32.mrf.mxu2 }
 0x1a2   : > { %v1268_v61 = vadd.f32 %v1210_v60, %v968_v40  ;;  %v1485_v2 = vpop.f32.mrf.mxu3  ;;  %v1763_v27 = vpop.f32.mrf.mxu0  ;;  %v5019_v40 = vld [vmem:[#allocation12_spill] sm:$0xff] }
 0x1a4   : > { %v1543_v31 = vadd.f32 %v1485_v2, %v1268_v61  ;;  %v5020_v61 = vld [vmem:[#allocation7_spill] sm:$0xff]  ;;  %v5021_v2 = vld [vmem:[#allocation28_spill] sm:$0xff] }
 0x1a5   : > { %v973_v37 = vpop.f32.mrf.mxu1  ;;  %3555 = vmatmul.msk.f32.gmra.mxu0 %vm432_vm0, %v4145_v10 }
 0x1a6   : > { %v4531_v16 = vadd.f32 %v1760_v5, %v1543_v31  ;;  %3489 = vmatmul.msk.f32.gmra.mxu2 %vm432_vm0, %v4119_v4  ;;  %v5014_v4 = vld [vmem:[#allocation3_spill] sm:$0xff]  ;;  %v974_v26 = vadd.f32 %v973_v37, %v5015_v19 }
 0x1a7   : > { %3522 = vmatmul.msk.f32.gmra.mxu3 %vm432_vm0, %v2386_v39 }
 0x1a8   : > { %3457 = vmatmul.msk.f32.gmra.mxu1 %vm432_vm0, %v4131_v7 }
 0x1a9   : > { %v1213_v0 = vpop.f32.mrf.mxu2 }
 0x1aa   : > { %v1269_v49 = vadd.f32 %v1213_v0, %v971_v62  ;;  %v1488_v42 = vpop.f32.mrf.mxu3  ;;  %v1766_v30 = vpop.f32.mrf.mxu0  ;;  %v2390_v0 = vld [vmem:[#allocation2 + $0x91] sm:$0xff] }
 0x1ac   : > { %v1544_v47 = vadd.f32 %v1488_v42, %v1269_v49  ;;  %v5022_v42 = vld [vmem:[#allocation15_spill] sm:$0xff] }
 0x1ad   : > { %v976_v6 = vpop.f32.mrf.mxu1  ;;  %3556 = vmatmul.msk.f32.gmra.mxu0 %vm432_vm0, %v5013_v44 }
 0x1ae   : > { %v4541_v55 = vadd.f32 %v1763_v27, %v1544_v47  ;;  %3490 = vmatmul.msk.f32.gmra.mxu2 %vm432_vm0, %v5014_v4  ;;  %v977_v34 = vadd.f32 %v976_v6, %v5018_v41  ;;  %v5023_v47 = vld [vmem:[#allocation10_spill] sm:$0xff] }
 0x1af   : > { %3523 = vmatmul.msk.f32.gmra.mxu3 %vm432_vm0, %v2387_v24  ;;  %v5024_v24 = vld [vmem:[#allocation5_spill] sm:$0xff] }
 0x1b0   : > { %3458 = vmatmul.msk.f32.gmra.mxu1 %vm432_vm0, %v4145_v10 }
 0x1b1   : > { %v1216_v7 = vpop.f32.mrf.mxu2 }
 0x1b2   : > { %v1270_v35 = vadd.f32 %v1216_v7, %v974_v26  ;;  %v1491_v46 = vpop.f32.mrf.mxu3  ;;  %v1769_v25 = vpop.f32.mrf.mxu0 }
 0x1b4   : > { %v1545_v3 = vadd.f32 %v1491_v46, %v1270_v35  ;;  %v2391_v35 = vld [vmem:[#allocation2 + $0x99] sm:$0xff] }
 0x1b5   : > { %v979_v57 = vpop.f32.mrf.mxu1  ;;  %3557 = vmatmul.msk.f32.gmra.mxu0 %vm432_vm0, %v5016_v33 }
 0x1b6   : > { %v4551_v11 = vadd.f32 %v1766_v30, %v1545_v3  ;;  %3491 = vmatmul.msk.f32.gmra.mxu2 %vm432_vm0, %v5017_v28  ;;  %v980_v27 = vadd.f32 %v979_v57, %v5021_v2  ;;  %v5027_v57 = vld [vmem:[#allocation8_spill] sm:$0xff] }
 0x1b7   : > { %3524 = vmatmul.msk.f32.gmra.mxu3 %vm432_vm0, %v2388_v56  ;;  %v5026_v56 = vld [vmem:[#allocation13_spill] sm:$0xff] }
 0x1b8   : > { %3459 = vmatmul.msk.f32.gmra.mxu1 %vm432_vm0, %v5013_v44 }
 0x1b9   : > { %v1219_v10 = vpop.f32.mrf.mxu2 }
 0x1ba   : > { %v1271_v58 = vadd.f32 %v1219_v10, %v977_v34  ;;  %v1494_v59 = vpop.f32.mrf.mxu3  ;;  %v1772_v17 = vpop.f32.mrf.mxu0 }
 0x1bc   : > { %v1546_v5 = vadd.f32 %v1494_v59, %v1271_v58  ;;  %v2392_v59 = vld [vmem:[#allocation2 + $0xa9] sm:$0xff] }
 0x1bd   : > { %v982_v51 = vpop.f32.mrf.mxu1  ;;  %3558 = vmatmul.msk.f32.gmra.mxu0 %vm432_vm0, %v5019_v40 }
 0x1be   : > { %v4561_v60 = vadd.f32 %v1769_v25, %v1546_v5  ;;  %3492 = vmatmul.msk.f32.gmra.mxu2 %vm432_vm0, %v5020_v61  ;;  %v983_v6 = vadd.f32 %v982_v51, %v5024_v24  ;;  %v5025_v25 = vld [vmem:[#allocation19_spill] sm:$0xff]  ;;  %v5029_v51 = vld [vmem:[#allocation16_spill] sm:$0xff] }
 0x1bf   : > { %3525 = vmatmul.msk.f32.gmra.mxu3 %vm432_vm0, %v2389_v22  ;;  %v5028_v5 = vld [vmem:[#allocation23_spill] sm:$0xff] }
 0x1c0   : > { %3460 = vmatmul.msk.f32.gmra.mxu1 %vm432_vm0, %v5016_v33 }
 0x1c1   : > { %v1222_v31 = vpop.f32.mrf.mxu2 }
 0x1c2   : > { %v1272_v39 = vadd.f32 %v1222_v31, %v980_v27  ;;  %v1497_v37 = vpop.f32.mrf.mxu3  ;;  %v1775_v45 = vpop.f32.mrf.mxu0 }
 0x1c4   : > { %v1547_v62 = vadd.f32 %v1497_v37, %v1272_v39 }
 0x1c5   : > { %v985_v49 = vpop.f32.mrf.mxu1  ;;  %3559 = vmatmul.msk.f32.gmra.mxu0 %vm432_vm0, %v5022_v42 }
 0x1c6   : > { %v4571_v30 = vadd.f32 %v1772_v17, %v1547_v62  ;;  %3493 = vmatmul.msk.f32.gmra.mxu2 %vm432_vm0, %v5023_v47  ;;  %v986_v33 = vadd.f32 %v985_v49, %v5027_v57  ;;  %v5033_v47 = vld [vmem:[#allocation14_spill] sm:$0xff] }
 0x1c7   : > { %3526 = vmatmul.msk.f32.gmra.mxu3 %vm432_vm0, %v2390_v0  ;;  %v5031_v0 = vld [vmem:[#allocation27_spill] sm:$0xff]  ;;  %v5036_v57 = vld [vmem:[#allocation18_spill] sm:$0xff] }
 0x1c8   : > { %3461 = vmatmul.msk.f32.gmra.mxu1 %vm432_vm0, %v5019_v40  ;;  %v5030_v40 = vld [vmem:[#allocation11_spill] sm:$0xff] }
 0x1c9   : > { %v1225_v44 = vpop.f32.mrf.mxu2 }
 0x1ca   : > { %v1273_v4 = vadd.f32 %v1225_v44, %v983_v6  ;;  %v1500_v19 = vpop.f32.mrf.mxu3  ;;  %v1778_v26 = vpop.f32.mrf.mxu0 }
 0x1cc   : > { %v1548_v7 = vadd.f32 %v1500_v19, %v1273_v4 }
 0x1cd   : > { %v988_v46 = vpop.f32.mrf.mxu1  ;;  %3560 = vmatmul.msk.f32.gmra.mxu0 %vm432_vm0, %v5025_v25 }
 0x1ce   : > { %v4581_v3 = vadd.f32 %v1775_v45, %v1548_v7  ;;  %3494 = vmatmul.msk.f32.gmra.mxu2 %vm432_vm0, %v5026_v56  ;;  %v989_v61 = vadd.f32 %v988_v46, %v5030_v40  ;;  %v2393_v45 = vld [vmem:[#allocation2 + $0xb1] sm:$0xff]  ;;  %v2394_v7 = vld [vmem:[#allocation2 + $0xc1] sm:$0xff] }
 0x1cf   : > { %3527 = vmatmul.msk.f32.gmra.mxu3 %vm432_vm0, %v2391_v35  ;;  %v5034_v46 = vld [vmem:[#allocation30_spill] sm:$0xff]  ;;  %v5035_v56 = vld [vmem:[#allocation24_spill] sm:$0xff] }
 0x1d0   : > { %3462 = vmatmul.msk.f32.gmra.mxu1 %vm432_vm0, %v5022_v42  ;;  %v5032_v42 = vld [vmem:[#allocation20_spill] sm:$0xff] }
 0x1d1   : > { %v1228_v28 = vpop.f32.mrf.mxu2 }
 0x1d2   : > { %v1274_v41 = vadd.f32 %v1228_v28, %v986_v33  ;;  %v1503_v34 = vpop.f32.mrf.mxu3  ;;  %v1781_v10 = vpop.f32.mrf.mxu0 }
 0x1d4   : > { %v1549_v58 = vadd.f32 %v1503_v34, %v1274_v41 }
 0x1d5   : > { %v991_v17 = vpop.f32.mrf.mxu1  ;;  %3561 = vmatmul.msk.f32.gmra.mxu0 %vm432_vm0, %v5028_v5 }
 0x1d6   : > { %v4591_v22 = vadd.f32 %v1778_v26, %v1549_v58  ;;  %3495 = vmatmul.msk.f32.gmra.mxu2 %vm432_vm0, %v5029_v51  ;;  %v992_v24 = vadd.f32 %v991_v17, %v5033_v47  ;;  %v5037_v51 = vld [vmem:[#allocation22_spill] sm:$0xff] }
 0x1d7   : > { %3528 = vmatmul.msk.f32.gmra.mxu3 %vm432_vm0, %v2392_v59  ;;  %v2395_v59 = vld [vmem:[#allocation2 + $0xc9] sm:$0xff] }
 0x1d8   : > { %3463 = vmatmul.msk.f32.gmra.mxu1 %vm432_vm0, %v5025_v25 }
 0x1d9   : > { %v1231_v2 = vpop.f32.mrf.mxu2 }
 0x1da   : > { %v1275_v27 = vadd.f32 %v1231_v2, %v989_v61  ;;  %v1506_v31 = vpop.f32.mrf.mxu3  ;;  %v1784_v39 = vpop.f32.mrf.mxu0 }
 0x1dc   : > { %v1550_v37 = vadd.f32 %v1506_v31, %v1275_v27 }
 0x1dd   : > { %v994_v62 = vpop.f32.mrf.mxu1  ;;  %3562 = vmatmul.msk.f32.gmra.mxu0 %vm432_vm0, %v5031_v0 }
 0x1de   : > { %v4601_v49 = vadd.f32 %v1781_v10, %v1550_v37  ;;  %3496 = vmatmul.msk.f32.gmra.mxu2 %vm432_vm0, %v5032_v42  ;;  %v995_v33 = vadd.f32 %v994_v62, %v5036_v57  ;;  %v2396_v37 = vld [vmem:[#allocation2 + $0xd9] sm:$0xff] }
 0x1df   : > { %3529 = vmatmul.msk.f32.gmra.mxu3 %vm432_vm0, %v2393_v45 }
 0x1e0   : > { %3464 = vmatmul.msk.f32.gmra.mxu1 %vm432_vm0, %v5028_v5 }
 0x1e1   : > { %v1234_v6 = vpop.f32.mrf.mxu2 }
 0x1e2   : > { %v1276_v44 = vadd.f32 %v1234_v6, %v992_v24  ;;  %v1509_v4 = vpop.f32.mrf.mxu3  ;;  %v1787_v19 = vpop.f32.mrf.mxu0 }
 0x1e4   : > { %v1551_v26 = vadd.f32 %v1509_v4, %v1276_v44  ;;  %v2397_v4 = vld [vmem:[#allocation2 + $0xe1] sm:$0xff] }
 0x1e5   : > { %v997_v35 = vpop.f32.mrf.mxu1  ;;  %3563 = vmatmul.msk.f32.gmra.mxu0 %vm432_vm0, %v5034_v46 }
 0x1e6   : > { %v4611_v25 = vadd.f32 %v1784_v39, %v1551_v26  ;;  %3497 = vmatmul.msk.f32.gmra.mxu2 %vm432_vm0, %v5035_v56  ;;  %v998_v40 = vadd.f32 %v997_v35, %v5037_v51  ;;  %v4662_v51 = vld [vmem:[%s4941_s2] ss:$0 sm:$0xff] }
 0x1e7   : > { %3530 = vmatmul.msk.f32.gmra.mxu3 %vm432_vm0, %v2394_v7 }
 0x1e8   : > { %3465 = vmatmul.msk.f32.gmra.mxu1 %vm432_vm0, %v5031_v0 }
 0x1e9   : > { %v1237_v28 = vpop.f32.mrf.mxu2 }
 0x1ea   : > { %v1277_v41 = vadd.f32 %v1237_v28, %v995_v33  ;;  %v1512_v34 = vpop.f32.mrf.mxu3  ;;  %v1790_v10 = vpop.f32.mrf.mxu0  ;;  %v2398_v33 = vld [vmem:[#allocation2 + $0xf1] sm:$0xff] }
 0x1ec   : > { %v1552_v58 = vadd.f32 %v1512_v34, %v1277_v41 }
 0x1ed   : > { %v1000_v17 = vpop.f32.mrf.mxu1  ;;  %3564 = vmatmul.msk.f32.gmra.mxu0 %vm432_vm0, %v4314_v8 }
 0x1ee   : > { %v4621_v5 = vadd.f32 %v1787_v19, %v1552_v58  ;;  %3498 = vmatmul.msk.f32.gmra.mxu2 %vm432_vm0, %v4287_v13  ;;  %v5038_v13 = vld [vmem:[#allocation26_spill] sm:$0xff] }
 0x1ef   : > { %3531 = vmatmul.msk.f32.gmra.mxu3 %vm432_vm0, %v2395_v59  ;;  %v1001_v0 = vadd.f32 %v1000_v17, %v5038_v13  ;;  %v2400_v13 = vld [vmem:[#allocation2 + $0x109] sm:$0xff] }
 0x1f0   : > { %3466 = vmatmul.msk.f32.gmra.mxu1 %vm432_vm0, %v5034_v46 }
 0x1f1   : > { %v1240_v61 = vpop.f32.mrf.mxu2 }
 0x1f2   : > { %v1278_v2 = vadd.f32 %v1240_v61, %v998_v40  ;;  %v1515_v27 = vpop.f32.mrf.mxu3  ;;  %v1793_v31 = vpop.f32.mrf.mxu0  ;;  %v2399_v40 = vld [vmem:[#allocation2 + $0xf9] sm:$0xff] }
 0x1f4   : > { %v1553_v39 = vadd.f32 %v1515_v27, %v1278_v2 }
 0x1f5   : > { %v1003_v45 = vpop.f32.mrf.mxu1  ;;  %3565 = vmatmul.msk.f32.gmra.mxu0 %vm432_vm0, %v4329_v38 }
 0x1f6   : > { %v4631_v62 = vadd.f32 %v1790_v10, %v1553_v39  ;;  %3499 = vmatmul.msk.f32.gmra.mxu2 %vm432_vm0, %v4303_v20  ;;  %v5039_v20 = vld [vmem:[#allocation29_spill] sm:$0xff] }
 0x1f7   : > { %3532 = vmatmul.msk.f32.gmra.mxu3 %vm432_vm0, %v2396_v37  ;;  %v1004_v7 = vadd.f32 %v1003_v45, %v5039_v20 }
 0x1f8   : > { %3467 = vmatmul.msk.f32.gmra.mxu1 %vm432_vm0, %v4314_v8 }
 0x1f9   : > { %v1243_v42 = vpop.f32.mrf.mxu2 }
 0x1fa   : > { %v1279_v47 = vadd.f32 %v1243_v42, %v1001_v0  ;;  %v1518_v24 = vpop.f32.mrf.mxu3  ;;  %v1796_v6 = vpop.f32.mrf.mxu0 }
 0x1fc   : > { %v1554_v44 = vadd.f32 %v1518_v24, %v1279_v47  ;;  %v5042_v47 = vld [vmem:[#allocation34_spill] sm:$0xff]  ;;  %v5043_v24 = vld [vmem:[#allocation33_spill] sm:$0xff] }
 0x1fd   : > { %v1978_v19 = vpop.f32.mrf.mxu1  ;;  %3566 = vmatmul.msk.f32.gmra.mxu0 %vm432_vm0, %v4344_v32 }
 0x1fe   : > { %v4641_v26 = vadd.f32 %v1793_v31, %v1554_v44  ;;  %3500 = vmatmul.msk.f32.gmra.mxu2 %vm432_vm0, %v4316_v54  ;;  %v5040_v54 = vld [vmem:[#allocation31_spill] sm:$0xff] }
 0x1ff   : > { %3533 = vmatmul.msk.f32.gmra.mxu3 %vm432_vm0, %v2397_v4 }
 0x200   : > { %3468 = vmatmul.msk.f32.gmra.mxu1 %vm432_vm0, %v4329_v38  ;;  %v2074_v38 = vadd.f32 %v1978_v19, %v5040_v54 }
 0x201   : > { %v1246_v8 = vpop.f32.mrf.mxu2 }
 0x202   : > { %v1280_v35 = vadd.f32 %v1246_v8, %v1004_v7  ;;  %v1521_v46 = vpop.f32.mrf.mxu3  ;;  %v2804_v56 = vpop.f32.mrf.mxu0 }
 0x204   : > { %v1555_v57 = vadd.f32 %v1521_v46, %v1280_v35 }
 0x205   : > { %v1981_v28 = vpop.f32.mrf.mxu1  ;;  %3567 = vmatmul.msk.f32.gmra.mxu0 %vm432_vm0, %v4359_v1 }
 0x206   : > { %v4651_v41 = vadd.f32 %v1796_v6, %v1555_v57  ;;  %3501 = vmatmul.msk.f32.gmra.mxu2 %vm432_vm0, %v4331_v15 }
 0x207   : > { %3534 = vmatmul.msk.f32.gmra.mxu3 %vm432_vm0, %v2398_v33 }
 0x208   : > { %3469 = vmatmul.msk.f32.gmra.mxu1 %vm432_vm0, %v4344_v32  ;;  %v5041_v32 = vld [vmem:[#allocation32_spill] sm:$0xff] }
 0x209   : > { %v2254_v34 = vpop.f32.mrf.mxu2  ;;  %v2075_v2 = vadd.f32 %v1981_v28, %v5041_v32  ;;  %v2401_v28 = vld [vmem:[#allocation2 + $0x111] sm:$0xff] }
 0x20a   : > { %v2350_v10 = vadd.f32 %v2254_v34, %v2074_v38  ;;  %v2529_v58 = vpop.f32.mrf.mxu3  ;;  %v2807_v59 = vpop.f32.mrf.mxu0  ;;  %v1851_v38 = vld [vmem:[#allocation2 + $0x10a] sm:$0xff] }
 0x20c   : > { %v2625_v17 = vadd.f32 %v2529_v58, %v2350_v10  ;;  %v5044_v10 = vld [vmem:[#allocation36_spill] sm:$0xff]  ;;  %v5045_v58 = vld [vmem:[#allocation35_spill] sm:$0xff] }
 0x20d   : > { %v1984_v61 = vpop.f32.mrf.mxu1  ;;  %3568 = vmatmul.msk.f32.gmra.mxu0 %vm432_vm0, %v4374_v50 }
 0x20e   : > { %v2900_v15 = vadd.f32 %v2804_v56, %v2625_v17  ;;  %3502 = vmatmul.msk.f32.gmra.mxu2 %vm432_vm0, %v4346_v53  ;;  %v2076_v6 = vadd.f32 %v1984_v61, %v5043_v24 }
 0x20f   : > { %3535 = vmatmul.msk.f32.gmra.mxu3 %vm432_vm0, %v2399_v40 }
 0x210   : > { %v2936_v27 = vadd.f32 %v4662_v51, %v2900_v15  ;;  %3470 = vmatmul.msk.f32.gmra.mxu1 %vm432_vm0, %v4359_v1 }
 0x211   : > { %v2257_v31 = vpop.f32.mrf.mxu2 }
 0x212   : > { %2968 = vst.msk [vmem:[%s4673_s17] sm:$0xff] %vm432_vm0, %v2936_v27  ;;  %v2351_v53 = vadd.f32 %v2257_v31, %v2075_v2  ;;  %v2532_v39 = vpop.f32.mrf.mxu3  ;;  %v2810_v37 = vpop.f32.mrf.mxu0  ;;  %v3071_v1 = vmul.f32 %v2936_v27, %v2936_v27  ;;  %v3000_v19 = vsel %vm432_vm0, %v2936_v27, 0.0  ;;  %v2677_v27 = vld [vmem:[#allocation2 + $0x122] sm:$0xff] }
 0x214   : > { %v2626_v45 = vadd.f32 %v2532_v39, %v2351_v53  ;;  %v3103_v56 = vsel %vm432_vm0, %v3071_v1, 0.0  ;;  %v2127_v53 = vld [vmem:[#allocation2 + $0x120] sm:$0xff] }
 0x215   : > { %v1987_v0 = vpop.f32.mrf.mxu1  ;;  %3569 = vmatmul.msk.f32.gmra.mxu0 %vm432_vm0, %v4389_v63  ;;  %v5046_v1 = vld [vmem:[#allocation37_spill] sm:$0xff] }
 0x216   : > { %v2901_v42 = vadd.f32 %v2807_v59, %v2626_v45  ;;  %3503 = vmatmul.msk.f32.gmra.mxu2 %vm432_vm0, %v5042_v47  ;;  %v2077_v59 = vadd.f32 %v1987_v0, %v5045_v58  ;;  %v2402_v45 = vld [vmem:[#allocation2 + $0x121] sm:$0xff] }
 0x217   : > { %3536 = vmatmul.msk.f32.gmra.mxu3 %vm432_vm0, %v2400_v13 }
 0x218   : > { %v2937_v44 = vadd.f32 %v4662_v51, %v2901_v42  ;;  %3471 = vmatmul.msk.f32.gmra.mxu1 %vm432_vm0, %v4374_v50  ;;  %v1852_v42 = vld [vmem:[#allocation2 + $0x112] sm:$0xff] }
 0x219   : > { %v2260_v4 = vpop.f32.mrf.mxu2 }
 0x21a   : > { %2969 = vst.msk [vmem:[%s4673_s17 + $0x8] sm:$0xff] %vm432_vm0, %v2937_v44  ;;  %v3001_v63 = vsel %vm432_vm0, %v2937_v44, 0.0  ;;  %v3072_v20 = vmul.f32 %v2937_v44, %v2937_v44  ;;  %v2352_v7 = vadd.f32 %v2260_v4, %v2076_v6  ;;  %v2535_v8 = vpop.f32.mrf.mxu3  ;;  %v2813_v35 = vpop.f32.mrf.mxu0 }
 0x21b   : > { %v3002_v46 = vadd.f32 %v3001_v63, %v3000_v19 }
 0x21c   : > { %v3104_v57 = vsel %vm432_vm0, %v3072_v20, 0.0  ;;  %v2627_v33 = vadd.f32 %v2535_v8, %v2352_v7  ;;  %v2678_v8 = vld [vmem:[#allocation2 + $0x12a] sm:$0xff] }
 0x21d   : > { %v3105_v50 = vadd.f32 %v3104_v57, %v3103_v56  ;;  %v1990_v54 = vpop.f32.mrf.mxu1  ;;  %3570 = vmatmul.msk.f32.gmra.mxu0 %vm432_vm0, %v4401_v52 }
 0x21e   : > { %v2902_v34 = vadd.f32 %v2810_v37, %v2627_v33  ;;  %3504 = vmatmul.msk.f32.gmra.mxu2 %vm432_vm0, %v5044_v10  ;;  %v2078_v24 = vadd.f32 %v1990_v54, %v5046_v1  ;;  %v2403_v33 = vld [vmem:[#allocation2 + $0x129] sm:$0xff] }
 0x21f   : > { %3537 = vmatmul.msk.f32.gmra.mxu3 %vm432_vm0, %v2401_v28 }
 0x220   : > { %v2938_v17 = vadd.f32 %v4662_v51, %v2902_v34  ;;  %3472 = vmatmul.msk.f32.gmra.mxu1 %vm432_vm0, %v1851_v38  ;;  %v5047_v38 = vld [vmem:[#allocation38_spill] sm:$0xff] }
 0x221   : > { %v2263_v40 = vpop.f32.mrf.mxu2 }
 0x222   : > { %2970 = vst.msk [vmem:[%s4673_s17 + $0x10] sm:$0xff] %vm432_vm0, %v2938_v17  ;;  %v3003_v61 = vsel %vm432_vm0, %v2938_v17, 0.0  ;;  %v3073_v15 = vmul.f32 %v2938_v17, %v2938_v17  ;;  %v2353_v32 = vadd.f32 %v2263_v40, %v2077_v59  ;;  %v2538_v52 = vpop.f32.mrf.mxu3  ;;  %v2816_v2 = vpop.f32.mrf.mxu0 }
 0x223   : > { %v3004_v31 = vadd.f32 %v3003_v61, %v3002_v46  ;;  %v2128_v46 = vld [vmem:[#allocation2 + $0x128] sm:$0xff] }
 0x224   : > { %v3106_v39 = vsel %vm432_vm0, %v3073_v15, 0.0  ;;  %v2628_v37 = vadd.f32 %v2538_v52, %v2353_v32  ;;  %v2679_v32 = vld [vmem:[#allocation2 + $0x13a] sm:$0xff] }
 0x225   : > { %v3107_v13 = vadd.f32 %v3106_v39, %v3105_v50  ;;  %v1993_v0 = vpop.f32.mrf.mxu1  ;;  %3571 = vmatmul.msk.f32.gmra.mxu0 %vm432_vm0, %v2677_v27  ;;  %v2404_v39 = vld [vmem:[#allocation2 + $0x139] sm:$0xff] }
 0x226   : > { %v2903_v47 = vadd.f32 %v2813_v35, %v2628_v37  ;;  %3505 = vmatmul.msk.f32.gmra.mxu2 %vm432_vm0, %v2127_v53  ;;  %v2079_v34 = vadd.f32 %v1993_v0, %v5047_v38 }
 0x227   : > { %3538 = vmatmul.msk.f32.gmra.mxu3 %vm432_vm0, %v2402_v45 }
 0x228   : > { %v2939_v6 = vadd.f32 %v4662_v51, %v2903_v47  ;;  %3473 = vmatmul.msk.f32.gmra.mxu1 %vm432_vm0, %v1852_v42 }
 0x229   : > { %v2266_v44 = vpop.f32.mrf.mxu2 }
 0x22a   : > { %2971 = vst.msk [vmem:[%s4673_s17 + $0x18] sm:$0xff] %vm432_vm0, %v2939_v6  ;;  %v3005_v4 = vsel %vm432_vm0, %v2939_v6, 0.0  ;;  %v3074_v19 = vmul.f32 %v2939_v6, %v2939_v6  ;;  %v2354_v63 = vadd.f32 %v2266_v44, %v2078_v24  ;;  %v2541_v20 = vpop.f32.mrf.mxu3  ;;  %v2819_v7 = vpop.f32.mrf.mxu0 }
 0x22b   : > { %v3006_v35 = vadd.f32 %v3005_v4, %v3004_v31 }
 0x22c   : > { %v3108_v56 = vsel %vm432_vm0, %v3074_v19, 0.0  ;;  %v2629_v57 = vadd.f32 %v2541_v20, %v2354_v63  ;;  %v2680_v19 = vld [vmem:[#allocation2 + $0x142] sm:$0xff] }
 0x22d   : > { %v3109_v28 = vadd.f32 %v3108_v56, %v3107_v13  ;;  %v1996_v50 = vpop.f32.mrf.mxu1  ;;  %3572 = vmatmul.msk.f32.gmra.mxu0 %vm432_vm0, %v2678_v8  ;;  %v5048_v13 = vld [vmem:[#allocation39_spill] sm:$0xff]  ;;  %v2130_v20 = vld [vmem:[#allocation2 + $0x140] sm:$0xff] }
 0x22e   : > { %v2904_v54 = vadd.f32 %v2816_v2, %v2629_v57  ;;  %3506 = vmatmul.msk.f32.gmra.mxu2 %vm432_vm0, %v2128_v46  ;;  %v2129_v2 = vld [vmem:[#allocation2 + $0x138] sm:$0xff]  ;;  %v2080_v0 = vadd.f32 %v1996_v50, %v5048_v13  ;;  %v2405_v46 = vld [vmem:[#allocation2 + $0x141] sm:$0xff] }
 0x22f   : > { %3539 = vmatmul.msk.f32.gmra.mxu3 %vm432_vm0, %v2403_v33  ;;  %v5049_v33 = vld [vmem:[#allocation40_spill] sm:$0xff] }
 0x230   : > { %v2940_v10 = vadd.f32 %v4662_v51, %v2904_v54  ;;  %3474 = vmatmul.msk.f32.gmra.mxu1 %vm432_vm0, %v2677_v27 }
 0x231   : > { %v2269_v58 = vpop.f32.mrf.mxu2 }
 0x232   : > { %2972 = vst.msk [vmem:[%s4673_s17 + $0x20] sm:$0xff] %vm432_vm0, %v2940_v10  ;;  %v3007_v59 = vsel %vm432_vm0, %v2940_v10, 0.0  ;;  %v3075_v17 = vmul.f32 %v2940_v10, %v2940_v10  ;;  %v2355_v40 = vadd.f32 %v2269_v58, %v2079_v34  ;;  %v2544_v61 = vpop.f32.mrf.mxu3  ;;  %v2822_v15 = vpop.f32.mrf.mxu0 }
 0x233   : > { %v3008_v52 = vadd.f32 %v3007_v59, %v3006_v35 }
 0x234   : > { %v3110_v31 = vsel %vm432_vm0, %v3075_v17, 0.0  ;;  %v2630_v53 = vadd.f32 %v2544_v61, %v2355_v40  ;;  %v2681_v17 = vld [vmem:[#allocation2 + $0x152] sm:$0xff] }
 0x235   : > { %v3111_v37 = vadd.f32 %v3110_v31, %v3109_v28  ;;  %v1999_v45 = vpop.f32.mrf.mxu1  ;;  %3573 = vmatmul.msk.f32.gmra.mxu0 %vm432_vm0, %v2679_v32  ;;  %v2131_v61 = vld [vmem:[#allocation2 + $0x150] sm:$0xff] }
 0x236   : > { %v2905_v27 = vadd.f32 %v2819_v7, %v2630_v53  ;;  %3507 = vmatmul.msk.f32.gmra.mxu2 %vm432_vm0, %v2129_v2  ;;  %v2081_v28 = vadd.f32 %v1999_v45, %v5049_v33  ;;  %v2406_v2 = vld [vmem:[#allocation2 + $0x151] sm:$0xff] }
 0x237   : > { %3540 = vmatmul.msk.f32.gmra.mxu3 %vm432_vm0, %v2404_v39  ;;  %v5050_v39 = vld [vmem:[#allocation41_spill] sm:$0xff] }
 0x238   : > { %v2941_v42 = vadd.f32 %v4662_v51, %v2905_v27  ;;  %3475 = vmatmul.msk.f32.gmra.mxu1 %vm432_vm0, %v2678_v8 }
 0x239   : > { %v2272_v47 = vpop.f32.mrf.mxu2 }
 0x23a   : > { %2973 = vst.msk [vmem:[%s4673_s17 + $0x28] sm:$0xff] %vm432_vm0, %v2941_v42  ;;  %v3009_v1 = vsel %vm432_vm0, %v2941_v42, 0.0  ;;  %v3076_v24 = vmul.f32 %v2941_v42, %v2941_v42  ;;  %v2356_v6 = vadd.f32 %v2272_v47, %v2080_v0  ;;  %v2547_v44 = vpop.f32.mrf.mxu3  ;;  %v2825_v4 = vpop.f32.mrf.mxu0 }
 0x23b   : > { %v3010_v63 = vadd.f32 %v3009_v1, %v3008_v52 }
 0x23c   : > { %v3112_v7 = vsel %vm432_vm0, %v3076_v24, 0.0  ;;  %v2631_v35 = vadd.f32 %v2547_v44, %v2356_v6  ;;  %v2682_v24 = vld [vmem:[#allocation2 + $0x15a] sm:$0xff] }
 0x23d   : > { %v3113_v56 = vadd.f32 %v3112_v7, %v3111_v37  ;;  %v2002_v57 = vpop.f32.mrf.mxu1  ;;  %3574 = vmatmul.msk.f32.gmra.mxu0 %vm432_vm0, %v2680_v19  ;;  %v2132_v44 = vld [vmem:[#allocation2 + $0x158] sm:$0xff] }
 0x23e   : > { %v2906_v8 = vadd.f32 %v2822_v15, %v2631_v35  ;;  %3508 = vmatmul.msk.f32.gmra.mxu2 %vm432_vm0, %v2130_v20  ;;  %v2082_v37 = vadd.f32 %v2002_v57, %v5050_v39  ;;  %v2407_v20 = vld [vmem:[#allocation2 + $0x159] sm:$0xff] }
 0x23f   : > { %3541 = vmatmul.msk.f32.gmra.mxu3 %vm432_vm0, %v2405_v46 }
 0x240   : > { %v2942_v50 = vadd.f32 %v4662_v51, %v2906_v8  ;;  %3476 = vmatmul.msk.f32.gmra.mxu1 %vm432_vm0, %v2679_v32 }
 0x241   : > { %v2275_v54 = vpop.f32.mrf.mxu2 }
 0x242   : > { %2974 = vst.msk [vmem:[%s4673_s17 + $0x30] sm:$0xff] %vm432_vm0, %v2942_v50  ;;  %v3011_v38 = vsel %vm432_vm0, %v2942_v50, 0.0  ;;  %v3077_v34 = vmul.f32 %v2942_v50, %v2942_v50  ;;  %v2357_v10 = vadd.f32 %v2275_v54, %v2081_v28  ;;  %v2550_v58 = vpop.f32.mrf.mxu3  ;;  %v2828_v59 = vpop.f32.mrf.mxu0 }
 0x243   : > { %v3012_v40 = vadd.f32 %v3011_v38, %v3010_v63  ;;  %v2683_v38 = vld [vmem:[#allocation2 + $0x16a] sm:$0xff] }
 0x244   : > { %v3114_v15 = vsel %vm432_vm0, %v3077_v34, 0.0  ;;  %v2632_v52 = vadd.f32 %v2550_v58, %v2357_v10  ;;  %v2133_v10 = vld [vmem:[#allocation2 + $0x168] sm:$0xff] }
 0x245   : > { %v3115_v31 = vadd.f32 %v3114_v15, %v3113_v56  ;;  %v2005_v53 = vpop.f32.mrf.mxu1  ;;  %3575 = vmatmul.msk.f32.gmra.mxu0 %vm432_vm0, %v2681_v17 }
 0x246   : > { %v2907_v32 = vadd.f32 %v2825_v4, %v2632_v52  ;;  %3509 = vmatmul.msk.f32.gmra.mxu2 %vm432_vm0, %v2131_v61  ;;  %v2083_v46 = vadd.f32 %v2005_v53, %v4439_v14 }
 0x247   : > { %3542 = vmatmul.msk.f32.gmra.mxu3 %vm432_vm0, %v2406_v2 }
 0x248   : > { %v2943_v45 = vadd.f32 %v4662_v51, %v2907_v32  ;;  %3477 = vmatmul.msk.f32.gmra.mxu1 %vm432_vm0, %v2680_v19 }
 0x249   : > { %v2278_v27 = vpop.f32.mrf.mxu2 }
 0x24a   : > { %2975 = vst.msk [vmem:[%s4673_s17 + $0x38] sm:$0xff] %vm432_vm0, %v2943_v45  ;;  %v3013_v13 = vsel %vm432_vm0, %v2943_v45, 0.0  ;;  %v3078_v0 = vmul.f32 %v2943_v45, %v2943_v45  ;;  %v2358_v42 = vadd.f32 %v2278_v27, %v2082_v37  ;;  %v2553_v47 = vpop.f32.mrf.mxu3  ;;  %v2831_v1 = vpop.f32.mrf.mxu0  ;;  %v2684_v45 = vld [vmem:[#allocation2 + $0x172] sm:$0xff] }
 0x24b   : > { %v3014_v6 = vadd.f32 %v3013_v13, %v3012_v40  ;;  %v2134_v13 = vld [vmem:[#allocation2 + $0x170] sm:$0xff] }
 0x24c   : > { %v3116_v4 = vsel %vm432_vm0, %v3078_v0, 0.0  ;;  %v2633_v63 = vadd.f32 %v2553_v47, %v2358_v42  ;;  %v2409_v42 = vld [vmem:[#allocation2 + $0x171] sm:$0xff] }
 0x24d   : > { %v3117_v7 = vadd.f32 %v3116_v4, %v3115_v31  ;;  %v2008_v35 = vpop.f32.mrf.mxu1  ;;  %3576 = vmatmul.msk.f32.gmra.mxu0 %vm432_vm0, %v2682_v24 }
 0x24e   : > { %v2908_v19 = vadd.f32 %v2828_v59, %v2633_v63  ;;  %3510 = vmatmul.msk.f32.gmra.mxu2 %vm432_vm0, %v2132_v44  ;;  %v2408_v59 = vld [vmem:[#allocation2 + $0x169] sm:$0xff]  ;;  %v2084_v15 = vadd.f32 %v2008_v35, %v4448_v21 }
 0x24f   : > { %3543 = vmatmul.msk.f32.gmra.mxu3 %vm432_vm0, %v2407_v20 }
 0x250   : > { %v2944_v56 = vadd.f32 %v4662_v51, %v2908_v19  ;;  %3478 = vmatmul.msk.f32.gmra.mxu1 %vm432_vm0, %v2681_v17 }
 0x251   : > { %v2281_v57 = vpop.f32.mrf.mxu2 }
 0x252   : > { %2976 = vst.msk [vmem:[%s4673_s17 + $0x40] sm:$0xff] %vm432_vm0, %v2944_v56  ;;  %v3015_v8 = vsel %vm432_vm0, %v2944_v56, 0.0  ;;  %v3079_v33 = vmul.f32 %v2944_v56, %v2944_v56  ;;  %v2359_v28 = vadd.f32 %v2281_v57, %v2083_v46  ;;  %v2556_v50 = vpop.f32.mrf.mxu3  ;;  %v2834_v54 = vpop.f32.mrf.mxu0  ;;  %v2685_v46 = vld [vmem:[#allocation2 + $0x182] sm:$0xff] }
 0x253   : > { %v3016_v34 = vadd.f32 %v3015_v8, %v3014_v6  ;;  %v2135_v57 = vld [vmem:[#allocation2 + $0x180] sm:$0xff] }
 0x254   : > { %v3118_v58 = vsel %vm432_vm0, %v3079_v33, 0.0  ;;  %v2634_v14 = vadd.f32 %v2556_v50, %v2359_v28  ;;  %v2410_v33 = vld [vmem:[#allocation2 + $0x181] sm:$0xff] }
 0x255   : > { %v3119_v40 = vadd.f32 %v3118_v58, %v3117_v7  ;;  %v2011_v61 = vpop.f32.mrf.mxu1  ;;  %3577 = vmatmul.msk.f32.gmra.mxu0 %vm432_vm0, %v2683_v38 }
 0x256   : > { %v2909_v17 = vadd.f32 %v2831_v1, %v2634_v14  ;;  %3511 = vmatmul.msk.f32.gmra.mxu2 %vm432_vm0, %v2133_v10  ;;  %v2085_v6 = vadd.f32 %v2011_v61, %v4456_v36 }
 0x257   : > { %3544 = vmatmul.msk.f32.gmra.mxu3 %vm432_vm0, %v2408_v59 }
 0x258   : > { %v2945_v52 = vadd.f32 %v4662_v51, %v2909_v17  ;;  %3479 = vmatmul.msk.f32.gmra.mxu1 %vm432_vm0, %v2682_v24  ;;  %v2686_v17 = vld [vmem:[#allocation2 + $0x18a] sm:$0xff] }
 0x259   : > { %v2284_v2 = vpop.f32.mrf.mxu2 }
 0x25a   : > { %2977 = vst.msk [vmem:[%s4673_s17 + $0x48] sm:$0xff] %vm432_vm0, %v2945_v52  ;;  %v3017_v31 = vsel %vm432_vm0, %v2945_v52, 0.0  ;;  %v3080_v53 = vmul.f32 %v2945_v52, %v2945_v52  ;;  %v2360_v32 = vadd.f32 %v2284_v2, %v2084_v15  ;;  %v2559_v39 = vpop.f32.mrf.mxu3  ;;  %v2837_v37 = vpop.f32.mrf.mxu0  ;;  %v2136_v52 = vld [vmem:[#allocation2 + $0x188] sm:$0xff] }
 0x25b   : > { %v3018_v27 = vadd.f32 %v3017_v31, %v3016_v34  ;;  %v2411_v31 = vld [vmem:[#allocation2 + $0x189] sm:$0xff] }
 0x25c   : > { %v3120_v0 = vsel %vm432_vm0, %v3080_v53, 0.0  ;;  %v2635_v21 = vadd.f32 %v2559_v39, %v2360_v32 }
 0x25d   : > { %v3121_v47 = vadd.f32 %v3120_v0, %v3119_v40  ;;  %v2014_v1 = vpop.f32.mrf.mxu1  ;;  %3578 = vmatmul.msk.f32.gmra.mxu0 %vm432_vm0, %v2684_v45 }
 0x25e   : > { %v2910_v24 = vadd.f32 %v2834_v54, %v2635_v21  ;;  %3512 = vmatmul.msk.f32.gmra.mxu2 %vm432_vm0, %v2134_v13 }
 0x25f   : > { %3545 = vmatmul.msk.f32.gmra.mxu3 %vm432_vm0, %v2409_v42 }
 0x260   : > { %v2946_v44 = vadd.f32 %v4662_v51, %v2910_v24  ;;  %3480 = vmatmul.msk.f32.gmra.mxu1 %vm432_vm0, %v2683_v38  ;;  %v2086_v38 = vadd.f32 %v2014_v1, %v4464_v43  ;;  %v2687_v1 = vld [vmem:[#allocation2 + $0x19a] sm:$0xff] }
 0x261   : > { %v2287_v4 = vpop.f32.mrf.mxu2 }
 0x262   : > { %2978 = vst.msk [vmem:[%s4673_s17 + $0x50] sm:$0xff] %vm432_vm0, %v2946_v44  ;;  %v3019_v63 = vsel %vm432_vm0, %v2946_v44, 0.0  ;;  %v3081_v20 = vmul.f32 %v2946_v44, %v2946_v44  ;;  %v2361_v7 = vadd.f32 %v2287_v4, %v2085_v6  ;;  %v2562_v35 = vpop.f32.mrf.mxu3  ;;  %v2840_v19 = vpop.f32.mrf.mxu0  ;;  %v2137_v6 = vld [vmem:[#allocation2 + $0x198] sm:$0xff] }
 0x263   : > { %v3020_v56 = vadd.f32 %v3019_v63, %v3018_v27  ;;  %v2412_v4 = vld [vmem:[#allocation2 + $0x199] sm:$0xff] }
 0x264   : > { %v3122_v8 = vsel %vm432_vm0, %v3081_v20, 0.0  ;;  %v2636_v36 = vadd.f32 %v2562_v35, %v2361_v7 }
 0x265   : > { %v3123_v28 = vadd.f32 %v3122_v8, %v3121_v47  ;;  %v2017_v50 = vpop.f32.mrf.mxu1  ;;  %3579 = vmatmul.msk.f32.gmra.mxu0 %vm432_vm0, %v2685_v46 }
 0x266   : > { %v2911_v54 = vadd.f32 %v2837_v37, %v2636_v36  ;;  %3513 = vmatmul.msk.f32.gmra.mxu2 %vm432_vm0, %v2135_v57  ;;  %v2087_v37 = vadd.f32 %v2017_v50, %v4471_v48 }
 0x267   : > { %3546 = vmatmul.msk.f32.gmra.mxu3 %vm432_vm0, %v2410_v33 }
 0x268   : > { %v2947_v34 = vadd.f32 %v4662_v51, %v2911_v54  ;;  %3481 = vmatmul.msk.f32.gmra.mxu1 %vm432_vm0, %v2684_v45  ;;  %v2138_v54 = vld [vmem:[#allocation2 + $0x1a0] sm:$0xff] }
 0x269   : > { %v2290_v10 = vpop.f32.mrf.mxu2 }
 0x26a   : > { %2979 = vst.msk [vmem:[%s4673_s17 + $0x58] sm:$0xff] %vm432_vm0, %v2947_v34  ;;  %v3021_v58 = vsel %vm432_vm0, %v2947_v34, 0.0  ;;  %v3082_v14 = vmul.f32 %v2947_v34, %v2947_v34  ;;  %v2362_v59 = vadd.f32 %v2290_v10, %v2086_v38  ;;  %v2565_v40 = vpop.f32.mrf.mxu3  ;;  %v2843_v61 = vpop.f32.mrf.mxu0  ;;  %v2413_v34 = vld [vmem:[#allocation2 + $0x1a1] sm:$0xff] }
 0x26b   : > { %v3022_v15 = vadd.f32 %v3021_v58, %v3020_v56 }
 0x26c   : > { %v3124_v2 = vsel %vm432_vm0, %v3082_v14, 0.0  ;;  %v2637_v43 = vadd.f32 %v2565_v40, %v2362_v59 }
 0x26d   : > { %v3125_v53 = vadd.f32 %v3124_v2, %v3123_v28  ;;  %v2020_v32 = vpop.f32.mrf.mxu1  ;;  %3580 = vmatmul.msk.f32.gmra.mxu0 %vm432_vm0, %v2686_v17  ;;  %v2688_v28 = vld [vmem:[#allocation2 + $0x1a2] sm:$0xff] }
 0x26e   : > { %v2912_v39 = vadd.f32 %v2840_v19, %v2637_v43  ;;  %3514 = vmatmul.msk.f32.gmra.mxu2 %vm432_vm0, %v2136_v52  ;;  %v2088_v35 = vadd.f32 %v2020_v32, %v4478_v12 }
 0x26f   : > { %3547 = vmatmul.msk.f32.gmra.mxu3 %vm432_vm0, %v2411_v31 }
 0x270   : > { %v2948_v45 = vadd.f32 %v4662_v51, %v2912_v39  ;;  %3482 = vmatmul.msk.f32.gmra.mxu1 %vm432_vm0, %v2685_v46 }
 0x271   : > { %v2293_v27 = vpop.f32.mrf.mxu2 }
 0x272   : > { %2980 = vst.msk [vmem:[%s4673_s17 + $0x60] sm:$0xff] %vm432_vm0, %v2948_v45  ;;  %v3023_v13 = vsel %vm432_vm0, %v2948_v45, 0.0  ;;  %v3083_v0 = vmul.f32 %v2948_v45, %v2948_v45  ;;  %v2363_v21 = vadd.f32 %v2293_v27, %v2087_v37  ;;  %v2568_v42 = vpop.f32.mrf.mxu3  ;;  %v2846_v47 = vpop.f32.mrf.mxu0 }
 0x273   : > { %v3024_v24 = vadd.f32 %v3023_v13, %v3022_v15 }
 0x274   : > { %v3126_v44 = vsel %vm432_vm0, %v3083_v0, 0.0  ;;  %v2638_v48 = vadd.f32 %v2568_v42, %v2363_v21 }
 0x275   : > { %v3127_v63 = vadd.f32 %v3126_v44, %v3125_v53  ;;  %v2023_v20 = vpop.f32.mrf.mxu1  ;;  %3581 = vmatmul.msk.f32.gmra.mxu0 %vm432_vm0, %v2687_v1 }
 0x276   : > { %v2913_v7 = vadd.f32 %v2843_v61, %v2638_v48  ;;  %3515 = vmatmul.msk.f32.gmra.mxu2 %vm432_vm0, %v2137_v6  ;;  %v2089_v59 = vadd.f32 %v2023_v20, %v4487_v18 }
 0x277   : > { %3548 = vmatmul.msk.f32.gmra.mxu3 %vm432_vm0, %v2412_v4 }
 0x278   : > { %v2949_v19 = vadd.f32 %v4662_v51, %v2913_v7  ;;  %3483 = vmatmul.msk.f32.gmra.mxu1 %vm432_vm0, %v2686_v17 }
 0x279   : > { %v2296_v46 = vpop.f32.mrf.mxu2 }
 0x27a   : > { %2981 = vst.msk [vmem:[%s4673_s17 + $0x68] sm:$0xff] %vm432_vm0, %v2949_v19  ;;  %v3025_v56 = vsel %vm432_vm0, %v2949_v19, 0.0  ;;  %v3084_v57 = vmul.f32 %v2949_v19, %v2949_v19  ;;  %v2364_v8 = vadd.f32 %v2296_v46, %v2088_v35  ;;  %v2571_v36 = vpop.f32.mrf.mxu3  ;;  %v2849_v33 = vpop.f32.mrf.mxu0 }
 0x27b   : > { %v3026_v50 = vadd.f32 %v3025_v56, %v3024_v24 }
 0x27c   : > { %v3128_v38 = vsel %vm432_vm0, %v3084_v57, 0.0  ;;  %v2639_v12 = vadd.f32 %v2571_v36, %v2364_v8 }
 0x27d   : > { %v3129_v10 = vadd.f32 %v3128_v38, %v3127_v63  ;;  %v2026_v58 = vpop.f32.mrf.mxu1  ;;  %3582 = vmatmul.msk.f32.gmra.mxu0 %vm432_vm0, %v2688_v28 }
 0x27e   : > { %v2914_v14 = vadd.f32 %v2846_v47, %v2639_v12  ;;  %3516 = vmatmul.msk.f32.gmra.mxu2 %vm432_vm0, %v2138_v54  ;;  %v2090_v18 = vadd.f32 %v2026_v58, %v4498_v29 }
 0x27f   : > { %3549 = vmatmul.msk.f32.gmra.mxu3 %vm432_vm0, %v2413_v34 }
 0x280   : > { %v2950_v40 = vadd.f32 %v4662_v51, %v2914_v14 }
 0x281   : > { %v2299_v61 = vpop.f32.mrf.mxu2 }
 0x282   : > { %2982 = vst.msk [vmem:[%s4673_s17 + $0x70] sm:$0xff] %vm432_vm0, %v2950_v40  ;;  %v3027_v17 = vsel %vm432_vm0, %v2950_v40, 0.0  ;;  %v3085_v15 = vmul.f32 %v2950_v40, %v2950_v40  ;;  %v2365_v52 = vadd.f32 %v2299_v61, %v2089_v59  ;;  %v2574_v2 = vpop.f32.mrf.mxu3  ;;  %v2852_v43 = vpop.f32.mrf.mxu0 }
 0x283   : > { %v3028_v31 = vadd.f32 %v3027_v17, %v3026_v50 }
 0x284   : > { %v3130_v53 = vsel %vm432_vm0, %v3085_v15, 0.0  ;;  %v2640_v32 = vadd.f32 %v2574_v2, %v2365_v52 }
 0x285   : > { %v3131_v39 = vadd.f32 %v3130_v53, %v3129_v10  ;;  %v2029_v37 = vpop.f32.mrf.mxu1 }
 0x286   : > { %v2915_v45 = vadd.f32 %v2849_v33, %v2640_v32  ;;  %v2091_v29 = vadd.f32 %v2029_v37, %v4509_v23 }
 0x288   : > { %v2951_v27 = vadd.f32 %v4662_v51, %v2915_v45 }
 0x289   : > { %v2302_v13 = vpop.f32.mrf.mxu2 }
 0x28a   : > { %2983 = vst.msk [vmem:[%s4673_s17 + $0x78] sm:$0xff] %vm432_vm0, %v2951_v27  ;;  %v3029_v0 = vsel %vm432_vm0, %v2951_v27, 0.0  ;;  %v3086_v21 = vmul.f32 %v2951_v27, %v2951_v27  ;;  %v2366_v42 = vadd.f32 %v2302_v13, %v2090_v18  ;;  %v2577_v47 = vpop.f32.mrf.mxu3  ;;  %v2855_v1 = vpop.f32.mrf.mxu0 }
 0x28b   : > { %v3030_v24 = vadd.f32 %v3029_v0, %v3028_v31 }
 0x28c   : > { %v3132_v6 = vsel %vm432_vm0, %v3086_v21, 0.0  ;;  %v2641_v44 = vadd.f32 %v2577_v47, %v2366_v42 }
 0x28d   : > { %v3133_v48 = vadd.f32 %v3132_v6, %v3131_v39  ;;  %v2032_v4 = vpop.f32.mrf.mxu1 }
 0x28e   : > { %v2916_v63 = vadd.f32 %v2852_v43, %v2641_v44  ;;  %v2092_v23 = vadd.f32 %v2032_v4, %v4520_v9 }
 0x290   : > { %v2952_v20 = vadd.f32 %v4662_v51, %v2916_v63 }
 0x291   : > { %v2305_v7 = vpop.f32.mrf.mxu2 }
 0x292   : > { %2984 = vst.msk [vmem:[%s4673_s17 + $0x80] sm:$0xff] %vm432_vm0, %v2952_v20  ;;  %v3031_v35 = vsel %vm432_vm0, %v2952_v20, 0.0  ;;  %v3087_v19 = vmul.f32 %v2952_v20, %v2952_v20  ;;  %v2367_v46 = vadd.f32 %v2305_v7, %v2091_v29  ;;  %v2580_v56 = vpop.f32.mrf.mxu3  ;;  %v2858_v57 = vpop.f32.mrf.mxu0 }
 0x293   : > { %v3032_v8 = vadd.f32 %v3031_v35, %v3030_v24 }
 0x294   : > { %v3134_v36 = vsel %vm432_vm0, %v3087_v19, 0.0  ;;  %v2642_v33 = vadd.f32 %v2580_v56, %v2367_v46 }
 0x295   : > { %v3135_v28 = vadd.f32 %v3134_v36, %v3133_v48  ;;  %v2035_v50 = vpop.f32.mrf.mxu1 }
 0x296   : > { %v2917_v54 = vadd.f32 %v2855_v1, %v2642_v33  ;;  %v2093_v9 = vadd.f32 %v2035_v50, %v4531_v16 }
 0x298   : > { %v2953_v38 = vadd.f32 %v4662_v51, %v2917_v54 }
 0x299   : > { %v2308_v12 = vpop.f32.mrf.mxu2 }
 0x29a   : > { %2985 = vst.msk [vmem:[%s4673_s17 + $0x88] sm:$0xff] %vm432_vm0, %v2953_v38  ;;  %v3033_v34 = vsel %vm432_vm0, %v2953_v38, 0.0  ;;  %v3088_v10 = vmul.f32 %v2953_v38, %v2953_v38  ;;  %v2368_v58 = vadd.f32 %v2308_v12, %v2092_v23  ;;  %v2583_v14 = vpop.f32.mrf.mxu3  ;;  %v2861_v59 = vpop.f32.mrf.mxu0 }
 0x29b   : > { %v3034_v40 = vadd.f32 %v3033_v34, %v3032_v8 }
 0x29c   : > { %v3136_v61 = vsel %vm432_vm0, %v3088_v10, 0.0  ;;  %v2643_v17 = vadd.f32 %v2583_v14, %v2368_v58 }
 0x29d   : > { %v3137_v15 = vadd.f32 %v3136_v61, %v3135_v28  ;;  %v2038_v52 = vpop.f32.mrf.mxu1 }
 0x29e   : > { %v2918_v2 = vadd.f32 %v2858_v57, %v2643_v17  ;;  %v2094_v16 = vadd.f32 %v2038_v52, %v4541_v55 }
 0x2a0   : > { %v2954_v43 = vadd.f32 %v4662_v51, %v2918_v2 }
 0x2a1   : > { %v2311_v31 = vpop.f32.mrf.mxu2 }
 0x2a2   : > { %2986 = vst.msk [vmem:[%s4673_s17 + $0x90] sm:$0xff] %vm432_vm0, %v2954_v43  ;;  %v3035_v53 = vsel %vm432_vm0, %v2954_v43, 0.0  ;;  %v3089_v32 = vmul.f32 %v2954_v43, %v2954_v43  ;;  %v2369_v39 = vadd.f32 %v2311_v31, %v2093_v9  ;;  %v2586_v37 = vpop.f32.mrf.mxu3  ;;  %v2864_v45 = vpop.f32.mrf.mxu0 }
 0x2a3   : > { %v3036_v18 = vadd.f32 %v3035_v53, %v3034_v40 }
 0x2a4   : > { %v3138_v27 = vsel %vm432_vm0, %v3089_v32, 0.0  ;;  %v2644_v13 = vadd.f32 %v2586_v37, %v2369_v39 }
 0x2a5   : > { %v3139_v0 = vadd.f32 %v3138_v27, %v3137_v15  ;;  %v2041_v21 = vpop.f32.mrf.mxu1 }
 0x2a6   : > { %v2919_v42 = vadd.f32 %v2861_v59, %v2644_v13  ;;  %v2095_v55 = vadd.f32 %v2041_v21, %v4551_v11 }
 0x2a8   : > { %v2955_v47 = vadd.f32 %v4662_v51, %v2919_v42 }
 0x2a9   : > { %v2314_v1 = vpop.f32.mrf.mxu2 }
 0x2aa   : > { %2987 = vst.msk [vmem:[%s4673_s17 + $0x98] sm:$0xff] %vm432_vm0, %v2955_v47  ;;  %v3037_v24 = vsel %vm432_vm0, %v2955_v47, 0.0  ;;  %v3090_v6 = vmul.f32 %v2955_v47, %v2955_v47  ;;  %v2370_v44 = vadd.f32 %v2314_v1, %v2094_v16  ;;  %v2589_v48 = vpop.f32.mrf.mxu3  ;;  %v2867_v4 = vpop.f32.mrf.mxu0 }
 0x2ab   : > { %v3038_v63 = vadd.f32 %v3037_v24, %v3036_v18 }
 0x2ac   : > { %v3140_v29 = vsel %vm432_vm0, %v3090_v6, 0.0  ;;  %v2645_v20 = vadd.f32 %v2589_v48, %v2370_v44 }
 0x2ad   : > { %v3141_v7 = vadd.f32 %v3140_v29, %v3139_v0  ;;  %v2044_v35 = vpop.f32.mrf.mxu1 }
 0x2ae   : > { %v2920_v19 = vadd.f32 %v2864_v45, %v2645_v20  ;;  %v2096_v11 = vadd.f32 %v2044_v35, %v4561_v60 }
 0x2b0   : > { %v2956_v46 = vadd.f32 %v4662_v51, %v2920_v19 }
 0x2b1   : > { %v2317_v56 = vpop.f32.mrf.mxu2 }
 0x2b2   : > { %2988 = vst.msk [vmem:[%s4673_s17 + $0xa0] sm:$0xff] %vm432_vm0, %v2956_v46  ;;  %v3039_v57 = vsel %vm432_vm0, %v2956_v46, 0.0  ;;  %v3091_v8 = vmul.f32 %v2956_v46, %v2956_v46  ;;  %v2371_v36 = vadd.f32 %v2317_v56, %v2095_v55  ;;  %v2592_v33 = vpop.f32.mrf.mxu3  ;;  %v2870_v28 = vpop.f32.mrf.mxu0 }
 0x2b3   : > { %v3040_v50 = vadd.f32 %v3039_v57, %v3038_v63 }
 0x2b4   : > { %v3142_v54 = vsel %vm432_vm0, %v3091_v8, 0.0  ;;  %v2646_v23 = vadd.f32 %v2592_v33, %v2371_v36 }
 0x2b5   : > { %v3143_v38 = vadd.f32 %v3142_v54, %v3141_v7  ;;  %v2047_v12 = vpop.f32.mrf.mxu1 }
 0x2b6   : > { %v2921_v34 = vadd.f32 %v2867_v4, %v2646_v23  ;;  %v2097_v60 = vadd.f32 %v2047_v12, %v4571_v30 }
 0x2b8   : > { %v2957_v10 = vadd.f32 %v4662_v51, %v2921_v34 }
 0x2b9   : > { %v2320_v58 = vpop.f32.mrf.mxu2 }
 0x2ba   : > { %2989 = vst.msk [vmem:[%s4673_s17 + $0xa8] sm:$0xff] %vm432_vm0, %v2957_v10  ;;  %v3041_v14 = vsel %vm432_vm0, %v2957_v10, 0.0  ;;  %v3092_v59 = vmul.f32 %v2957_v10, %v2957_v10  ;;  %v2372_v40 = vadd.f32 %v2320_v58, %v2096_v11  ;;  %v2595_v61 = vpop.f32.mrf.mxu3  ;;  %v2873_v17 = vpop.f32.mrf.mxu0 }
 0x2bb   : > { %v3042_v15 = vadd.f32 %v3041_v14, %v3040_v50 }
 0x2bc   : > { %v3144_v52 = vsel %vm432_vm0, %v3092_v59, 0.0  ;;  %v2647_v2 = vadd.f32 %v2595_v61, %v2372_v40 }
 0x2bd   : > { %v3145_v9 = vadd.f32 %v3144_v52, %v3143_v38  ;;  %v2050_v43 = vpop.f32.mrf.mxu1 }
 0x2be   : > { %v2922_v31 = vadd.f32 %v2870_v28, %v2647_v2  ;;  %v2098_v30 = vadd.f32 %v2050_v43, %v4581_v3 }
 0x2c0   : > { %v2958_v53 = vadd.f32 %v4662_v51, %v2922_v31 }
 0x2c1   : > { %v2323_v32 = vpop.f32.mrf.mxu2 }
 0x2c2   : > { %2990 = vst.msk [vmem:[%s4673_s17 + $0xb0] sm:$0xff] %vm432_vm0, %v2958_v53  ;;  %v3043_v39 = vsel %vm432_vm0, %v2958_v53, 0.0  ;;  %v3093_v37 = vmul.f32 %v2958_v53, %v2958_v53  ;;  %v2373_v45 = vadd.f32 %v2323_v32, %v2097_v60  ;;  %v2598_v18 = vpop.f32.mrf.mxu3  ;;  %v2876_v27 = vpop.f32.mrf.mxu0 }
 0x2c3   : > { %v3044_v13 = vadd.f32 %v3043_v39, %v3042_v15 }
 0x2c4   : > { %v3146_v0 = vsel %vm432_vm0, %v3093_v37, 0.0  ;;  %v2648_v21 = vadd.f32 %v2598_v18, %v2373_v45 }
 0x2c5   : > { %v3147_v42 = vadd.f32 %v3146_v0, %v3145_v9  ;;  %v2053_v16 = vpop.f32.mrf.mxu1 }
 0x2c6   : > { %v2923_v47 = vadd.f32 %v2873_v17, %v2648_v21  ;;  %v2099_v3 = vadd.f32 %v2053_v16, %v4591_v22 }
 0x2c8   : > { %v2959_v1 = vadd.f32 %v4662_v51, %v2923_v47 }
 0x2c9   : > { %v2326_v24 = vpop.f32.mrf.mxu2 }
 0x2ca   : > { %2991 = vst.msk [vmem:[%s4673_s17 + $0xb8] sm:$0xff] %vm432_vm0, %v2959_v1  ;;  %v3045_v6 = vsel %vm432_vm0, %v2959_v1, 0.0  ;;  %v3094_v44 = vmul.f32 %v2959_v1, %v2959_v1  ;;  %v2374_v48 = vadd.f32 %v2326_v24, %v2098_v30  ;;  %v2601_v4 = vpop.f32.mrf.mxu3  ;;  %v2879_v63 = vpop.f32.mrf.mxu0 }
 0x2cb   : > { %v3046_v29 = vadd.f32 %v3045_v6, %v3044_v13 }
 0x2cc   : > { %v3148_v20 = vsel %vm432_vm0, %v3094_v44, 0.0  ;;  %v2649_v7 = vadd.f32 %v2601_v4, %v2374_v48 }
 0x2cd   : > { %v3149_v35 = vadd.f32 %v3148_v20, %v3147_v42  ;;  %v2056_v19 = vpop.f32.mrf.mxu1 }
 0x2ce   : > { %v2924_v55 = vadd.f32 %v2876_v27, %v2649_v7  ;;  %v2100_v22 = vadd.f32 %v2056_v19, %v4601_v49 }
 0x2d0   : > { %v2960_v46 = vadd.f32 %v4662_v51, %v2924_v55 }
 0x2d1   : > { %v2329_v56 = vpop.f32.mrf.mxu2 }
 0x2d2   : > { %2992 = vst.msk [vmem:[%s4673_s17 + $0xc0] sm:$0xff] %vm432_vm0, %v2960_v46  ;;  %v3047_v57 = vsel %vm432_vm0, %v2960_v46, 0.0  ;;  %v3095_v8 = vmul.f32 %v2960_v46, %v2960_v46  ;;  %v2375_v36 = vadd.f32 %v2329_v56, %v2099_v3  ;;  %v2604_v33 = vpop.f32.mrf.mxu3  ;;  %v2882_v28 = vpop.f32.mrf.mxu0 }
 0x2d3   : > { %v3048_v50 = vadd.f32 %v3047_v57, %v3046_v29 }
 0x2d4   : > { %v3150_v54 = vsel %vm432_vm0, %v3095_v8, 0.0  ;;  %v2650_v23 = vadd.f32 %v2604_v33, %v2375_v36 }
 0x2d5   : > { %v3151_v38 = vadd.f32 %v3150_v54, %v3149_v35  ;;  %v2059_v12 = vpop.f32.mrf.mxu1 }
 0x2d6   : > { %v2925_v34 = vadd.f32 %v2879_v63, %v2650_v23  ;;  %v2101_v49 = vadd.f32 %v2059_v12, %v4611_v25 }
 0x2d8   : > { %v2961_v11 = vadd.f32 %v4662_v51, %v2925_v34 }
 0x2d9   : > { %v2332_v10 = vpop.f32.mrf.mxu2 }
 0x2da   : > { %2993 = vst.msk [vmem:[%s4673_s17 + $0xc8] sm:$0xff] %vm432_vm0, %v2961_v11  ;;  %v3049_v58 = vsel %vm432_vm0, %v2961_v11, 0.0  ;;  %v3096_v14 = vmul.f32 %v2961_v11, %v2961_v11  ;;  %v2376_v59 = vadd.f32 %v2332_v10, %v2100_v22  ;;  %v2607_v40 = vpop.f32.mrf.mxu3  ;;  %v2885_v17 = vpop.f32.mrf.mxu0 }
 0x2db   : > { %v3050_v61 = vadd.f32 %v3049_v58, %v3048_v50 }
 0x2dc   : > { %v3152_v15 = vsel %vm432_vm0, %v3096_v14, 0.0  ;;  %v2651_v52 = vadd.f32 %v2607_v40, %v2376_v59 }
 0x2dd   : > { %v3153_v2 = vadd.f32 %v3152_v15, %v3151_v38  ;;  %v2062_v43 = vpop.f32.mrf.mxu1 }
 0x2de   : > { %v2926_v9 = vadd.f32 %v2882_v28, %v2651_v52  ;;  %v2102_v25 = vadd.f32 %v2062_v43, %v4621_v5 }
 0x2e0   : > { %v2962_v31 = vadd.f32 %v4662_v51, %v2926_v9 }
 0x2e1   : > { %v2335_v60 = vpop.f32.mrf.mxu2 }
 0x2e2   : > { %2994 = vst.msk [vmem:[%s4673_s17 + $0xd0] sm:$0xff] %vm432_vm0, %v2962_v31  ;;  %v3051_v53 = vsel %vm432_vm0, %v2962_v31, 0.0  ;;  %v3097_v32 = vmul.f32 %v2962_v31, %v2962_v31  ;;  %v2377_v39 = vadd.f32 %v2335_v60, %v2101_v49  ;;  %v2610_v37 = vpop.f32.mrf.mxu3  ;;  %v2888_v0 = vpop.f32.mrf.mxu0 }
 0x2e3   : > { %v3052_v45 = vadd.f32 %v3051_v53, %v3050_v61 }
 0x2e4   : > { %v3154_v18 = vsel %vm432_vm0, %v3097_v32, 0.0  ;;  %v2652_v27 = vadd.f32 %v2610_v37, %v2377_v39 }
 0x2e5   : > { %v3155_v13 = vadd.f32 %v3154_v18, %v3153_v2  ;;  %v2065_v47 = vpop.f32.mrf.mxu1 }
 0x2e6   : > { %v2927_v21 = vadd.f32 %v2885_v17, %v2652_v27  ;;  %v2103_v5 = vadd.f32 %v2065_v47, %v4631_v62 }
 0x2e8   : > { %v2963_v42 = vadd.f32 %v4662_v51, %v2927_v21  ;;  %v3604_v51 = vld [vmem:[%s4941_s2] ss:$0 sm:$0xff] }
 0x2e9   : > { %v2338_v16 = vpop.f32.mrf.mxu2 }
 0x2ea   : > { %2995 = vst.msk [vmem:[%s4673_s17 + $0xd8] sm:$0xff] %vm432_vm0, %v2963_v42  ;;  %v3053_v30 = vsel %vm432_vm0, %v2963_v42, 0.0  ;;  %v3098_v1 = vmul.f32 %v2963_v42, %v2963_v42  ;;  %v2378_v24 = vadd.f32 %v2338_v16, %v2102_v25  ;;  %v2613_v6 = vpop.f32.mrf.mxu3  ;;  %v2891_v20 = vpop.f32.mrf.mxu0 }
 0x2eb   : > { %v3054_v44 = vadd.f32 %v3053_v30, %v3052_v45 }
 0x2ec   : > { %v3156_v48 = vsel %vm432_vm0, %v3098_v1, 0.0  ;;  %v2653_v4 = vadd.f32 %v2613_v6, %v2378_v24 }
 0x2ed   : > { %v3157_v63 = vadd.f32 %v3156_v48, %v3155_v13  ;;  %v2068_v57 = vpop.f32.mrf.mxu1 }
 0x2ee   : > { %v2928_v29 = vadd.f32 %v2888_v0, %v2653_v4  ;;  %v2104_v28 = vadd.f32 %v2068_v57, %v4641_v26 }
 0x2f0   : > { %v2964_v7 = vadd.f32 %v3604_v51, %v2928_v29 }
 0x2f1   : > { %v2341_v35 = vpop.f32.mrf.mxu2 }
 0x2f2   : > { %2996 = vst.msk [vmem:[%s4673_s17 + $0xe0] sm:$0xff] %vm432_vm0, %v2964_v7  ;;  %v3055_v19 = vsel %vm432_vm0, %v2964_v7, 0.0  ;;  %v3099_v55 = vmul.f32 %v2964_v7, %v2964_v7  ;;  %v2379_v3 = vadd.f32 %v2341_v35, %v2103_v5  ;;  %v2616_v46 = vpop.f32.mrf.mxu3  ;;  %v2894_v23 = vpop.f32.mrf.mxu0 }
 0x2f3   : > { %v3056_v56 = vadd.f32 %v3055_v19, %v3054_v44 }
 0x2f4   : > { %v3158_v8 = vsel %vm432_vm0, %v3099_v55, 0.0  ;;  %v2654_v36 = vadd.f32 %v2616_v46, %v2379_v3 }
 0x2f5   : > { %v3159_v62 = vadd.f32 %v3158_v8, %v3157_v63  ;;  %v2071_v59 = vpop.f32.mrf.mxu1 }
 0x2f6   : > { %v2929_v33 = vadd.f32 %v2891_v20, %v2654_v36  ;;  %v2105_v26 = vadd.f32 %v2071_v59, %v4651_v41 }
 0x2f8   : > { %v2965_v50 = vadd.f32 %v3604_v51, %v2929_v33 }
 0x2f9   : > { %v2344_v54 = vpop.f32.mrf.mxu2 }
 0x2fa   : > { %2997 = vst.msk [vmem:[%s4673_s17 + $0xe8] sm:$0xff] %vm432_vm0, %v2965_v50  ;;  %v3057_v38 = vsel %vm432_vm0, %v2965_v50, 0.0  ;;  %v3100_v12 = vmul.f32 %v2965_v50, %v2965_v50  ;;  %v2380_v34 = vadd.f32 %v2344_v54, %v2104_v28  ;;  %v2619_v22 = vpop.f32.mrf.mxu3  ;;  %v2897_v49 = vpop.f32.mrf.mxu0 }
 0x2fb   : > { %v3058_v11 = vadd.f32 %v3057_v38, %v3056_v56 }
 0x2fc   : > { %v3160_v10 = vsel %vm432_vm0, %v3100_v12, 0.0  ;;  %v2655_v58 = vadd.f32 %v2619_v22, %v2380_v34 }
 0x2fd   : > { %v3161_v14 = vadd.f32 %v3160_v10, %v3159_v62 }
 0x2fe   : > { %v2930_v40 = vadd.f32 %v2894_v23, %v2655_v58 }
 0x300   : > { %v2966_v61 = vadd.f32 %v3604_v51, %v2930_v40 }
 0x301   : > { %v2347_v17 = vpop.f32.mrf.mxu2 }
 0x302   : > { %2998 = vst.msk [vmem:[%s4673_s17 + $0xf0] sm:$0xff] %vm432_vm0, %v2966_v61  ;;  %v3059_v15 = vsel %vm432_vm0, %v2966_v61, 0.0  ;;  %v3101_v52 = vmul.f32 %v2966_v61, %v2966_v61  ;;  %v2381_v2 = vadd.f32 %v2347_v17, %v2105_v26  ;;  %v2622_v9 = vpop.f32.mrf.mxu3 }
 0x303   : > { %v3060_v43 = vadd.f32 %v3059_v15, %v3058_v11 }
 0x304   : > { %v3162_v31 = vsel %vm432_vm0, %v3101_v52, 0.0  ;;  %v2656_v60 = vadd.f32 %v2622_v9, %v2381_v2 }
 0x305   : > { %v3163_v53 = vadd.f32 %v3162_v31, %v3161_v14 }
 0x306   : > { %v2931_v32 = vadd.f32 %v2897_v49, %v2656_v60 }
 0x308   : > { %v2967_v39 = vadd.f32 %v3604_v51, %v2931_v32 }
 0x30a   : > { %2999 = vst.msk [vmem:[%s4673_s17 + $0xf8] sm:$0xff] %vm432_vm0, %v2967_v39  ;;  %v3061_v41 = vsel %vm432_vm0, %v2967_v39, 0.0  ;;  %v3102_v37 = vmul.f32 %v2967_v39, %v2967_v39 }
 0x30b   : > { %v3062_v45 = vadd.f32 %v3061_v41, %v3060_v43 }
 0x30c   : > { %v3164_v18 = vsel %vm432_vm0, %v3102_v37, 0.0 }
 0x30d   : > { %v3063_v27 = vrot.slane %v3062_v45, 4  ;;  %v3165_v13 = vadd.f32 %v3164_v18, %v3163_v53 }
 0x30f   : > { %v3064_v0 = vadd.f32 %v3063_v27, %v3062_v45  ;;  %v3166_v21 = vrot.slane %v3165_v13, 4 }
 0x311   : > { %v3065_v25 = vrot.slane %v3064_v0, 2  ;;  %v3167_v42 = vadd.f32 %v3166_v21, %v3165_v13 }
 0x313   : > { %v3066_v16 = vadd.f32 %v3065_v25, %v3064_v0  ;;  %v3168_v47 = vrot.slane %v3167_v42, 2 }
 0x315   : > { %v3067_v30 = vrot.slane %v3066_v16, 1  ;;  %v3169_v1 = vadd.f32 %v3168_v47, %v3167_v42 }
 0x317   : > { %v3068_v24 = vadd.f32 %v3067_v30, %v3066_v16  ;;  %v3170_v6 = vrot.slane %v3169_v1, 1 }
 0x319   : > { %3070 = vst.msk [vmem:[%s292_s21] sm:$0x1] %vm3069_vm2, %v3068_v24  ;;  %v3171_v44 = vadd.f32 %v3170_v6, %v3169_v1 }
 0x31b   : > { %3172 = vst.msk [vmem:[%s295_s26] sm:$0x1] %vm3069_vm2, %v3171_v44 }
 0x31c PF: > { %s18_s24 = sadd.s32 1, %s3611_s24  }
 0x31d   : > { %p15_p4 = scmp.ge.s32.totalorder %s18_s24, 4  }
 0x31f   :  { %17 = sbr.rel (!%p15_p4) target bundleno = 1 (0x1), region = 104 }

</bundles_post_ra>
